<compile_context>
chip_gen: v6e
topology: v6e:2x2x1
jax: 0.10.0
libtpu: 0.0.40
codegen_flags: <defaults>
</compile_context>

<pallas_src>
import jax
import jax.numpy as jnp
from jax.experimental import pallas as pl
from jax.experimental.pallas import tpu as pltpu


# ---------------------------------------------------------------------------
# Fused conv3x3(pad=1) + folded BN(+bias) + ReLU + MaxPool2d(2) kernel
# ---------------------------------------------------------------------------
def _conv3x3_bn_relu_pool_kernel(x_ref, w_ref, scale_ref, shift_ref, o_ref,
                                 patch_ref):
    """One grid step = one image.

    x_ref     : (1, H+2, W+2, Cin)  bf16  padded NHWC input
    w_ref     : (9*Cin, Cout)       bf16  taps packed (kh, kw, cin) along K
    scale_ref : (1, Cout)           f32   folded BN scale
    shift_ref : (1, Cout)           f32   folded BN shift (+ conv bias)
    o_ref     : (1, Ho, Wo*Cout)    f32   2x2-max-pooled output, (wo,cout) on lanes
    patch_ref : (H*W, 9*Cin)        bf16  VMEM scratch for the im2col operand
    """
    _, hp2, wp2, cin = x_ref.shape
    h, w = hp2 - 2, wp2 - 2
    ho, wo_n = h // 2, w // 2
    cout = w_ref.shape[1]

    # --- im2col assembly in VMEM (never touches HBM) ------------------------
    x = x_ref[0]                                            # (H+2, W+2, Cin) bf16
    for kh in range(3):
        for kw in range(3):
            k = kh * 3 + kw
            patch_ref[:, k * cin:(k + 1) * cin] = (
                x[kh:kh + h, kw:kw + w, :].reshape(h * w, cin))

    # --- single MXU matmul: (H*W, 9*Cin) @ (9*Cin, Cout), fp32 accumulation -
    y = jnp.dot(patch_ref[...], w_ref[...],
                preferred_element_type=jnp.float32)          # (H*W, Cout) f32

    # --- folded BatchNorm (+ conv bias) + ReLU epilogue (fp32) ---------------
    y = jnp.maximum(y * scale_ref[...] + shift_ref[...], 0.0)

    # --- fused MaxPool2d(2) ---------------------------------------------------
    # W direction: rows of y are m = h*W + w, so adjacent-row pairs pool over w.
    t = y.reshape(h * wo_n, 2, cout)                         # minor dim unchanged
    yw = jnp.maximum(t[:, 0, :], t[:, 1, :])                 # (H*Wo, Cout)
    # H direction: rows are now h*Wo + wo; split h into (ho, parity*Wo + wo).
    u = yw.reshape(ho, 2 * wo_n, cout)                       # minor dim unchanged
    pooled = jnp.maximum(u[:, :wo_n, :], u[:, wo_n:, :])     # (Ho, Wo, Cout)

    # --- lane-packed store into the (1, Ho, Wo*Cout) output block ------------
    for wo in range(wo_n):
        o_ref[0, :, wo * cout:(wo + 1) * cout] = pooled[:, wo, :]


def conv2d_bn_relu_maxpool(x_nchw, w_packed, scale, shift):
    """Fused Conv2d(3x3, pad=1) + BatchNorm(eval) + ReLU + MaxPool2d(2); NCHW in/out."""
    B, cin, H, W = x_nchw.shape
    assert H % 2 == 0 and W % 2 == 0, "MaxPool2d(2) path requires even H and W"
    cout = w_packed.shape[-1]
    Ho, Wo = H // 2, W // 2

    # One layout change + one cast at the module boundary:
    # NCHW f32 -> padded NHWC bf16 (halves activation DMA bytes into the kernel).
    x = jnp.transpose(x_nchw, (0, 2, 3, 1)).astype(jnp.bfloat16)
    xp = jnp.pad(x, ((0, 0), (1, 1), (1, 1), (0, 0)))        # (B, H+2, W+2, Cin)

    out_flat = pl.pallas_call(
        _conv3x3_bn_relu_pool_kernel,
        out_shape=jax.ShapeDtypeStruct((B, Ho, Wo * cout), jnp.float32),
        grid=(B,),
        in_specs=[
            pl.BlockSpec((1, H + 2, W + 2, cin), lambda b: (b, 0, 0, 0)),
            pl.BlockSpec((9 * cin, cout), lambda b: (0, 0)),
            pl.BlockSpec((1, cout), lambda b: (0, 0)),
            pl.BlockSpec((1, cout), lambda b: (0, 0)),
        ],
        out_specs=pl.BlockSpec((1, Ho, Wo * cout), lambda b: (b, 0, 0)),
        scratch_shapes=[pltpu.VMEM((H * W, 9 * cin), jnp.bfloat16)],
        compiler_params=pltpu.CompilerParams(
            dimension_semantics=("parallel",),
            vmem_limit_bytes=32 * 1024 * 1024),
    )(xp, w_packed, scale, shift)

    # Free contiguous reshape + one transpose back to NCHW at the boundary.
    return jnp.transpose(out_flat.reshape(B, Ho, Wo, cout), (0, 3, 1, 2))


@jax.jit
def conv_2d_forward(x_nchw, params):
    return conv2d_bn_relu_maxpool(x_nchw, params['w'], params['scale'],
                                  params['shift'])


# ---------------------------------------------------------------------------
# Parameters (weights packed once; BN + conv bias folded once)
# ---------------------------------------------------------------------------
def init_params(key, in_channels, out_channels, eps=1e-5):
    kw_, kb, kg, kbe, km, kv = jax.random.split(key, 6)
    fan_in = in_channels * 9
    bound = 1.0 / (fan_in ** 0.5)
    w = jax.random.uniform(kw_, (out_channels, in_channels, 3, 3),
                           jnp.float32, -bound, bound)
    conv_b = jax.random.uniform(kb, (out_channels,), jnp.float32, -bound, bound)
    gamma = 1.0 + 0.02 * jax.random.normal(kg, (out_channels,), jnp.float32)
    beta = 0.02 * jax.random.normal(kbe, (out_channels,), jnp.float32)
    running_mean = 0.1 * jax.random.normal(km, (out_channels,), jnp.float32)
    running_var = jax.random.uniform(kv, (out_channels,), jnp.float32, 0.5, 1.5)

    # Done ONCE at init:
    # (Cout, Cin, 3, 3) -> (kh, kw, Cin, Cout) -> (9*Cin, Cout) bf16 MXU operand,
    # contraction index ordered (kh, kw, cin) to match the in-kernel im2col.
    w_packed = jnp.transpose(w, (2, 3, 1, 0)).reshape(9 * in_channels,
                                                      out_channels)
    # Fold conv bias + inference BatchNorm into per-channel scale/shift.
    scale = gamma / jnp.sqrt(running_var + eps)
    shift = beta + scale * (conv_b - running_mean)

    params = {
        'w': w_packed.astype(jnp.bfloat16),
        'scale': scale.reshape(1, out_channels).astype(jnp.float32),
        'shift': shift.reshape(1, out_channels).astype(jnp.float32),
    }
    raw = {'w': w, 'b': conv_b, 'gamma': gamma, 'beta': beta,
           'mean': running_mean, 'var': running_var, 'eps': eps}
    return params, raw


def reference_forward(x, raw):
    y = jax.lax.conv_general_dilated(
        x, raw['w'], window_strides=(1, 1), padding=((1, 1), (1, 1)),
        dimension_numbers=('NCHW', 'OIHW', 'NCHW'))
    y = y + raw['b'][None, :, None, None]
    y = (y - raw['mean'][None, :, None, None]) * (
        raw['gamma'][None, :, None, None]
        / jnp.sqrt(raw['var'][None, :, None, None] + raw['eps']))
    y = y + raw['beta'][None, :, None, None]
    y = jnp.maximum(y, 0.0)
    B, C, H, W = y.shape
    return y.reshape(B, C, H // 2, 2, W // 2, 2).max(axis=(3, 5))


if __name__ == "__main__":
    key = jax.random.PRNGKey(0)
    k_in, k_p = jax.random.split(key)

    B, Cin, H, W = 2, 4, 16, 16           # (batch, input_channels, height, width)
    Cout = 8

    x = jax.random.normal(k_in, (B, Cin, H, W), jnp.float32)
    params, raw = init_params(k_p, Cin, Cout)

    out = conv_2d_forward(x, params)
    out = jax.block_until_ready(out)

    assert out.shape == (B, Cout, H // 2, W // 2), out.shape
    assert bool(jnp.all(jnp.isfinite(out)))
    assert bool(jnp.all(out >= 0.0))      # ReLU + max-pool => non-negative

    # Loose tolerance: the kernel feeds bf16 operands to the MXU (fp32 accumulation).
    ref = reference_forward(x, raw)
    max_err = float(jnp.max(jnp.abs(out - ref)))
    assert max_err < 1e-1, max_err

    print("KERNEL_OK")
</pallas_src>

<mosaic_0001>
module attributes {stable_mosaic.version = 11 : i64} {
  func.func @_conv3x3_bn_relu_pool_kernel(%arg0: i32, %arg1: memref<1x18x18x4xbf16, #tpu.memory_space<vmem>>, %arg2: memref<36x8xbf16, #tpu.memory_space<vmem>>, %arg3: memref<1x8xf32, #tpu.memory_space<vmem>>, %arg4: memref<1x8xf32, #tpu.memory_space<vmem>>, %arg5: memref<1x8x64xf32, #tpu.memory_space<vmem>>, %arg6: memref<256x36xbf16, #tpu.memory_space<vmem>>) attributes {dimension_semantics = [#tpu.dimension_semantics<parallel>], iteration_bounds = array<i64: 2>, scalar_prefetch = 0 : i64, scratch_operands = 1 : i64, tpu.core_type = #tpu.core_type<tc>, window_params = [{transform_indices = @transform_0, window_bounds = array<i64: 1, 18, 18, 4>}, {pipeline_mode = #tpu.pipeline_mode<synchronous>, transform_indices = @transform_1, window_bounds = array<i64: 36, 8>}, {pipeline_mode = #tpu.pipeline_mode<synchronous>, transform_indices = @transform_2, window_bounds = array<i64: 1, 8>}, {pipeline_mode = #tpu.pipeline_mode<synchronous>, transform_indices = @transform_3, window_bounds = array<i64: 1, 8>}, {transform_indices = @transform_4, window_bounds = array<i64: 1, 8, 64>}]} {
    %c0 = arith.constant 0 : index
    %c0_0 = arith.constant 0 : index
    %c0_1 = arith.constant 0 : index
    %c0_2 = arith.constant 0 : index
    %0 = vector.load %arg1[%c0, %c0_0, %c0_1, %c0_2] : memref<1x18x18x4xbf16, #tpu.memory_space<vmem>>, vector<1x18x18x4xbf16>
    %1 = vector.shape_cast %0 : vector<1x18x18x4xbf16> to vector<18x18x4xbf16>
    %2 = vector.extract_strided_slice %1 {offsets = [0, 0, 0], sizes = [16, 16, 4], strides = [1, 1, 1]} : vector<18x18x4xbf16> to vector<16x16x4xbf16>
    %3 = vector.shape_cast %2 : vector<16x16x4xbf16> to vector<256x4xbf16>
    %c0_3 = arith.constant 0 : index
    %c0_4 = arith.constant 0 : index
    %4 = vector.load %arg6[%c0_3, %c0_4] : memref<256x36xbf16, #tpu.memory_space<vmem>>, vector<256x4xbf16>
    tpu.vector_store %arg6[%c0_3, %c0_4], %3 {strides = array<i32>} : memref<256x36xbf16, #tpu.memory_space<vmem>>, vector<256x4xbf16>,
    %5 = vector.extract_strided_slice %1 {offsets = [0, 1, 0], sizes = [16, 16, 4], strides = [1, 1, 1]} : vector<18x18x4xbf16> to vector<16x16x4xbf16>
    %6 = vector.shape_cast %5 : vector<16x16x4xbf16> to vector<256x4xbf16>
    %c0_5 = arith.constant 0 : index
    %c4 = arith.constant 4 : index
    %7 = vector.load %arg6[%c0_5, %c4] : memref<256x36xbf16, #tpu.memory_space<vmem>>, vector<256x4xbf16>
    tpu.vector_store %arg6[%c0_5, %c4], %6 {strides = array<i32>} : memref<256x36xbf16, #tpu.memory_space<vmem>>, vector<256x4xbf16>,
    %8 = vector.extract_strided_slice %1 {offsets = [0, 2, 0], sizes = [16, 16, 4], strides = [1, 1, 1]} : vector<18x18x4xbf16> to vector<16x16x4xbf16>
    %9 = vector.shape_cast %8 : vector<16x16x4xbf16> to vector<256x4xbf16>
    %c0_6 = arith.constant 0 : index
    %c8 = arith.constant 8 : index
    %10 = vector.load %arg6[%c0_6, %c8] : memref<256x36xbf16, #tpu.memory_space<vmem>>, vector<256x4xbf16>
    tpu.vector_store %arg6[%c0_6, %c8], %9 {strides = array<i32>} : memref<256x36xbf16, #tpu.memory_space<vmem>>, vector<256x4xbf16>,
    %11 = vector.extract_strided_slice %1 {offsets = [1, 0, 0], sizes = [16, 16, 4], strides = [1, 1, 1]} : vector<18x18x4xbf16> to vector<16x16x4xbf16>
    %12 = vector.shape_cast %11 : vector<16x16x4xbf16> to vector<256x4xbf16>
    %c0_7 = arith.constant 0 : index
    %c12 = arith.constant 12 : index
    %13 = vector.load %arg6[%c0_7, %c12] : memref<256x36xbf16, #tpu.memory_space<vmem>>, vector<256x4xbf16>
    tpu.vector_store %arg6[%c0_7, %c12], %12 {strides = array<i32>} : memref<256x36xbf16, #tpu.memory_space<vmem>>, vector<256x4xbf16>,
    %14 = vector.extract_strided_slice %1 {offsets = [1, 1, 0], sizes = [16, 16, 4], strides = [1, 1, 1]} : vector<18x18x4xbf16> to vector<16x16x4xbf16>
    %15 = vector.shape_cast %14 : vector<16x16x4xbf16> to vector<256x4xbf16>
    %c0_8 = arith.constant 0 : index
    %c16 = arith.constant 16 : index
    %16 = vector.load %arg6[%c0_8, %c16] : memref<256x36xbf16, #tpu.memory_space<vmem>>, vector<256x4xbf16>
    tpu.vector_store %arg6[%c0_8, %c16], %15 {strides = array<i32>} : memref<256x36xbf16, #tpu.memory_space<vmem>>, vector<256x4xbf16>,
    %17 = vector.extract_strided_slice %1 {offsets = [1, 2, 0], sizes = [16, 16, 4], strides = [1, 1, 1]} : vector<18x18x4xbf16> to vector<16x16x4xbf16>
    %18 = vector.shape_cast %17 : vector<16x16x4xbf16> to vector<256x4xbf16>
    %c0_9 = arith.constant 0 : index
    %c20 = arith.constant 20 : index
    %19 = vector.load %arg6[%c0_9, %c20] : memref<256x36xbf16, #tpu.memory_space<vmem>>, vector<256x4xbf16>
    tpu.vector_store %arg6[%c0_9, %c20], %18 {strides = array<i32>} : memref<256x36xbf16, #tpu.memory_space<vmem>>, vector<256x4xbf16>,
    %20 = vector.extract_strided_slice %1 {offsets = [2, 0, 0], sizes = [16, 16, 4], strides = [1, 1, 1]} : vector<18x18x4xbf16> to vector<16x16x4xbf16>
    %21 = vector.shape_cast %20 : vector<16x16x4xbf16> to vector<256x4xbf16>
    %c0_10 = arith.constant 0 : index
    %c24 = arith.constant 24 : index
    %22 = vector.load %arg6[%c0_10, %c24] : memref<256x36xbf16, #tpu.memory_space<vmem>>, vector<256x4xbf16>
    tpu.vector_store %arg6[%c0_10, %c24], %21 {strides = array<i32>} : memref<256x36xbf16, #tpu.memory_space<vmem>>, vector<256x4xbf16>,
    %23 = vector.extract_strided_slice %1 {offsets = [2, 1, 0], sizes = [16, 16, 4], strides = [1, 1, 1]} : vector<18x18x4xbf16> to vector<16x16x4xbf16>
    %24 = vector.shape_cast %23 : vector<16x16x4xbf16> to vector<256x4xbf16>
    %c0_11 = arith.constant 0 : index
    %c28 = arith.constant 28 : index
    %25 = vector.load %arg6[%c0_11, %c28] : memref<256x36xbf16, #tpu.memory_space<vmem>>, vector<256x4xbf16>
    tpu.vector_store %arg6[%c0_11, %c28], %24 {strides = array<i32>} : memref<256x36xbf16, #tpu.memory_space<vmem>>, vector<256x4xbf16>,
    %26 = vector.extract_strided_slice %1 {offsets = [2, 2, 0], sizes = [16, 16, 4], strides = [1, 1, 1]} : vector<18x18x4xbf16> to vector<16x16x4xbf16>
    %27 = vector.shape_cast %26 : vector<16x16x4xbf16> to vector<256x4xbf16>
    %c0_12 = arith.constant 0 : index
    %c32 = arith.constant 32 : index
    %28 = vector.load %arg6[%c0_12, %c32] : memref<256x36xbf16, #tpu.memory_space<vmem>>, vector<256x4xbf16>
    tpu.vector_store %arg6[%c0_12, %c32], %27 {strides = array<i32>} : memref<256x36xbf16, #tpu.memory_space<vmem>>, vector<256x4xbf16>,
    %c0_13 = arith.constant 0 : index
    %c0_14 = arith.constant 0 : index
    %29 = vector.load %arg6[%c0_13, %c0_14] : memref<256x36xbf16, #tpu.memory_space<vmem>>, vector<256x36xbf16>
    %c0_15 = arith.constant 0 : index
    %c0_16 = arith.constant 0 : index
    %30 = vector.load %arg2[%c0_15, %c0_16] : memref<36x8xbf16, #tpu.memory_space<vmem>>, vector<36x8xbf16>
    %cst = arith.constant dense<0.000000e+00> : vector<256x8xf32>
    %31 = tpu.matmul %29, %30, %cst {dimension_numbers = #tpu.dot_dimension_numbers<[1], [0], [0], [1], [0, 0, 1, 1], [], []>} : vector<256x36xbf16>, vector<36x8xbf16>, vector<256x8xf32> -> vector<256x8xf32>
    %c0_17 = arith.constant 0 : index
    %c0_18 = arith.constant 0 : index
    %32 = vector.load %arg3[%c0_17, %c0_18] : memref<1x8xf32, #tpu.memory_space<vmem>>, vector<1x8xf32>
    %33 = vector.broadcast %32 : vector<1x8xf32> to vector<256x8xf32>
    %34 = arith.mulf %31, %33 : vector<256x8xf32>
    %c0_19 = arith.constant 0 : index
    %c0_20 = arith.constant 0 : index
    %35 = vector.load %arg4[%c0_19, %c0_20] : memref<1x8xf32, #tpu.memory_space<vmem>>, vector<1x8xf32>
    %36 = vector.broadcast %35 : vector<1x8xf32> to vector<256x8xf32>
    %37 = arith.addf %34, %36 : vector<256x8xf32>
    %cst_21 = arith.constant 0.000000e+00 : f32
    %38 = vector.broadcast %cst_21 : f32 to vector<256x8xf32>
    %39 = arith.maximumf %37, %38 : vector<256x8xf32>
    %40 = vector.shape_cast %39 : vector<256x8xf32> to vector<128x2x8xf32>
    %41 = vector.extract_strided_slice %40 {offsets = [0, 0, 0], sizes = [128, 1, 8], strides = [1, 1, 1]} : vector<128x2x8xf32> to vector<128x1x8xf32>
    %42 = vector.shape_cast %41 : vector<128x1x8xf32> to vector<128x8xf32>
    %43 = vector.extract_strided_slice %40 {offsets = [0, 1, 0], sizes = [128, 1, 8], strides = [1, 1, 1]} : vector<128x2x8xf32> to vector<128x1x8xf32>
    %44 = vector.shape_cast %43 : vector<128x1x8xf32> to vector<128x8xf32>
    %45 = arith.maximumf %42, %44 : vector<128x8xf32>
    %46 = vector.shape_cast %45 : vector<128x8xf32> to vector<8x16x8xf32>
    %47 = vector.extract_strided_slice %46 {offsets = [0, 0, 0], sizes = [8, 8, 8], strides = [1, 1, 1]} : vector<8x16x8xf32> to vector<8x8x8xf32>
    %48 = vector.extract_strided_slice %46 {offsets = [0, 8, 0], sizes = [8, 8, 8], strides = [1, 1, 1]} : vector<8x16x8xf32> to vector<8x8x8xf32>
    %49 = arith.maximumf %47, %48 : vector<8x8x8xf32>
    %50 = vector.extract_strided_slice %49 {offsets = [0, 0, 0], sizes = [8, 1, 8], strides = [1, 1, 1]} : vector<8x8x8xf32> to vector<8x1x8xf32>
    %51 = vector.shape_cast %50 : vector<8x1x8xf32> to vector<8x8xf32>
    %c0_22 = arith.constant 0 : index
    %c0_23 = arith.constant 0 : index
    %c0_24 = arith.constant 0 : index
    %52 = vector.load %arg5[%c0_22, %c0_23, %c0_24] : memref<1x8x64xf32, #tpu.memory_space<vmem>>, vector<1x8x8xf32>
    %53 = vector.shape_cast %52 : vector<1x8x8xf32> to vector<8x8xf32>
    %54 = vector.shape_cast %51 : vector<8x8xf32> to vector<1x8x8xf32>
    tpu.vector_store %arg5[%c0_22, %c0_23, %c0_24], %54 {strides = array<i32>} : memref<1x8x64xf32, #tpu.memory_space<vmem>>, vector<1x8x8xf32>,
    %55 = vector.extract_strided_slice %49 {offsets = [0, 1, 0], sizes = [8, 1, 8], strides = [1, 1, 1]} : vector<8x8x8xf32> to vector<8x1x8xf32>
    %56 = vector.shape_cast %55 : vector<8x1x8xf32> to vector<8x8xf32>
    %c0_25 = arith.constant 0 : index
    %c0_26 = arith.constant 0 : index
    %c8_27 = arith.constant 8 : index
    %57 = vector.load %arg5[%c0_25, %c0_26, %c8_27] : memref<1x8x64xf32, #tpu.memory_space<vmem>>, vector<1x8x8xf32>
    %58 = vector.shape_cast %57 : vector<1x8x8xf32> to vector<8x8xf32>
    %59 = vector.shape_cast %56 : vector<8x8xf32> to vector<1x8x8xf32>
    tpu.vector_store %arg5[%c0_25, %c0_26, %c8_27], %59 {strides = array<i32>} : memref<1x8x64xf32, #tpu.memory_space<vmem>>, vector<1x8x8xf32>,
    %60 = vector.extract_strided_slice %49 {offsets = [0, 2, 0], sizes = [8, 1, 8], strides = [1, 1, 1]} : vector<8x8x8xf32> to vector<8x1x8xf32>
    %61 = vector.shape_cast %60 : vector<8x1x8xf32> to vector<8x8xf32>
    %c0_28 = arith.constant 0 : index
    %c0_29 = arith.constant 0 : index
    %c16_30 = arith.constant 16 : index
    %62 = vector.load %arg5[%c0_28, %c0_29, %c16_30] : memref<1x8x64xf32, #tpu.memory_space<vmem>>, vector<1x8x8xf32>
    %63 = vector.shape_cast %62 : vector<1x8x8xf32> to vector<8x8xf32>
    %64 = vector.shape_cast %61 : vector<8x8xf32> to vector<1x8x8xf32>
    tpu.vector_store %arg5[%c0_28, %c0_29, %c16_30], %64 {strides = array<i32>} : memref<1x8x64xf32, #tpu.memory_space<vmem>>, vector<1x8x8xf32>,
    %65 = vector.extract_strided_slice %49 {offsets = [0, 3, 0], sizes = [8, 1, 8], strides = [1, 1, 1]} : vector<8x8x8xf32> to vector<8x1x8xf32>
    %66 = vector.shape_cast %65 : vector<8x1x8xf32> to vector<8x8xf32>
    %c0_31 = arith.constant 0 : index
    %c0_32 = arith.constant 0 : index
    %c24_33 = arith.constant 24 : index
    %67 = vector.load %arg5[%c0_31, %c0_32, %c24_33] : memref<1x8x64xf32, #tpu.memory_space<vmem>>, vector<1x8x8xf32>
    %68 = vector.shape_cast %67 : vector<1x8x8xf32> to vector<8x8xf32>
    %69 = vector.shape_cast %66 : vector<8x8xf32> to vector<1x8x8xf32>
    tpu.vector_store %arg5[%c0_31, %c0_32, %c24_33], %69 {strides = array<i32>} : memref<1x8x64xf32, #tpu.memory_space<vmem>>, vector<1x8x8xf32>,
    %70 = vector.extract_strided_slice %49 {offsets = [0, 4, 0], sizes = [8, 1, 8], strides = [1, 1, 1]} : vector<8x8x8xf32> to vector<8x1x8xf32>
    %71 = vector.shape_cast %70 : vector<8x1x8xf32> to vector<8x8xf32>
    %c0_34 = arith.constant 0 : index
    %c0_35 = arith.constant 0 : index
    %c32_36 = arith.constant 32 : index
    %72 = vector.load %arg5[%c0_34, %c0_35, %c32_36] : memref<1x8x64xf32, #tpu.memory_space<vmem>>, vector<1x8x8xf32>
    %73 = vector.shape_cast %72 : vector<1x8x8xf32> to vector<8x8xf32>
    %74 = vector.shape_cast %71 : vector<8x8xf32> to vector<1x8x8xf32>
    tpu.vector_store %arg5[%c0_34, %c0_35, %c32_36], %74 {strides = array<i32>} : memref<1x8x64xf32, #tpu.memory_space<vmem>>, vector<1x8x8xf32>,
    %75 = vector.extract_strided_slice %49 {offsets = [0, 5, 0], sizes = [8, 1, 8], strides = [1, 1, 1]} : vector<8x8x8xf32> to vector<8x1x8xf32>
    %76 = vector.shape_cast %75 : vector<8x1x8xf32> to vector<8x8xf32>
    %c0_37 = arith.constant 0 : index
    %c0_38 = arith.constant 0 : index
    %c40 = arith.constant 40 : index
    %77 = vector.load %arg5[%c0_37, %c0_38, %c40] : memref<1x8x64xf32, #tpu.memory_space<vmem>>, vector<1x8x8xf32>
    %78 = vector.shape_cast %77 : vector<1x8x8xf32> to vector<8x8xf32>
    %79 = vector.shape_cast %76 : vector<8x8xf32> to vector<1x8x8xf32>
    tpu.vector_store %arg5[%c0_37, %c0_38, %c40], %79 {strides = array<i32>} : memref<1x8x64xf32, #tpu.memory_space<vmem>>, vector<1x8x8xf32>,
    %80 = vector.extract_strided_slice %49 {offsets = [0, 6, 0], sizes = [8, 1, 8], strides = [1, 1, 1]} : vector<8x8x8xf32> to vector<8x1x8xf32>
    %81 = vector.shape_cast %80 : vector<8x1x8xf32> to vector<8x8xf32>
    %c0_39 = arith.constant 0 : index
    %c0_40 = arith.constant 0 : index
    %c48 = arith.constant 48 : index
    %82 = vector.load %arg5[%c0_39, %c0_40, %c48] : memref<1x8x64xf32, #tpu.memory_space<vmem>>, vector<1x8x8xf32>
    %83 = vector.shape_cast %82 : vector<1x8x8xf32> to vector<8x8xf32>
    %84 = vector.shape_cast %81 : vector<8x8xf32> to vector<1x8x8xf32>
    tpu.vector_store %arg5[%c0_39, %c0_40, %c48], %84 {strides = array<i32>} : memref<1x8x64xf32, #tpu.memory_space<vmem>>, vector<1x8x8xf32>,
    %85 = vector.extract_strided_slice %49 {offsets = [0, 7, 0], sizes = [8, 1, 8], strides = [1, 1, 1]} : vector<8x8x8xf32> to vector<8x1x8xf32>
    %86 = vector.shape_cast %85 : vector<8x1x8xf32> to vector<8x8xf32>
    %c0_41 = arith.constant 0 : index
    %c0_42 = arith.constant 0 : index
    %c56 = arith.constant 56 : index
    %87 = vector.load %arg5[%c0_41, %c0_42, %c56] : memref<1x8x64xf32, #tpu.memory_space<vmem>>, vector<1x8x8xf32>
    %88 = vector.shape_cast %87 : vector<1x8x8xf32> to vector<8x8xf32>
    %89 = vector.shape_cast %86 : vector<8x8xf32> to vector<1x8x8xf32>
    tpu.vector_store %arg5[%c0_41, %c0_42, %c56], %89 {strides = array<i32>} : memref<1x8x64xf32, #tpu.memory_space<vmem>>, vector<1x8x8xf32>,
    return
  }
  func.func @transform_0(%arg0: i32) -> (i32, i32, i32, i32) {
    %c0_i32 = arith.constant 0 : i32
    %c0_i32_0 = arith.constant 0 : i32
    %c0_i32_1 = arith.constant 0 : i32
    %c0_i32_2 = arith.constant 0 : i32
    return %arg0, %c0_i32, %c0_i32_0, %c0_i32_1 : i32, i32, i32, i32
  }
  func.func @transform_1(%arg0: i32) -> (i32, i32) {
    %c0_i32 = arith.constant 0 : i32
    %c0_i32_0 = arith.constant 0 : i32
    %c0_i32_1 = arith.constant 0 : i32
    return %c0_i32, %c0_i32_0 : i32, i32
  }
  func.func @transform_2(%arg0: i32) -> (i32, i32) {
    %c0_i32 = arith.constant 0 : i32
    %c0_i32_0 = arith.constant 0 : i32
    %c0_i32_1 = arith.constant 0 : i32
    return %c0_i32, %c0_i32_0 : i32, i32
  }
  func.func @transform_3(%arg0: i32) -> (i32, i32) {
    %c0_i32 = arith.constant 0 : i32
    %c0_i32_0 = arith.constant 0 : i32
    %c0_i32_1 = arith.constant 0 : i32
    return %c0_i32, %c0_i32_0 : i32, i32
  }
  func.func @transform_4(%arg0: i32) -> (i32, i32, i32) {
    %c0_i32 = arith.constant 0 : i32
    %c0_i32_0 = arith.constant 0 : i32
    %c0_i32_1 = arith.constant 0 : i32
    return %arg0, %c0_i32, %c0_i32_0 : i32, i32, i32
  }
}

</mosaic_0001>

<bundles_post_ra>
// kernel: conv_2d_forward.1
= control target key start
LH: loop header
LB: loop body
LE: loop exit
PB: predicated region body
PF: predicated region fallthrough
CT: control target
= control target key end

     0   :  { %s4488_s15 = smov 0   ;;  %s6438_s0 = inlined_call_operand.vmem [shape: bf16[2,18,18,4], index: 0, kind: input, shape index: {}]   ;;  %s6439_s1 = inlined_call_operand.vmem [shape: bf16[36,8], index: 1, kind: input, shape index: {}]   ;;  %s6440_s2 = inlined_call_operand.vmem [shape: f32[1,8], index: 2, kind: input, shape index: {}]   ;;  %s6441_s3 = inlined_call_operand.vmem [shape: f32[1,8], index: 3, kind: input, shape index: {}]   ;;  %s6442_s4 = inlined_call_operand.vmem [shape: f32[2,8,64], index: 4, kind: output, shape index: {}]  }
   0x1 LB: > { %s4144_s16 = sadd.s32 4294967295, %s4449_s15   ;;  %p4148_p0 = scmp.ge.s32.totalorder %s4449_s15, 1  ;;  %s4449_s15 = sphi %s4488_s15, %s14_s15  }
   0x2   : > { %p162_p1 = scmp.lt.s32.totalorder %s4449_s15, 3 }
   0x4   : > { %p163_p2 = pnand %p4148_p0, %p162_p1 }
   0x6   : > { %166 = sbr.rel (%p163_p2) target bundleno = 1012 (0x3f4), region = 36 }
   0xb   : > { %p187_p3 = scmp.lt.s32.totalorder %s4144_s16, 1  ;;  %vm251_vm0 = vcmask 27648   ;;  %vm284_vm1 = vsmask.f32 3328  ;;  %vm285_vm2 = vsmask.f32 7440 }
   0xc   : > { %vm4551_vm3 = vmor %vm284_vm1, %vm285_vm2  ;;  %v6527_v28 = vmov 0  ;;  %s4451_s21 = smov 4   ;;  %vm848_vm4 = vcmask 1042432   ;;  %vm849_vm5 = vcmask 1046532   ;;  %s4452_s22 = smov 8   ;;  %vm767_vm7 = vcmask 60448  }
   0xd   : > { %s6644_s16 = smov (!%p187_p3, %s4144_s16), 1  ;;  %v6528_v28 = vsel %vm4551_vm3, 4294967295, %v6527_v28  ;;  %vm4970_vm6 = vmor %vm848_vm4, %vm849_vm5  ;;  %s4453_s23 = smov 12   ;;  %vm1059_vm8 = vcmask 93248   ;;  %vm2115_vm9 = vcmask 1041408   ;;  %vm1190_vm10 = vcmask 126048  }
   0xe   : > { %s4401_s17 = smul.u32 216, %s6644_s16  ;;  %6529 = vst [vmem:[#allocation3_spill] sm:$0xff] %v6528_v28  ;;  %s4454_s24 = smov 16   ;;  %vm1343_vm11 = vcmask 158848   ;;  %vm1480_vm12 = vcmask 191648   ;;  %vm1611_vm13 = vcmask 224448  }
   0xf   : > { %s4455_s25 = smov 20   ;;  %s4456_s26 = smov 24   ;;  %vm1764_vm14 = vcmask 257248   ;;  %vm1901_vm15 = vcmask 290048   ;;  %vm3710_vm1 = vcmask 1041409   ;;  %vm3712_vm2 = vcmask 1042434  }
  0x10   : > { %s4502_s20 = scalar_lea.vmem %s6438_s0, %s4401_s17  ;;  %s4457_s27 = smov 28   ;;  %vm3716_vm4 = vcmask 1044484   ;;  %vm3718_vm5 = vcmask 1045509  }
  0x11   : > { %v4505_v0 = vld [vmem:[%s4502_s20 + $0xc] sm:$0xf]  ;;  %v4508_v1 = vld [vmem:[%s4502_s20 + $0x10] sm:$0xf]  ;;  %v4511_v2 = vld [vmem:[%s4502_s20] sm:$0xf] }
  0x12   : > { %v312_v3 = vshrl.u32 %v4505_v0, 16  ;;  %v315_v4 = vshll.u32 %v4505_v0, 16  ;;  %v321_v5 = vshll.u32 %v4508_v1, 16  ;;  %v4517_v6 = vld [vmem:[%s4502_s20 + $0x4] sm:$0xf]  ;;  %v288_v7 = vshrl.u32 %v4511_v2, 16 }
  0x13   : > { %254 = vst.msk [vmem:[#allocation2 + $0x8] sm:$0xf] %vm251_vm0, %v4505_v0  ;;  %252 = vst.msk [vmem:[#allocation2] sm:$0xf] %vm251_vm0, %v4511_v2  ;;  %v291_v8 = vshll.u32 %v4511_v2, 16  ;;  %v297_v9 = vshll.u32 %v4517_v6, 16 }
  0x14   : > { %255 = vst.msk [vmem:[#allocation2 + $0xc] sm:$0xf] %vm251_vm0, %v4508_v1  ;;  %v4529_v10 = vld [vmem:[%s4502_s20 + $0x14] sm:$0x1]  ;;  %v325_v11 = vshrl.u32 %v4508_v1, 16  ;;  %v301_v12 = vshrl.u32 %v4517_v6, 16 }
  0x15   : > { %253 = vst.msk [vmem:[#allocation2 + $0x4] sm:$0xf] %vm251_vm0, %v4517_v6  ;;  %v314_v13 = vrot.slane %v312_v3, 4  ;;  %v317_v14 = vrot.slane %v315_v4, 5  ;;  %v323_v15 = vrot.slane %v321_v5, 5  ;;  %v290_v16 = vrot.slane %v288_v7, 4 }
  0x16   : > { %v4536_v17 = vld [vmem:[%s4502_s20 + $0x8] sm:$0x1]  ;;  %v293_v18 = vrot.slane %v291_v8, 5  ;;  %v299_v19 = vrot.slane %v297_v9, 5  ;;  %v327_v20 = vrot.slane %v325_v11, 4  ;;  %v331_v21 = vshll.u32 %v4529_v10, 16 }
  0x17   : > { %v4540_v22 = vld [vmem:[%s4502_s20 + $0x1c] sm:$0xf]  ;;  %v318_v23 = vor.u32 %v317_v14, %v314_v13  ;;  %v303_v24 = vrot.slane %v301_v12, 4  ;;  %v307_v25 = vshll.u32 %v4536_v17, 16  ;;  %v4544_v26 = vld [vmem:[%s4502_s20 + $0x20] sm:$0x1] }
  0x18   : > { %v345_v27 = vshll.u32 %v4540_v22, 16  ;;  %257 = vst.msk [vmem:[#allocation2 + $0x14] sm:$0xf] %vm251_vm0, %v4540_v22  ;;  %v294_v29 = vor.u32 %v293_v18, %v290_v16  ;;  %v328_v30 = vor.u32 %v327_v20, %v323_v15  ;;  %v333_v31 = vrot.slane %v331_v21, 5  ;;  %v4557_v33 = vld [vmem:[%s4502_s20 + $0x18] sm:$0xf] }
  0x19   : > { %v349_v32 = vshrl.u32 %v4540_v22, 16  ;;  %v4560_v34 = vld [vmem:[%s4502_s20 + $0x28] sm:$0xf]  ;;  %v319_v35 = vrot.slane %v318_v23, 4  ;;  %v304_v36 = vor.u32 %v303_v24, %v299_v19  ;;  %v309_v37 = vrot.slane %v307_v25, 5  ;;  %s4458_s6 = smov 32  }
  0x1a   : > { %v347_v38 = vrot.slane %v345_v27, 5  ;;  %v4563_v39 = vld [vmem:[%s4502_s20 + $0x2c] sm:$0x1]  ;;  %256 = vst.msk [vmem:[#allocation2 + $0x10] sm:$0xf] %vm251_vm0, %v4557_v33  ;;  %v295_v40 = vrot.slane %v294_v29, 4 }
  0x1b   : > { %259 = vst.msk [vmem:[#allocation2 + $0x1c] sm:$0xf] %vm251_vm0, %v4560_v34  ;;  %v329_v41 = vrot.slane %v328_v30, 4  ;;  %v351_v42 = vrot.slane %v349_v32, 4  ;;  %v355_v43 = vshll.u32 %v4544_v26, 16  ;;  %v4575_v45 = vsel %vm4551_vm3, %v319_v35, %v323_v15  ;;  %s4150_s19 = sshll.u32 %s6644_s16, 3 }
  0x1c   : > { %v4571_v44 = vld [vmem:[%s4502_s20 + $0x24] sm:$0xf]  ;;  %6530 = vst [vmem:[#allocation4_spill] sm:$0xff] %v4575_v45  ;;  %v305_v46 = vrot.slane %v304_v36, 4  ;;  %v336_v47 = vshrl.u32 %v4557_v33, 16  ;;  %v339_v48 = vshll.u32 %v4557_v33, 16  ;;  %675 = vrot.lane.b32.xlu1 %v4575_v45, %s4451_s21  ;;  %v300_v50 = vsel %vm4551_vm3, %v295_v40, %v299_v19 }
  0x1d   : > { %v4580_v49 = vld [vmem:[%s4502_s20 + $0x34] sm:$0xf]  ;;  %258 = vst.msk [vmem:[#allocation2 + $0x18] sm:$0xf] %vm251_vm0, %v4571_v44  ;;  %v4590_v51 = vsel %vm4551_vm3, %v329_v41, %v333_v31  ;;  %v352_v52 = vor.u32 %v351_v42, %v347_v38  ;;  %v357_v53 = vrot.slane %v355_v43, 5  ;;  %671 = vrot.lane.b32.xlu0 %v300_v50, %s4451_s21  ;;  %v369_v58 = vshll.u32 %v4560_v34, 16 }
  0x1e   : > { %6531 = vst [vmem:[#allocation5_spill] sm:$0xff] %v4590_v51  ;;  %v4593_v54 = vld [vmem:[%s4502_s20 + $0x30] sm:$0xf]  ;;  %261 = vst.msk [vmem:[#allocation2 + $0x24] sm:$0xf] %vm251_vm0, %v4580_v49  ;;  %v310_v55 = vsel %vm4551_vm3, %v305_v46, %v309_v37  ;;  %v338_v56 = vrot.slane %v336_v47, 4 }
  0x1f   : > { %v341_v57 = vrot.slane %v339_v48, 5  ;;  %v4602_v59 = vld [vmem:[%s4502_s20 + $0x40] sm:$0xf]  ;;  %260 = vst.msk [vmem:[#allocation2 + $0x20] sm:$0xf] %vm251_vm0, %v4593_v54  ;;  %v353_v60 = vrot.slane %v352_v52, 4 }
  0x20   : > { %v373_v61 = vshrl.u32 %v4560_v34, 16  ;;  %v379_v62 = vshll.u32 %v4563_v39, 16  ;;  %v360_v63 = vshrl.u32 %v4571_v44, 16  ;;  %v4610_v3 = vld [vmem:[%s4502_s20 + $0x38] sm:$0x1]  ;;  %v371_v5 = vrot.slane %v369_v58, 5  ;;  %677 = vrot.lane.b32.xlu1 %v4590_v51, %s4451_s21 }
  0x21   : > { %263 = vst.msk [vmem:[#allocation2 + $0x2c] sm:$0xf] %vm251_vm0, %v4602_v59  ;;  %v342_v4 = vor.u32 %v341_v57, %v338_v56  ;;  %v363_v7 = vshll.u32 %v4571_v44, 16  ;;  %v393_v8 = vshll.u32 %v4580_v49, 16  ;;  %v4617_v9 = vld [vmem:[%s4502_s20 + $0x3c] sm:$0xf]  ;;  %v4623_v11 = vsel %vm4551_vm3, %v353_v60, %v357_v53  ;;  %673 = vrot.lane.b32.xlu0 %v310_v55, %s4451_s21 }
  0x22   : > { %6532 = vst [vmem:[#allocation6_spill] sm:$0xff] %v4623_v11  ;;  %v375_v12 = vrot.slane %v373_v61, 4  ;;  %v381_v13 = vrot.slane %v379_v62, 5  ;;  %v362_v14 = vrot.slane %v360_v63, 4  ;;  %v4626_v15 = vld [vmem:[%s4502_s20 + $0x4c] sm:$0xf] }
  0x23   : > { %262 = vst.msk [vmem:[#allocation2 + $0x28] sm:$0xf] %vm251_vm0, %v4617_v9  ;;  %v343_v16 = vrot.slane %v342_v4, 4  ;;  %v365_v18 = vrot.slane %v363_v7, 5  ;;  %v395_v19 = vrot.slane %v393_v8, 5  ;;  %v397_v20 = vshrl.u32 %v4580_v49, 16 }
  0x24   : > { %265 = vst.msk [vmem:[#allocation2 + $0x34] sm:$0xf] %vm251_vm0, %v4626_v15  ;;  %v376_v21 = vor.u32 %v375_v12, %v371_v5  ;;  %v403_v23 = vshll.u32 %v4610_v3, 16  ;;  %v384_v24 = vshrl.u32 %v4593_v54, 16  ;;  %v387_v25 = vshll.u32 %v4593_v54, 16  ;;  %681 = vrot.lane.b32.xlu1 %v4623_v11, %s4451_s21 }
  0x25   : > { %v4638_v27 = vld [vmem:[%s4502_s20 + $0x48] sm:$0xf]  ;;  %v4642_v29 = vsel %vm4551_vm3, %v343_v16, %v347_v38  ;;  %v366_v30 = vor.u32 %v365_v18, %v362_v14  ;;  %v399_v31 = vrot.slane %v397_v20, 4  ;;  %v4645_v32 = vld [vmem:[%s4502_s20 + $0x44] sm:$0x1]  ;;  %v417_v35 = vshll.u32 %v4602_v59, 16 }
  0x26   : > { %6533 = vst [vmem:[#allocation7_spill] sm:$0xff] %v4642_v29  ;;  %v4649_v36 = vld [vmem:[%s4502_s20 + $0x58] sm:$0xf]  ;;  %264 = vst.msk [vmem:[#allocation2 + $0x30] sm:$0xf] %vm251_vm0, %v4638_v27  ;;  %v377_v37 = vrot.slane %v376_v21, 4  ;;  %679 = vrot.lane.b32.xlu0 %v4642_v29, %s4451_s21 }
  0x27   : > { %v405_v40 = vrot.slane %v403_v23, 5  ;;  %v386_v38 = vrot.slane %v384_v24, 4  ;;  %v389_v41 = vrot.slane %v387_v25, 5  ;;  %v4656_v42 = vld [vmem:[%s4502_s20 + $0x54] sm:$0xf]  ;;  %v367_v43 = vrot.slane %v366_v30, 4 }
  0x28   : > { %6534 = vst [vmem:[#allocation8_spill] sm:$0xff] %v4656_v42  ;;  %267 = vst.msk [vmem:[#allocation2 + $0x3c] sm:$0xf] %vm251_vm0, %v4649_v36  ;;  %v400_v46 = vor.u32 %v399_v31, %v395_v19  ;;  %v4662_v47 = vrot.slane %v417_v35, 5  ;;  %v421_v48 = vshrl.u32 %v4602_v59, 16  ;;  %v4672_v52 = vsel %vm4551_vm3, %v377_v37, %v381_v13 }
  0x29   : > { %v4666_v50 = vld [vmem:[%s4502_s20 + $0x64] sm:$0xf]  ;;  %266 = vst.msk [vmem:[#allocation2 + $0x38] sm:$0xf] %vm251_vm0, %v4656_v42  ;;  %6536 = vst [vmem:[#allocation10_spill] sm:$0xff] %v4672_v52  ;;  %v390_v53 = vor.u32 %v389_v41, %v386_v38  ;;  %v427_v55 = vshll.u32 %v4645_v32, 16  ;;  %v4686_v60 = vsel %vm4551_vm3, %v367_v43, %v371_v5  ;;  %685 = vrot.lane.b32.xlu1 %v4672_v52, %s4451_s21 }
  0x2a   : > { %6535 = vst [vmem:[#allocation9_spill] sm:$0xff] %v4666_v50  ;;  %v408_v56 = vshrl.u32 %v4617_v9, 16  ;;  %v4677_v57 = vld [vmem:[%s4502_s20 + $0x50] sm:$0x1]  ;;  %v4680_v58 = vld [vmem:[%s4502_s20 + $0x60] sm:$0xf]  ;;  %683 = vrot.lane.b32.xlu0 %v4686_v60, %s4451_s21 }
  0x2b   : > { %6537 = vst [vmem:[#allocation11_spill] sm:$0xff] %v4680_v58  ;;  %269 = vst.msk [vmem:[#allocation2 + $0x44] sm:$0xf] %vm251_vm0, %v4666_v50  ;;  %v401_v61 = vrot.slane %v400_v46, 4  ;;  %v423_v62 = vrot.slane %v421_v48, 4  ;;  %v411_v63 = vshll.u32 %v4617_v9, 16 }
  0x2c   : > { %6538 = vst [vmem:[#allocation12_spill] sm:$0xff] %v4686_v60  ;;  %v4690_v4 = vld [vmem:[%s4502_s20 + $0x70] sm:$0xf]  ;;  %268 = vst.msk [vmem:[#allocation2 + $0x40] sm:$0xf] %vm251_vm0, %v4680_v58  ;;  %v391_v7 = vrot.slane %v390_v53, 4 }
  0x2d   : > { %v429_v8 = vrot.slane %v427_v55, 5  ;;  %v410_v12 = vrot.slane %v408_v56, 4  ;;  %v441_v5 = vshll.u32 %v4626_v15, 16  ;;  %271 = vst.msk [vmem:[#allocation2 + $0x4c] sm:$0xf] %vm251_vm0, %v4690_v4  ;;  %v4703_v13 = vsel %vm4551_vm3, %v401_v61, %v405_v40 }
  0x2e   : > { %6539 = vst [vmem:[#allocation13_spill] sm:$0xff] %v4703_v13  ;;  %v424_v14 = vor.u32 %v423_v62, %v4662_v47  ;;  %v413_v16 = vrot.slane %v411_v63, 5  ;;  %v445_v18 = vshrl.u32 %v4626_v15, 16  ;;  %v4708_v20 = vld [vmem:[%s4502_s20 + $0x6c] sm:$0xf]  ;;  %v4715_v23 = vsel %vm4551_vm3, %v391_v7, %v395_v19  ;;  %689 = vrot.lane.b32.xlu1 %v4703_v13, %s4451_s21 }
  0x2f   : > { %6540 = vst [vmem:[#allocation14_spill] sm:$0xff] %v4708_v20  ;;  %v4711_v21 = vld [vmem:[%s4502_s20 + $0x7c] sm:$0xf]  ;;  %6541 = vst [vmem:[#allocation15_spill] sm:$0xff] %v4715_v23  ;;  %v443_v24 = vrot.slane %v441_v5, 5  ;;  %v451_v25 = vshll.u32 %v4677_v57, 16  ;;  %687 = vrot.lane.b32.xlu0 %v4715_v23, %s4451_s21 }
  0x30   : > { %v432_v30 = vshrl.u32 %v4638_v27, 16  ;;  %v4720_v31 = vld [vmem:[%s4502_s20 + $0x5c] sm:$0x1]  ;;  %270 = vst.msk [vmem:[#allocation2 + $0x48] sm:$0xf] %vm251_vm0, %v4708_v20  ;;  %v425_v35 = vrot.slane %v424_v14, 4  ;;  %v414_v37 = vor.u32 %v413_v16, %v410_v12 }
  0x31   : > { %273 = vst.msk [vmem:[#allocation2 + $0x54] sm:$0xf] %vm251_vm0, %v4711_v21  ;;  %v447_v40 = vrot.slane %v445_v18, 4  ;;  %v435_v19 = vshll.u32 %v4638_v27, 16  ;;  %v4728_v38 = vld [vmem:[%s4502_s20 + $0x78] sm:$0xf] }
  0x32   : > { %6542 = vst [vmem:[#allocation16_spill] sm:$0xff] %v4728_v38  ;;  %v453_v41 = vrot.slane %v451_v25, 5  ;;  %v434_v43 = vrot.slane %v432_v30, 4  ;;  %v465_v46 = vshll.u32 %v4649_v36, 16  ;;  %v469_v48 = vshrl.u32 %v4649_v36, 16 }
  0x33   : > { %v4735_v53 = vld [vmem:[%s4502_s20 + $0x88] sm:$0xf]  ;;  %272 = vst.msk [vmem:[#allocation2 + $0x50] sm:$0xf] %vm251_vm0, %v4728_v38  ;;  %v4743_v55 = vsel %vm4551_vm3, %v425_v35, %v429_v8  ;;  %v415_v56 = vrot.slane %v414_v37, 4  ;;  %v448_v61 = vor.u32 %v447_v40, %v443_v24  ;;  %v437_v62 = vrot.slane %v435_v19, 5 }
  0x34   : > { %6543 = vst [vmem:[#allocation17_spill] sm:$0xff] %v4743_v55  ;;  %v4746_v63 = vld [vmem:[%s4502_s20 + $0x84] sm:$0xf]  ;;  %275 = vst.msk [vmem:[#allocation2 + $0x5c] sm:$0xf] %vm251_vm0, %v4735_v53  ;;  %v467_v7 = vrot.slane %v465_v46, 5  ;;  %693 = vrot.lane.b32.xlu1 %v4743_v55, %s4451_s21 }
  0x35   : > { %6544 = vst [vmem:[#allocation18_spill] sm:$0xff] %v4746_v63  ;;  %v471_v12 = vrot.slane %v469_v48, 4  ;;  %v475_v5 = vshll.u32 %v4720_v31, 16  ;;  %v456_v14 = vshrl.u32 %v4656_v42, 16  ;;  %v4753_v16 = vld [vmem:[%s4502_s20 + $0x94] sm:$0xf]  ;;  %v4760_v8 = vsel %vm4551_vm3, %v415_v56, %v4662_v47 }
  0x36   : > { %6545 = vst [vmem:[#allocation19_spill] sm:$0xff] %v4753_v16  ;;  %274 = vst.msk [vmem:[#allocation2 + $0x58] sm:$0xf] %vm251_vm0, %v4746_v63  ;;  %v449_v18 = vrot.slane %v448_v61, 4  ;;  %v438_v25 = vor.u32 %v437_v62, %v434_v43  ;;  %v459_v30 = vshll.u32 %v4656_v42, 16  ;;  %v489_v47 = vshll.u32 %v4666_v50, 16  ;;  %691 = vrot.lane.b32.xlu0 %v4760_v8, %s4451_s21 }
  0x37   : > { %6546 = vst [vmem:[#allocation20_spill] sm:$0xff] %v4760_v8  ;;  %v4764_v35 = vld [vmem:[%s4502_s20 + $0x68] sm:$0x1]  ;;  %v4767_v37 = vld [vmem:[%s4502_s20 + $0x90] sm:$0xf]  ;;  %v472_v40 = vor.u32 %v471_v12, %v467_v7  ;;  %v477_v19 = vrot.slane %v475_v5, 5 }
  0x38   : > { %277 = vst.msk [vmem:[#allocation2 + $0x64] sm:$0xf] %vm251_vm0, %v4753_v16  ;;  %v458_v46 = vrot.slane %v456_v14, 4  ;;  %v4775_v48 = vld [vmem:[%s4502_s20 + $0xa0] sm:$0xf]  ;;  %v4783_v43 = vsel %vm4551_vm3, %v449_v18, %v453_v41  ;;  %v439_v56 = vrot.slane %v438_v25, 4 }
  0x39   : > { %276 = vst.msk [vmem:[#allocation2 + $0x60] sm:$0xf] %vm251_vm0, %v4767_v37  ;;  %6547 = vst [vmem:[#allocation21_spill] sm:$0xff] %v4783_v43  ;;  %v461_v61 = vrot.slane %v459_v30, 5  ;;  %v493_v62 = vshrl.u32 %v4666_v50, 16  ;;  %v473_v12 = vrot.slane %v472_v40, 4  ;;  %697 = vrot.lane.b32.xlu1 %v4783_v43, %s4451_s21 }
  0x3a   : > { %279 = vst.msk [vmem:[#allocation2 + $0x6c] sm:$0xf] %vm251_vm0, %v4775_v48  ;;  %v491_v5 = vrot.slane %v489_v47, 5  ;;  %v499_v14 = vshll.u32 %v4764_v35, 16  ;;  %v480_v55 = vshrl.u32 %v4680_v58, 16  ;;  %v4795_v41 = vsel %vm4551_vm3, %v439_v56, %v443_v24 }
  0x3b   : > { %v4791_v8 = vld [vmem:[%s4502_s20 + $0x9c] sm:$0xf]  ;;  %6548 = vst [vmem:[#allocation22_spill] sm:$0xff] %v4795_v41  ;;  %v462_v18 = vor.u32 %v461_v61, %v458_v46  ;;  %v495_v25 = vrot.slane %v493_v62, 4  ;;  %v483_v30 = vshll.u32 %v4680_v58, 16  ;;  %v4810_v47 = vsel %vm4551_vm3, %v473_v12, %v477_v19  ;;  %695 = vrot.lane.b32.xlu0 %v4795_v41, %s4451_s21 }
  0x3c   : > { %v4799_v23 = vld [vmem:[%s4502_s20 + $0x74] sm:$0x1]  ;;  %v4802_v40 = vld [vmem:[%s4502_s20 + $0xac] sm:$0xf]  ;;  %278 = vst.msk [vmem:[#allocation2 + $0x68] sm:$0xf] %vm251_vm0, %v4791_v8 }
  0x3d   : > { %6549 = vst [vmem:[#allocation23_spill] sm:$0xff] %v4799_v23  ;;  %6550 = vst [vmem:[#allocation24_spill] sm:$0xff] %v4802_v40  ;;  %v501_v24 = vrot.slane %v499_v14, 5  ;;  %v482_v46 = vrot.slane %v480_v55, 4  ;;  %v513_v56 = vshll.u32 %v4690_v4, 16  ;;  %v463_v62 = vrot.slane %v462_v18, 4  ;;  %701 = vrot.lane.b32.xlu1 %v4810_v47, %s4451_s21 }
  0x3e   : > { %6551 = vst [vmem:[#allocation25_spill] sm:$0xff] %v4810_v47  ;;  %v4814_v61 = vld [vmem:[%s4502_s20 + $0xa8] sm:$0xf]  ;;  %281 = vst.msk [vmem:[#allocation2 + $0x74] sm:$0xf] %vm251_vm0, %v4802_v40  ;;  %v496_v43 = vor.u32 %v495_v25, %v491_v5  ;;  %v485_v13 = vrot.slane %v483_v30, 5 }
  0x3f   : > { %6552 = vst [vmem:[#allocation26_spill] sm:$0xff] %v4814_v61  ;;  %v517_v19 = vshrl.u32 %v4690_v4, 16  ;;  %v4822_v12 = vld [vmem:[%s4502_s20 + $0xb8] sm:$0xf]  ;;  %280 = vst.msk [vmem:[#allocation2 + $0x70] sm:$0xf] %vm251_vm0, %v4814_v61  ;;  %v4833_v18 = vsel %vm4551_vm3, %v463_v62, %v467_v7 }
  0x40   : > { %v515_v55 = vrot.slane %v513_v56, 5  ;;  %v523_v14 = vshll.u32 %v4799_v23, 16  ;;  %v504_v60 = vshrl.u32 %v4708_v20, 16  ;;  %v507_v52 = vshll.u32 %v4708_v20, 16  ;;  %283 = vst.msk [vmem:[#allocation2 + $0x7c] sm:$0xf] %vm251_vm0, %v4822_v12  ;;  %699 = vrot.lane.b32.xlu0 %v4833_v18, %s4451_s21 }
  0x41   : > { %6553 = vst [vmem:[#allocation27_spill] sm:$0xff] %v4833_v18  ;;  %v497_v25 = vrot.slane %v496_v43, 4  ;;  %v486_v30 = vor.u32 %v485_v13, %v482_v46  ;;  %v519_v41 = vrot.slane %v517_v19, 4  ;;  %v4836_v29 = vld [vmem:[%s4502_s20 + $0x80] sm:$0x1]  ;;  %v537_v20 = vshll.u32 %v4711_v21, 16 }
  0x42   : > { %v4839_v11 = vld [vmem:[%s4502_s20 + $0xb4] sm:$0xf]  ;;  %v525_v56 = vrot.slane %v523_v14, 5  ;;  %v506_v45 = vrot.slane %v504_v60, 4  ;;  %v509_v51 = vrot.slane %v507_v52, 5  ;;  %v541_v46 = vshrl.u32 %v4711_v21, 16 }
  0x43   : > { %282 = vst.msk [vmem:[#allocation2 + $0x78] sm:$0xf] %vm251_vm0, %v4839_v11  ;;  %v4850_v13 = vsel %vm4551_vm3, %v497_v25, %v501_v24  ;;  %v487_v7 = vrot.slane %v486_v30, 4  ;;  %v520_v43 = vor.u32 %v519_v41, %v515_v55  ;;  %v539_v60 = vrot.slane %v537_v20, 5  ;;  %v4861_v24 = vld [vmem:[%s4502_s20 + $0x8c] sm:$0x1] }
  0x44   : > { %6554 = vst [vmem:[#allocation28_spill] sm:$0xff] %v4850_v13  ;;  %v510_v62 = vor.u32 %v509_v51, %v506_v45  ;;  %v547_v52 = vshll.u32 %v4836_v29, 16  ;;  %v528_v19 = vshrl.u32 %v4728_v38, 16  ;;  %v543_v18 = vrot.slane %v541_v46, 4  ;;  %6556 = vst [vmem:[#allocation30_spill] sm:$0xff] %v4861_v24  ;;  %705 = vrot.lane.b32.xlu1 %v4850_v13, %s4451_s21 }
  0x45   : > { %v4857_v14 = vsel %vm4551_vm3, %v487_v7, %v491_v5  ;;  %v521_v47 = vrot.slane %v520_v43, 4  ;;  %v531_v23 = vshll.u32 %v4728_v38, 16  ;;  %v561_v20 = vshll.u32 %v4735_v53, 16 }
  0x46   : > { %6555 = vst [vmem:[#allocation29_spill] sm:$0xff] %v4857_v14  ;;  %v511_v41 = vrot.slane %v510_v62, 4  ;;  %v549_v45 = vrot.slane %v547_v52, 5  ;;  %v530_v51 = vrot.slane %v528_v19, 4  ;;  %703 = vrot.lane.b32.xlu0 %v4857_v14, %s4451_s21  ;;  %v544_v25 = vor.u32 %v543_v18, %v539_v60 }
  0x47   : > { %v4870_v5 = vsel %vm4551_vm3, %v521_v47, %v525_v56  ;;  %v533_v30 = vrot.slane %v531_v23, 5  ;;  %v565_v7 = vshrl.u32 %v4735_v53, 16  ;;  %v563_v46 = vrot.slane %v561_v20, 5  ;;  %v4881_v47 = vld [vmem:[%s4502_s20 + $0x98] sm:$0x1] }
  0x48   : > { %6557 = vst [vmem:[#allocation31_spill] sm:$0xff] %v4870_v5  ;;  %v4875_v43 = vsel %vm4551_vm3, %v511_v41, %v515_v55  ;;  %v571_v62 = vshll.u32 %v4861_v24, 16  ;;  %v552_v52 = vshrl.u32 %v4746_v63, 16  ;;  %v545_v19 = vrot.slane %v544_v25, 4  ;;  %709 = vrot.lane.b32.xlu1 %v4870_v5, %s4451_s21  ;;  %v4901_v24 = vld [vmem:[%s4502_s20 + $0xa4] sm:$0x1] }
  0x49   : > { %6558 = vst [vmem:[#allocation32_spill] sm:$0xff] %v4875_v43  ;;  %v534_v13 = vor.u32 %v533_v30, %v530_v51  ;;  %v567_v14 = vrot.slane %v565_v7, 4  ;;  %v555_v38 = vshll.u32 %v4746_v63, 16  ;;  %v585_v55 = vshll.u32 %v4753_v16, 16 }
  0x4a   : > { %v573_v23 = vrot.slane %v571_v62, 5  ;;  %v554_v18 = vrot.slane %v552_v52, 4  ;;  %v589_v56 = vshrl.u32 %v4753_v16, 16  ;;  %707 = vrot.lane.b32.xlu0 %v4875_v43, %s4451_s21  ;;  %v4891_v41 = vsel %vm4551_vm3, %v545_v19, %v549_v45 }
  0x4b   : > { %6559 = vst [vmem:[#allocation33_spill] sm:$0xff] %v4891_v41  ;;  %v535_v51 = vrot.slane %v534_v13, 4  ;;  %v568_v20 = vor.u32 %v567_v14, %v563_v46  ;;  %v557_v25 = vrot.slane %v555_v38, 5  ;;  %v587_v30 = vrot.slane %v585_v55, 5 }
  0x4c   : > { %v591_v7 = vrot.slane %v589_v56, 4  ;;  %v595_v62 = vshll.u32 %v4881_v47, 16  ;;  %v576_v52 = vshrl.u32 %v4767_v37, 16  ;;  %v579_v43 = vshll.u32 %v4767_v37, 16  ;;  %713 = vrot.lane.b32.xlu1 %v4891_v41, %s4451_s21 }
  0x4d   : > { %v4897_v5 = vsel %vm4551_vm3, %v535_v51, %v539_v60  ;;  %v569_v63 = vrot.slane %v568_v20, 4  ;;  %v558_v16 = vor.u32 %v557_v25, %v554_v18  ;;  %v609_v45 = vshll.u32 %v4775_v48, 16 }
  0x4e   : > { %6560 = vst [vmem:[#allocation34_spill] sm:$0xff] %v4897_v5  ;;  %v592_v38 = vor.u32 %v591_v7, %v587_v30  ;;  %v597_v13 = vrot.slane %v595_v62, 5  ;;  %v578_v14 = vrot.slane %v576_v52, 4  ;;  %711 = vrot.lane.b32.xlu0 %v4897_v5, %s4451_s21  ;;  %v581_v18 = vrot.slane %v579_v43, 5 }
  0x4f   : > { %v4910_v60 = vsel %vm4551_vm3, %v569_v63, %v573_v23  ;;  %v559_v19 = vrot.slane %v558_v16, 4  ;;  %v613_v55 = vshrl.u32 %v4775_v48, 16  ;;  %v611_v51 = vrot.slane %v609_v45, 5  ;;  %v4921_v16 = vld [vmem:[%s4502_s20 + $0xb0] sm:$0x1] }
  0x50   : > { %6561 = vst [vmem:[#allocation35_spill] sm:$0xff] %v4910_v60  ;;  %v593_v56 = vrot.slane %v592_v38, 4  ;;  %v619_v20 = vshll.u32 %v4901_v24, 16  ;;  %v600_v25 = vshrl.u32 %v4791_v8, 16  ;;  %v582_v62 = vor.u32 %v581_v18, %v578_v14  ;;  %717 = vrot.lane.b32.xlu1 %v4910_v60, %s4451_s21 }
  0x51   : > { %v4917_v7 = vsel %vm4551_vm3, %v559_v19, %v563_v46  ;;  %v615_v52 = vrot.slane %v613_v55, 4  ;;  %v603_v63 = vshll.u32 %v4791_v8, 16  ;;  %v633_v45 = vshll.u32 %v4802_v40, 16 }
  0x52   : > { %6562 = vst [vmem:[#allocation36_spill] sm:$0xff] %v4917_v7  ;;  %v4927_v43 = vsel %vm4551_vm3, %v593_v56, %v597_v13  ;;  %v621_v23 = vrot.slane %v619_v20, 5  ;;  %v602_v38 = vrot.slane %v600_v25, 4  ;;  %715 = vrot.lane.b32.xlu0 %v4917_v7, %s4451_s21  ;;  %v583_v46 = vrot.slane %v582_v62, 4  ;;  %v4941_v7 = vld [vmem:[%s4502_s20 + $0xbc] sm:$0x1] }
  0x53   : > { %6563 = vst [vmem:[#allocation37_spill] sm:$0xff] %v4927_v43  ;;  %v616_v14 = vor.u32 %v615_v52, %v611_v51  ;;  %v605_v19 = vrot.slane %v603_v63, 5  ;;  %v637_v18 = vshrl.u32 %v4802_v40, 16  ;;  %v635_v55 = vrot.slane %v633_v45, 5 }
  0x54   : > { %v643_v60 = vshll.u32 %v4921_v16, 16  ;;  %v624_v5 = vshrl.u32 %v4814_v61, 16  ;;  %v627_v13 = vshll.u32 %v4814_v61, 16  ;;  %v4938_v56 = vsel %vm4551_vm3, %v583_v46, %v587_v30  ;;  %721 = vrot.lane.b32.xlu1 %v4927_v43, %s4451_s21 }
  0x55   : > { %6564 = vst [vmem:[#allocation38_spill] sm:$0xff] %v4938_v56  ;;  %v617_v20 = vrot.slane %v616_v14, 4  ;;  %v606_v25 = vor.u32 %v605_v19, %v602_v38  ;;  %v639_v41 = vrot.slane %v637_v18, 4  ;;  %v657_v45 = vshll.u32 %v4822_v12, 16 }
  0x56   : > { %v645_v62 = vrot.slane %v643_v60, 5  ;;  %v626_v52 = vrot.slane %v624_v5, 4  ;;  %v629_v63 = vrot.slane %v627_v13, 5  ;;  %719 = vrot.lane.b32.xlu0 %v4938_v56, %s4451_s21  ;;  %v661_v14 = vshrl.u32 %v4822_v12, 16 }
  0x57   : > { %v4950_v30 = vsel %vm4551_vm3, %v617_v20, %v621_v23  ;;  %v607_v46 = vrot.slane %v606_v25, 4  ;;  %v640_v38 = vor.u32 %v639_v41, %v635_v55  ;;  %v659_v18 = vrot.slane %v657_v45, 5 }
  0x58   : > { %v630_v19 = vor.u32 %v629_v63, %v626_v52  ;;  %v667_v43 = vshll.u32 %v4941_v7, 16  ;;  %v648_v5 = vshrl.u32 %v4839_v11, 16  ;;  %v663_v56 = vrot.slane %v661_v14, 4  ;;  %725 = vrot.lane.b32.xlu1 %v4950_v30, %s4451_s21 }
  0x59   : > { %v4957_v60 = vsel %vm4551_vm3, %v607_v46, %v611_v51  ;;  %v641_v13 = vrot.slane %v640_v38, 4  ;;  %v651_v61 = vshll.u32 %v4839_v11, 16  ;;  %v853_v45 = vrot.slane %v4517_v6, 5 }
  0x5a   : > { %v631_v41 = vrot.slane %v630_v19, 4  ;;  %v669_v23 = vrot.slane %v667_v43, 5  ;;  %v650_v20 = vrot.slane %v648_v5, 4  ;;  %723 = vrot.lane.b32.xlu0 %v4957_v60, %s4451_s21  ;;  %v664_v52 = vor.u32 %v663_v56, %v659_v18 }
  0x5b   : > { %v4966_v25 = vsel %vm4551_vm3, %v641_v13, %v645_v62  ;;  %v653_v51 = vrot.slane %v651_v61, 5  ;;  %v4151_v46 = vrot.slane %v4511_v2, 9  ;;  %v856_v61 = vrot.slane %v4536_v17, 5 }
  0x5c   : > { %6565 = vst [vmem:[#allocation39_spill] sm:$0xff] %v4966_v25  ;;  %v4977_v43 = vsel %vm4551_vm3, %v631_v41, %v635_v55  ;;  %v665_v38 = vrot.slane %v664_v52, 4  ;;  %729 = vrot.lane.b32.xlu1 %v4966_v25, %s4451_s21  ;;  %v855_v62 = vrot.slane %v853_v45, 4  ;;  %v860_v2 = vrot.slane %v4508_v1, 5  ;;  %v6581_v25 = vld [vmem:[#allocation26_spill] sm:$0xff] }
  0x5d   : > { %6568 = vst [vmem:[#allocation40_spill] sm:$0xff] %v4977_v43  ;;  %v654_v14 = vor.u32 %v653_v51, %v650_v20  ;;  %v854_v56 = vsel %vm4970_vm6, %v4151_v46, %v853_v45  ;;  %v863_v13 = vrot.slane %v4529_v10, 5  ;;  %v867_v41 = vrot.slane %v4540_v22, 5 }
  0x5e   : > { %727 = vrot.lane.b32.xlu0 %v4977_v43, %s4451_s21  ;;  %v4989_v6 = vsel %vm4551_vm3, %v665_v38, %v669_v23  ;;  %v857_v17 = vsel %vm4970_vm6, %v855_v62, %v856_v61  ;;  %v862_v5 = vrot.slane %v860_v2, 4  ;;  %v4152_v23 = vrot.slane %v4505_v0, 9 }
  0x5f   : > { %6569 = vst [vmem:[#allocation41_spill] sm:$0xff] %v4989_v6  ;;  %v655_v55 = vrot.slane %v654_v14, 4  ;;  %v869_v20 = vrot.slane %v867_v41, 4  ;;  %v870_v52 = vrot.slane %v4544_v26, 5  ;;  %v874_v51 = vrot.slane %v4560_v34, 5 }
  0x60   : > { %733 = vrot.lane.b32.xlu1 %v4989_v6, %s4451_s21  ;;  %v5015_v10 = vsel %vm4970_vm6, %v4152_v23, %v860_v2  ;;  %v4153_v45 = vrot.slane %v4557_v33, 9  ;;  %v877_v26 = vrot.slane %v4563_v39, 5  ;;  %v881_v14 = vrot.slane %v4580_v49, 5 }
  0x61   : > { %v4994_v19 = vsel %vm4551_vm3, %v655_v55, %v659_v18  ;;  %v5009_v18 = vsel %vm4970_vm6, %v862_v5, %v863_v13  ;;  %v5024_v46 = vsel %vm4970_vm6, %v869_v20, %v870_v52  ;;  %v876_v38 = vrot.slane %v874_v51, 4 }
  0x62   : > { %6570 = vst [vmem:[#allocation42_spill] sm:$0xff] %v4994_v19  ;;  %731 = vrot.lane.b32.xlu0 %v4994_v19, %s4451_s21  ;;  %v5030_v61 = vsel %vm4970_vm6, %v4153_v45, %v867_v41  ;;  %v883_v62 = vrot.slane %v881_v14, 4  ;;  %v884_v39 = vrot.slane %v4610_v3, 5  ;;  %v888_v2 = vrot.slane %v4602_v59, 5  ;;  %s6381_s21 = scalar_lea.vmem %s6442_s4, %s4150_s19 }
  0x63   : > { %v5039_v55 = vsel %vm4970_vm6, %v876_v38, %v877_v26  ;;  %v4155_v5 = vrot.slane %v4593_v54, 9  ;;  %v891_v3 = vrot.slane %v4645_v32, 5  ;;  %v895_v23 = vrot.slane %v4626_v15, 5 }
  0x64   : > { %965 = vrot.lane.b32.xlu1 %v857_v17, %s4452_s22  ;;  %v5054_v13 = vsel %vm4970_vm6, %v883_v62, %v884_v39  ;;  %v890_v41 = vrot.slane %v888_v2, 4  ;;  %v4156_v52 = vrot.slane %v4617_v9, 9  ;;  %v898_v32 = vrot.slane %v4677_v57, 5 }
  0x65   : > { %v5060_v20 = vsel %vm4970_vm6, %v4155_v5, %v881_v14  ;;  %v897_v45 = vrot.slane %v895_v23, 4  ;;  %v902_v38 = vrot.slane %v4649_v36, 5  ;;  %v4157_v14 = vrot.slane %v4638_v27, 9 }
  0x66   : > { %963 = vrot.lane.b32.xlu0 %v854_v56, %s4452_s22  ;;  %v4154_v56 = vrot.slane %v4571_v44, 9  ;;  %v5075_v26 = vsel %vm4970_vm6, %v4156_v52, %v888_v2  ;;  %v905_v57 = vrot.slane %v4720_v31, 5  ;;  %v909_v39 = vrot.slane %v4666_v50, 5 }
  0x67   : > { %v904_v62 = vrot.slane %v902_v38, 4  ;;  %v5090_v2 = vsel %vm4970_vm6, %v4157_v14, %v895_v23  ;;  %v4158_v5 = vrot.slane %v4656_v42, 9  ;;  %v912_v31 = vrot.slane %v4764_v35, 5  ;;  %v6574_v35 = vld [vmem:[#allocation23_spill] sm:$0xff] }
  0x68   : > { %969 = vrot.lane.b32.xlu1 %v5009_v18, %s4452_s22  ;;  %v5045_v17 = vsel %vm4970_vm6, %v4154_v56, %v874_v51  ;;  %v5069_v51 = vsel %vm4970_vm6, %v890_v41, %v891_v3  ;;  %v5084_v56 = vsel %vm4970_vm6, %v897_v45, %v898_v32  ;;  %v911_v3 = vrot.slane %v909_v39, 4 }
  0x69   : > { %v5099_v41 = vsel %vm4970_vm6, %v904_v62, %v905_v57  ;;  %v916_v52 = vrot.slane %v4690_v4, 5  ;;  %v5105_v23 = vsel %vm4970_vm6, %v4158_v5, %v902_v38  ;;  %v4159_v45 = vrot.slane %v4680_v58, 9  ;;  %v6576_v5 = vld [vmem:[#allocation14_spill] sm:$0xff] }
  0x6a   : > { %967 = vrot.lane.b32.xlu0 %v5015_v10, %s4452_s22  ;;  %6571 = vst [vmem:[#allocation43_spill] sm:$0xff] %v5099_v41  ;;  %6572 = vst [vmem:[#allocation44_spill] sm:$0xff] %v5105_v23  ;;  %v5114_v32 = vsel %vm4970_vm6, %v911_v3, %v912_v31  ;;  %v919_v62 = vrot.slane %v6574_v35, 5  ;;  %v923_v57 = vrot.slane %v4711_v21, 5  ;;  %v4160_v28 = vrot.slane %v6576_v5, 9 }
  0x6b   : > { %6573 = vst [vmem:[#allocation45_spill] sm:$0xff] %v5114_v32  ;;  %v918_v14 = vrot.slane %v916_v52, 4  ;;  %v5120_v38 = vsel %vm4970_vm6, %v4159_v45, %v909_v39  ;;  %v926_v35 = vrot.slane %v4836_v29, 5  ;;  %v930_v19 = vrot.slane %v4735_v53, 5  ;;  %v6577_v45 = vld [vmem:[#allocation16_spill] sm:$0xff]  ;;  %v6578_v29 = vld [vmem:[#allocation30_spill] sm:$0xff] }
  0x6c   : > { %973 = vrot.lane.b32.xlu1 %v5024_v46, %s4452_s22  ;;  %6575 = vst [vmem:[#allocation23_spill] sm:$0xff] %v5120_v38  ;;  %v925_v31 = vrot.slane %v923_v57, 4  ;;  %v5135_v39 = vsel %vm4970_vm6, %v4160_v28, %v916_v52  ;;  %v4161_v6 = vrot.slane %v6577_v45, 9  ;;  %v6580_v52 = vld [vmem:[#allocation18_spill] sm:$0xff]  ;;  %v958_v43 = vrot.slane %v4822_v12, 5 }
  0x6d   : > { %v5129_v3 = vsel %vm4970_vm6, %v918_v14, %v919_v62  ;;  %v932_v62 = vrot.slane %v930_v19, 4  ;;  %v4162_v50 = vrot.slane %v6580_v52, 9  ;;  %vm2066_vm0 = vcmask 293888  }
  0x6e   : > { %971 = vrot.lane.b32.xlu0 %v5030_v61, %s4452_s22  ;;  %v5144_v14 = vsel %vm4970_vm6, %v925_v31, %v926_v35  ;;  %v5150_v28 = vsel %vm4970_vm6, %v4161_v6, %v923_v57  ;;  %v4163_v57 = vrot.slane %v4767_v37, 9 }
  0x6f   : > { %v5165_v6 = vsel %vm4970_vm6, %v4162_v50, %v930_v19  ;;  %v4164_v19 = vrot.slane %v4791_v8, 9 }
  0x70   : > { %977 = vrot.lane.b32.xlu1 %v5039_v55, %s4452_s22 }
  0x72   : > { %975 = vrot.lane.b32.xlu0 %v5045_v17, %s4452_s22 }
  0x74   : > { %981 = vrot.lane.b32.xlu1 %v5054_v13, %s4452_s22 }
  0x76   : > { %979 = vrot.lane.b32.xlu0 %v5060_v20, %s4452_s22 }
  0x78   : > { %985 = vrot.lane.b32.xlu1 %v5069_v51, %s4452_s22 }
  0x7a   : > { %983 = vrot.lane.b32.xlu0 %v5075_v26, %s4452_s22 }
  0x7c   : > { %989 = vrot.lane.b32.xlu1 %v5084_v56, %s4452_s22 }
  0x7e   : > { %987 = vrot.lane.b32.xlu0 %v5090_v2, %s4452_s22 }
  0x80   : > { %993 = vrot.lane.b32.xlu1 %v5099_v41, %s4452_s22  ;;  %v951_v41 = vrot.slane %v4802_v40, 5  ;;  %v4165_v40 = vrot.slane %v6581_v25, 9 }
  0x82   : > { %991 = vrot.lane.b32.xlu0 %v5105_v23, %s4452_s22  ;;  %v944_v23 = vrot.slane %v4775_v48, 5 }
  0x84   : > { %997 = vrot.lane.b32.xlu1 %v5114_v32, %s4452_s22  ;;  %v6579_v32 = vld [vmem:[#allocation19_spill] sm:$0xff] }
  0x85   : > { %v937_v58 = vrot.slane %v6579_v32, 5 }
  0x86   : > { %995 = vrot.lane.b32.xlu0 %v5120_v38, %s4452_s22  ;;  %v933_v38 = vrot.slane %v6578_v29, 5  ;;  %v940_v29 = vrot.slane %v4881_v47, 5  ;;  %v947_v47 = vrot.slane %v4901_v24, 5  ;;  %v953_v24 = vrot.slane %v951_v41, 4 }
  0x87   : > { %v939_v35 = vrot.slane %v937_v58, 4  ;;  %v5180_v50 = vsel %vm4970_vm6, %v4163_v57, %v937_v58  ;;  %v5195_v57 = vsel %vm4970_vm6, %v4164_v19, %v944_v23  ;;  %v5211_v19 = vsel %vm4970_vm6, %v4165_v40, %v951_v41 }
  0x88   : > { %1001 = vrot.lane.b32.xlu1 %v5129_v3, %s4452_s22  ;;  %v5159_v31 = vsel %vm4970_vm6, %v932_v62, %v933_v38  ;;  %v946_v62 = vrot.slane %v944_v23, 4  ;;  %v961_v23 = vrot.slane %v4941_v7, 5 }
  0x89   : > { %v5174_v38 = vsel %vm4970_vm6, %v939_v35, %v940_v29  ;;  %v954_v29 = vrot.slane %v4921_v16, 5 }
  0x8a   : > { %999 = vrot.lane.b32.xlu0 %v5135_v39, %s4452_s22  ;;  %v5189_v35 = vsel %vm4970_vm6, %v946_v62, %v947_v47  ;;  %v960_v62 = vrot.slane %v958_v43, 4 }
  0x8b   : > { %v5206_v16 = vsel %vm4970_vm6, %v953_v24, %v954_v29 }
  0x8c   : > { %1005 = vrot.lane.b32.xlu1 %v5144_v14, %s4452_s22  ;;  %v5222_v7 = vsel %vm4970_vm6, %v960_v62, %v961_v23 }
  0x8e   : > { %1003 = vrot.lane.b32.xlu0 %v5150_v28, %s4452_s22  ;;  %v676_v58 = vpop.permute.xlu1 %675 }
  0x8f   : > { %770 = vst.msk [vmem:[#allocation2 + $0x8] sm:$0xf] %vm767_vm7, %v676_v58  ;;  %v672_v42 = vpop.permute.xlu0 %671 }
  0x90   : > { %1009 = vrot.lane.b32.xlu1 %v5159_v31, %s4452_s22  ;;  %768 = vst.msk [vmem:[#allocation2] sm:$0xf] %vm767_vm7, %v672_v42  ;;  %v4166_v42 = vrot.slane %v4839_v11, 9 }
  0x92   : > { %1007 = vrot.lane.b32.xlu0 %v5165_v6, %s4452_s22  ;;  %v678_v47 = vpop.permute.xlu1 %677  ;;  %v5226_v40 = vsel %vm4970_vm6, %v4166_v42, %v958_v43 }
  0x93   : > { %771 = vst.msk [vmem:[#allocation2 + $0xc] sm:$0xf] %vm767_vm7, %v678_v47  ;;  %v674_v58 = vpop.permute.xlu0 %673 }
  0x94   : > { %1013 = vrot.lane.b32.xlu1 %v5174_v38, %s4452_s22  ;;  %769 = vst.msk [vmem:[#allocation2 + $0x4] sm:$0xf] %vm767_vm7, %v674_v58 }
  0x96   : > { %1011 = vrot.lane.b32.xlu0 %v5180_v50, %s4452_s22  ;;  %v682_v24 = vpop.permute.xlu1 %681 }
  0x97   : > { %773 = vst.msk [vmem:[#allocation2 + $0x14] sm:$0xf] %vm767_vm7, %v682_v24 }
  0x98   : > { %1017 = vrot.lane.b32.xlu1 %v5189_v35, %s4452_s22  ;;  %v680_v41 = vpop.permute.xlu0 %679 }
  0x99   : > { %772 = vst.msk [vmem:[#allocation2 + $0x10] sm:$0xf] %vm767_vm7, %v680_v41 }
  0x9a   : > { %1015 = vrot.lane.b32.xlu0 %v5195_v57, %s4452_s22 }
  0x9b   : > { %v686_v29 = vpop.permute.xlu1 %685 }
  0x9c   : > { %1021 = vrot.lane.b32.xlu1 %v5206_v16, %s4452_s22  ;;  %775 = vst.msk [vmem:[#allocation2 + $0x1c] sm:$0xf] %vm767_vm7, %v686_v29  ;;  %v684_v62 = vpop.permute.xlu0 %683 }
  0x9d   : > { %774 = vst.msk [vmem:[#allocation2 + $0x18] sm:$0xf] %vm767_vm7, %v684_v62  ;;  %v6582_v62 = vld [vmem:[#allocation5_spill] sm:$0xff] }
  0x9e   : > { %1019 = vrot.lane.b32.xlu0 %v5211_v19, %s4452_s22 }
  0xa0   : > { %1025 = vrot.lane.b32.xlu1 %v5222_v7, %s4452_s22  ;;  %v690_v43 = vpop.permute.xlu1 %689 }
  0xa1   : > { %777 = vst.msk [vmem:[#allocation2 + $0x24] sm:$0xf] %vm767_vm7, %v690_v43  ;;  %v688_v23 = vpop.permute.xlu0 %687  ;;  %v6583_v43 = vld [vmem:[#allocation4_spill] sm:$0xff] }
  0xa2   : > { %1023 = vrot.lane.b32.xlu0 %v5226_v40, %s4452_s22  ;;  %776 = vst.msk [vmem:[#allocation2 + $0x20] sm:$0xf] %vm767_vm7, %v688_v23 }
  0xa4   : > { %1096 = vrot.lane.b32.xlu1 %v4508_v1, %s4453_s23 }
  0xa6   : > { %1094 = vrot.lane.b32.xlu0 %v4505_v0, %s4453_s23  ;;  %v694_v47 = vpop.permute.xlu1 %693 }
  0xa7   : > { %779 = vst.msk [vmem:[#allocation2 + $0x2c] sm:$0xf] %vm767_vm7, %v694_v47 }
  0xa8   : > { %1100 = vrot.lane.b32.xlu1 %v4540_v22, %s4453_s23  ;;  %v692_v42 = vpop.permute.xlu0 %691 }
  0xa9   : > { %778 = vst.msk [vmem:[#allocation2 + $0x28] sm:$0xf] %vm767_vm7, %v692_v42  ;;  %v6584_v42 = vld [vmem:[#allocation6_spill] sm:$0xff] }
  0xaa   : > { %1098 = vrot.lane.b32.xlu0 %v4557_v33, %s4453_s23 }
  0xab   : > { %v698_v0 = vpop.permute.xlu1 %697 }
  0xac   : > { %1104 = vrot.lane.b32.xlu1 %v4560_v34, %s4453_s23  ;;  %781 = vst.msk [vmem:[#allocation2 + $0x34] sm:$0xf] %vm767_vm7, %v698_v0  ;;  %v6585_v0 = vld [vmem:[#allocation7_spill] sm:$0xff] }
  0xad   : > { %v696_v1 = vpop.permute.xlu0 %695 }
  0xae   : > { %1102 = vrot.lane.b32.xlu0 %v4571_v44, %s4453_s23  ;;  %780 = vst.msk [vmem:[#allocation2 + $0x30] sm:$0xf] %vm767_vm7, %v696_v1 }
  0xaf   : > { %v702_v58 = vpop.permute.xlu1 %701 }
  0xb0   : > { %1108 = vrot.lane.b32.xlu1 %v4580_v49, %s4453_s23  ;;  %783 = vst.msk [vmem:[#allocation2 + $0x3c] sm:$0xf] %vm767_vm7, %v702_v58 }
  0xb2   : > { %1106 = vrot.lane.b32.xlu0 %v4593_v54, %s4453_s23  ;;  %v700_v24 = vpop.permute.xlu0 %699 }
  0xb3   : > { %782 = vst.msk [vmem:[#allocation2 + $0x38] sm:$0xf] %vm767_vm7, %v700_v24 }
  0xb4   : > { %1112 = vrot.lane.b32.xlu1 %v4602_v59, %s4453_s23 }
  0xb6   : > { %1110 = vrot.lane.b32.xlu0 %v4617_v9, %s4453_s23  ;;  %v706_v41 = vpop.permute.xlu1 %705 }
  0xb7   : > { %785 = vst.msk [vmem:[#allocation2 + $0x44] sm:$0xf] %vm767_vm7, %v706_v41 }
  0xb8   : > { %v704_v29 = vpop.permute.xlu0 %703  ;;  %1249 = vrot.lane.b32.xlu1 %v6582_v62, %s4454_s24 }
  0xb9   : > { %784 = vst.msk [vmem:[#allocation2 + $0x40] sm:$0xf] %vm767_vm7, %v704_v29 }
  0xba   : > { %1247 = vrot.lane.b32.xlu0 %v6583_v43, %s4454_s24  ;;  %v710_v23 = vpop.permute.xlu1 %709 }
  0xbb   : > { %787 = vst.msk [vmem:[#allocation2 + $0x4c] sm:$0xf] %vm767_vm7, %v710_v23 }
  0xbc   : > { %v708_v47 = vpop.permute.xlu0 %707  ;;  %1253 = vrot.lane.b32.xlu1 %v6584_v42, %s4454_s24 }
  0xbd   : > { %786 = vst.msk [vmem:[#allocation2 + $0x48] sm:$0xf] %vm767_vm7, %v708_v47 }
  0xbe   : > { %1251 = vrot.lane.b32.xlu0 %v6585_v0, %s4454_s24  ;;  %v714_v1 = vpop.permute.xlu1 %713 }
  0xbf   : > { %789 = vst.msk [vmem:[#allocation2 + $0x54] sm:$0xf] %vm767_vm7, %v714_v1  ;;  %v6587_v1 = vld [vmem:[#allocation32_spill] sm:$0xff] }
  0xc0   : > { %v712_v58 = vpop.permute.xlu0 %711  ;;  %1386 = vrot.lane.b32.xlu1 %v5009_v18, %s4455_s25 }
  0xc1   : > { %788 = vst.msk [vmem:[#allocation2 + $0x50] sm:$0xf] %vm767_vm7, %v712_v58 }
  0xc2   : > { %1384 = vrot.lane.b32.xlu0 %v5015_v10, %s4455_s25  ;;  %v718_v24 = vpop.permute.xlu1 %717 }
  0xc3   : > { %791 = vst.msk [vmem:[#allocation2 + $0x5c] sm:$0xf] %vm767_vm7, %v718_v24 }
  0xc4   : > { %v716_v41 = vpop.permute.xlu0 %715  ;;  %1390 = vrot.lane.b32.xlu1 %v5024_v46, %s4455_s25 }
  0xc5   : > { %790 = vst.msk [vmem:[#allocation2 + $0x58] sm:$0xf] %vm767_vm7, %v716_v41  ;;  %v4422_v41 = vld [vmem:[%s6439_s1 + $0x10] ss:$0 sps:$4 sm:$0x33]  }
  0xc6   : > { %1388 = vrot.lane.b32.xlu0 %v5030_v61, %s4455_s25  ;;  %v722_v29 = vpop.permute.xlu1 %721  ;;  %4399 = vmatprep.subr.msk.bf16.mxu0 %vm2115_vm9, %v4422_v41 }
  0xc7   : > { %793 = vst.msk [vmem:[#allocation2 + $0x64] sm:$0xf] %vm767_vm7, %v722_v29  ;;  %v6588_v29 = vld [vmem:[#allocation10_spill] sm:$0xff]  ;;  %4400 = vmatprep.subr.msk.bf16.mxu1 %vm2115_vm9, %v4422_v41 }
  0xc8   : > { %v720_v62 = vpop.permute.xlu0 %719  ;;  %1517 = vrot.lane.b32.xlu1 %v4540_v22, %s4456_s26 }
  0xc9   : > { %792 = vst.msk [vmem:[#allocation2 + $0x60] sm:$0xf] %vm767_vm7, %v720_v62  ;;  %v6589_v62 = vld [vmem:[#allocation12_spill] sm:$0xff] }
  0xca   : > { %1515 = vrot.lane.b32.xlu0 %v4557_v33, %s4456_s26  ;;  %v726_v18 = vpop.permute.xlu1 %725 }
  0xcb   : > { %795 = vst.msk [vmem:[#allocation2 + $0x6c] sm:$0xf] %vm767_vm7, %v726_v18  ;;  %v2117_v18 = vsel %vm2115_vm9, %v4422_v41, 0  ;;  %vm3777_vm9 = vcmask 130112  }
  0xcc   : > { %v724_v10 = vpop.permute.xlu0 %723  ;;  %1128 = vrot.lane.b32.xlu1 %v4690_v4, %s4453_s23  ;;  %4356 = vmatpush3.bf16.msra.mxu0 %v2117_v18 }
  0xcd   : > { %794 = vst.msk [vmem:[#allocation2 + $0x68] sm:$0xf] %vm767_vm7, %v724_v10  ;;  %4396 = vmatpush3.bf16.msra.mxu1 %v2117_v18 }
  0xce   : > { %1126 = vrot.lane.b32.xlu0 %v6576_v5, %s4453_s23  ;;  %v730_v43 = vpop.permute.xlu1 %729 }
  0xcf   : > { %797 = vst.msk [vmem:[#allocation2 + $0x74] sm:$0xf] %vm767_vm7, %v730_v43 }
  0xd0   : > { %v728_v23 = vpop.permute.xlu0 %727  ;;  %1521 = vrot.lane.b32.xlu1 %v4560_v34, %s4456_s26 }
  0xd1   : > { %796 = vst.msk [vmem:[#allocation2 + $0x70] sm:$0xf] %vm767_vm7, %v728_v23  ;;  %v4424_v23 = vld [vmem:[%s6439_s1 + $0x8] sm:$0xff]  }
  0xd2   : > { %1519 = vrot.lane.b32.xlu0 %v4571_v44, %s4456_s26  ;;  %v734_v22 = vpop.permute.xlu1 %733  ;;  %4357 = vmatprep.subr.bf16.mxu0 %v4424_v23 }
  0xd3   : > { %799 = vst.msk [vmem:[#allocation2 + $0x7c] sm:$0xf] %vm767_vm7, %v734_v22  ;;  %4358 = vmatpush3.bf16.msra.mxu0 %v4424_v23  ;;  %4394 = vmatprep.subr.bf16.mxu1 %v4424_v23 }
  0xd4   : > { %v732_v33 = vpop.permute.xlu0 %731  ;;  %1670 = vrot.lane.b32.xlu1 %v6584_v42, %s4457_s27  ;;  %4397 = vmatpush3.bf16.msra.mxu1 %v4424_v23 }
  0xd5   : > { %798 = vst.msk [vmem:[#allocation2 + $0x78] sm:$0xf] %vm767_vm7, %v732_v33  ;;  %vm3722_vm7 = vcmask 1047559  }
  0xd6   : > { %1668 = vrot.lane.b32.xlu0 %v6585_v0, %s4457_s27  ;;  %v966_v47 = vpop.permute.xlu1 %965  ;;  %v6586_v0 = vld [vmem:[#allocation31_spill] sm:$0xff] }
  0xd7   : > { %1061 = vst.msk [vmem:[#allocation2 + $0x4] sm:$0xf] %vm1059_vm8, %v966_v47  ;;  %v4425_v47 = vld [vmem:[%s6439_s1] sm:$0xff]  }
  0xd8   : > { %v964_v34 = vpop.permute.xlu0 %963  ;;  %1132 = vrot.lane.b32.xlu1 %v4711_v21, %s4453_s23  ;;  %4359 = vmatprep.subr.bf16.mxu0 %v4425_v47 }
  0xd9   : > { %1060 = vst.msk [vmem:[#allocation2] sm:$0xf] %vm1059_vm8, %v964_v34  ;;  %v6590_v34 = vld [vmem:[#allocation33_spill] sm:$0xff]  ;;  %4360 = vmatpush3.bf16.msra.mxu0 %v4425_v47  ;;  %4395 = vmatprep.subr.bf16.mxu1 %v4425_v47 }
  0xda   : > { %1130 = vrot.lane.b32.xlu0 %v6577_v45, %s4453_s23  ;;  %v970_v44 = vpop.permute.xlu1 %969  ;;  %4398 = vmatpush3.bf16.msra.mxu1 %v4425_v47 }
  0xdb   : > { %1063 = vst.msk [vmem:[#allocation2 + $0xc] sm:$0xf] %vm1059_vm8, %v970_v44 }
  0xdc   : > { %v968_v42 = vpop.permute.xlu0 %967  ;;  %1281 = vrot.lane.b32.xlu1 %v6586_v0, %s4454_s24 }
  0xdd   : > { %1062 = vst.msk [vmem:[#allocation2 + $0x8] sm:$0xf] %vm1059_vm8, %v968_v42 }
  0xde   : > { %1279 = vrot.lane.b32.xlu0 %v6587_v1, %s4454_s24  ;;  %v974_v58 = vpop.permute.xlu1 %973 }
  0xdf   : > { %1065 = vst.msk [vmem:[#allocation2 + $0x14] sm:$0xf] %vm1059_vm8, %v974_v58 }
  0xe0   : > { %v972_v24 = vpop.permute.xlu0 %971  ;;  %1674 = vrot.lane.b32.xlu1 %v6588_v29, %s4457_s27 }
  0xe1   : > { %1064 = vst.msk [vmem:[#allocation2 + $0x10] sm:$0xf] %vm1059_vm8, %v972_v24 }
  0xe2   : > { %1672 = vrot.lane.b32.xlu0 %v6589_v62, %s4457_s27  ;;  %v978_v10 = vpop.permute.xlu1 %977 }
  0xe3   : > { %1067 = vst.msk [vmem:[#allocation2 + $0x1c] sm:$0xf] %vm1059_vm8, %v978_v10 }
  0xe4   : > { %v976_v43 = vpop.permute.xlu0 %975  ;;  %1807 = vrot.lane.b32.xlu1 %v5024_v46, %s4458_s6  ;;  %v6591_v46 = vld [vmem:[#allocation34_spill] sm:$0xff] }
  0xe5   : > { %1066 = vst.msk [vmem:[#allocation2 + $0x18] sm:$0xf] %vm1059_vm8, %v976_v43 }
  0xe6   : > { %1805 = vrot.lane.b32.xlu0 %v5030_v61, %s4458_s6  ;;  %v982_v22 = vpop.permute.xlu1 %981 }
  0xe7   : > { %1069 = vst.msk [vmem:[#allocation2 + $0x24] sm:$0xf] %vm1059_vm8, %v982_v22 }
  0xe8   : > { %v980_v33 = vpop.permute.xlu0 %979  ;;  %1285 = vrot.lane.b32.xlu1 %v6590_v34, %s4454_s24 }
  0xe9   : > { %1068 = vst.msk [vmem:[#allocation2 + $0x20] sm:$0xf] %vm1059_vm8, %v980_v33 }
  0xea   : > { %1283 = vrot.lane.b32.xlu0 %v6591_v46, %s4454_s24  ;;  %v986_v61 = vpop.permute.xlu1 %985 }
  0xeb   : > { %1071 = vst.msk [vmem:[#allocation2 + $0x2c] sm:$0xf] %vm1059_vm8, %v986_v61 }
  0xec   : > { %v984_v44 = vpop.permute.xlu0 %983  ;;  %1418 = vrot.lane.b32.xlu1 %v5129_v3, %s4455_s25 }
  0xed   : > { %1070 = vst.msk [vmem:[#allocation2 + $0x28] sm:$0xf] %vm1059_vm8, %v984_v44 }
  0xee   : > { %1416 = vrot.lane.b32.xlu0 %v5135_v39, %s4455_s25  ;;  %v990_v42 = vpop.permute.xlu1 %989 }
  0xef   : > { %1073 = vst.msk [vmem:[#allocation2 + $0x34] sm:$0xf] %vm1059_vm8, %v990_v42 }
  0xf0   : > { %v988_v58 = vpop.permute.xlu0 %987  ;;  %1811 = vrot.lane.b32.xlu1 %v5039_v55, %s4458_s6 }
  0xf1   : > { %1072 = vst.msk [vmem:[#allocation2 + $0x30] sm:$0xf] %vm1059_vm8, %v988_v58  ;;  %v6594_v58 = vld [vmem:[#allocation13_spill] sm:$0xff] }
  0xf2   : > { %1809 = vrot.lane.b32.xlu0 %v5045_v17, %s4458_s6  ;;  %v994_v24 = vpop.permute.xlu1 %993 }
  0xf3   : > { %1075 = vst.msk [vmem:[#allocation2 + $0x3c] sm:$0xf] %vm1059_vm8, %v994_v24  ;;  %v6595_v24 = vld [vmem:[#allocation15_spill] sm:$0xff] }
  0xf4   : > { %v992_v41 = vpop.permute.xlu0 %991  ;;  %1422 = vrot.lane.b32.xlu1 %v5144_v14, %s4455_s25 }
  0xf5   : > { %1074 = vst.msk [vmem:[#allocation2 + $0x38] sm:$0xf] %vm1059_vm8, %v992_v41 }
  0xf6   : > { %1420 = vrot.lane.b32.xlu0 %v5150_v28, %s4455_s25  ;;  %v998_v18 = vpop.permute.xlu1 %997 }
  0xf7   : > { %1077 = vst.msk [vmem:[#allocation2 + $0x44] sm:$0xf] %vm1059_vm8, %v998_v18 }
  0xf8   : > { %v996_v10 = vpop.permute.xlu0 %995  ;;  %1549 = vrot.lane.b32.xlu1 %v4711_v21, %s4456_s26 }
  0xf9   : > { %1076 = vst.msk [vmem:[#allocation2 + $0x40] sm:$0xf] %vm1059_vm8, %v996_v10 }
  0xfa   : > { %1547 = vrot.lane.b32.xlu0 %v6577_v45, %s4456_s26  ;;  %v1002_v43 = vpop.permute.xlu1 %1001 }
  0xfb   : > { %1079 = vst.msk [vmem:[#allocation2 + $0x4c] sm:$0xf] %vm1059_vm8, %v1002_v43 }
  0xfc   : > { %v1000_v23 = vpop.permute.xlu0 %999  ;;  %1553 = vrot.lane.b32.xlu1 %v4735_v53, %s4456_s26 }
  0xfd   : > { %1078 = vst.msk [vmem:[#allocation2 + $0x48] sm:$0xf] %vm1059_vm8, %v1000_v23 }
  0xfe   : > { %1551 = vrot.lane.b32.xlu0 %v6580_v52, %s4456_s26  ;;  %v1006_v22 = vpop.permute.xlu1 %1005 }
  0xff   : > { %1081 = vst.msk [vmem:[#allocation2 + $0x54] sm:$0xf] %vm1059_vm8, %v1006_v22 }
 0x100   : > { %v1004_v33 = vpop.permute.xlu0 %1003  ;;  %1702 = vrot.lane.b32.xlu1 %v6590_v34, %s4457_s27  ;;  %v6592_v34 = vld [vmem:[#allocation35_spill] sm:$0xff] }
 0x101   : > { %1080 = vst.msk [vmem:[#allocation2 + $0x50] sm:$0xf] %vm1059_vm8, %v1004_v33 }
 0x102   : > { %1700 = vrot.lane.b32.xlu0 %v6591_v46, %s4457_s27  ;;  %v1010_v21 = vpop.permute.xlu1 %1009  ;;  %v6593_v46 = vld [vmem:[#allocation36_spill] sm:$0xff] }
 0x103   : > { %1083 = vst.msk [vmem:[#allocation2 + $0x5c] sm:$0xf] %vm1059_vm8, %v1010_v21 }
 0x104   : > { %v1008_v45 = vpop.permute.xlu0 %1007  ;;  %1257 = vrot.lane.b32.xlu1 %v6588_v29, %s4454_s24 }
 0x105   : > { %1082 = vst.msk [vmem:[#allocation2 + $0x58] sm:$0xf] %vm1059_vm8, %v1008_v45 }
 0x106   : > { %1255 = vrot.lane.b32.xlu0 %v6589_v62, %s4454_s24  ;;  %v1014_v47 = vpop.permute.xlu1 %1013 }
 0x107   : > { %1085 = vst.msk [vmem:[#allocation2 + $0x64] sm:$0xf] %vm1059_vm8, %v1014_v47 }
 0x108   : > { %v1012_v61 = vpop.permute.xlu0 %1011  ;;  %1706 = vrot.lane.b32.xlu1 %v6592_v34, %s4457_s27 }
 0x109   : > { %1084 = vst.msk [vmem:[#allocation2 + $0x60] sm:$0xf] %vm1059_vm8, %v1012_v61  ;;  %v6596_v61 = vld [vmem:[#allocation17_spill] sm:$0xff] }
 0x10a   : > { %1704 = vrot.lane.b32.xlu0 %v6593_v46, %s4457_s27  ;;  %v1018_v44 = vpop.permute.xlu1 %1017 }
 0x10b   : > { %1087 = vst.msk [vmem:[#allocation2 + $0x6c] sm:$0xf] %vm1059_vm8, %v1018_v44  ;;  %v6597_v44 = vld [vmem:[#allocation20_spill] sm:$0xff] }
 0x10c   : > { %v1016_v42 = vpop.permute.xlu0 %1015  ;;  %1839 = vrot.lane.b32.xlu1 %v5144_v14, %s4458_s6 }
 0x10d   : > { %1086 = vst.msk [vmem:[#allocation2 + $0x68] sm:$0xf] %vm1059_vm8, %v1016_v42 }
 0x10e   : > { %1837 = vrot.lane.b32.xlu0 %v5150_v28, %s4458_s6  ;;  %v1022_v29 = vpop.permute.xlu1 %1021 }
 0x10f   : > { %1089 = vst.msk [vmem:[#allocation2 + $0x74] sm:$0xf] %vm1059_vm8, %v1022_v29 }
 0x110   : > { %v1020_v62 = vpop.permute.xlu0 %1019  ;;  %1261 = vrot.lane.b32.xlu1 %v6594_v58, %s4454_s24 }
 0x111   : > { %1088 = vst.msk [vmem:[#allocation2 + $0x70] sm:$0xf] %vm1059_vm8, %v1020_v62  ;;  %v6598_v62 = vld [vmem:[#allocation37_spill] sm:$0xff] }
 0x112   : > { %1259 = vrot.lane.b32.xlu0 %v6595_v24, %s4454_s24  ;;  %v1026_v41 = vpop.permute.xlu1 %1025 }
 0x113   : > { %1091 = vst.msk [vmem:[#allocation2 + $0x7c] sm:$0xf] %vm1059_vm8, %v1026_v41 }
 0x114   : > { %v1024_v18 = vpop.permute.xlu0 %1023  ;;  %1394 = vrot.lane.b32.xlu1 %v5039_v55, %s4455_s25 }
 0x115   : > { %1090 = vst.msk [vmem:[#allocation2 + $0x78] sm:$0xf] %vm1059_vm8, %v1024_v18  ;;  %vm3725_vm8 = vcmask 64512  }
 0x116   : > { %1392 = vrot.lane.b32.xlu0 %v5045_v17, %s4455_s25  ;;  %v1097_v14 = vpop.permute.xlu1 %1096 }
 0x117   : > { %1192 = vst.msk [vmem:[#allocation2 + $0x4] sm:$0xf] %vm1190_vm10, %v1097_v14 }
 0x118   : > { %v1095_v28 = vpop.permute.xlu0 %1094  ;;  %1843 = vrot.lane.b32.xlu1 %v5159_v31, %s4458_s6 }
 0x119   : > { %1191 = vst.msk [vmem:[#allocation2] sm:$0xf] %vm1190_vm10, %v1095_v28 }
 0x11a   : > { %1841 = vrot.lane.b32.xlu0 %v5165_v6, %s4458_s6  ;;  %v1101_v10 = vpop.permute.xlu1 %1100 }
 0x11b   : > { %1194 = vst.msk [vmem:[#allocation2 + $0xc] sm:$0xf] %vm1190_vm10, %v1101_v10 }
 0x11c   : > { %v1099_v55 = vpop.permute.xlu0 %1098  ;;  %1398 = vrot.lane.b32.xlu1 %v5054_v13, %s4455_s25 }
 0x11d   : > { %1193 = vst.msk [vmem:[#allocation2 + $0x8] sm:$0xf] %vm1190_vm10, %v1099_v55 }
 0x11e   : > { %1396 = vrot.lane.b32.xlu0 %v5060_v20, %s4455_s25  ;;  %v1105_v17 = vpop.permute.xlu1 %1104 }
 0x11f   : > { %1196 = vst.msk [vmem:[#allocation2 + $0x14] sm:$0xf] %vm1190_vm10, %v1105_v17 }
 0x120   : > { %v1103_v43 = vpop.permute.xlu0 %1102  ;;  %1525 = vrot.lane.b32.xlu1 %v4580_v49, %s4456_s26 }
 0x121   : > { %1195 = vst.msk [vmem:[#allocation2 + $0x10] sm:$0xf] %vm1190_vm10, %v1103_v43 }
 0x122   : > { %1523 = vrot.lane.b32.xlu0 %v4593_v54, %s4456_s26  ;;  %v1109_v23 = vpop.permute.xlu1 %1108 }
 0x123   : > { %1198 = vst.msk [vmem:[#allocation2 + $0x1c] sm:$0xf] %vm1190_vm10, %v1109_v23 }
 0x124   : > { %v1107_v22 = vpop.permute.xlu0 %1106  ;;  %1136 = vrot.lane.b32.xlu1 %v4735_v53, %s4453_s23 }
 0x125   : > { %1197 = vst.msk [vmem:[#allocation2 + $0x18] sm:$0xf] %vm1190_vm10, %v1107_v22 }
 0x126   : > { %1134 = vrot.lane.b32.xlu0 %v6580_v52, %s4453_s23  ;;  %v1113_v33 = vpop.permute.xlu1 %1112 }
 0x127   : > { %1200 = vst.msk [vmem:[#allocation2 + $0x24] sm:$0xf] %vm1190_vm10, %v1113_v33 }
 0x128   : > { %v1111_v21 = vpop.permute.xlu0 %1110  ;;  %1529 = vrot.lane.b32.xlu1 %v4602_v59, %s4456_s26 }
 0x129   : > { %1199 = vst.msk [vmem:[#allocation2 + $0x20] sm:$0xf] %vm1190_vm10, %v1111_v21 }
 0x12a   : > { %1527 = vrot.lane.b32.xlu0 %v4617_v9, %s4456_s26  ;;  %v1250_v49 = vpop.permute.xlu1 %1249 }
 0x12b   : > { %1345 = vst.msk [vmem:[#allocation2 + $0x4] sm:$0xf] %vm1343_vm11, %v1250_v49 }
 0x12c   : > { %v1248_v54 = vpop.permute.xlu0 %1247  ;;  %1678 = vrot.lane.b32.xlu1 %v6594_v58, %s4457_s27  ;;  %v6599_v58 = vld [vmem:[#allocation38_spill] sm:$0xff] }
 0x12d   : > { %1344 = vst.msk [vmem:[#allocation2] sm:$0xf] %vm1343_vm11, %v1248_v54 }
 0x12e   : > { %1676 = vrot.lane.b32.xlu0 %v6595_v24, %s4457_s27  ;;  %v1254_v53 = vpop.permute.xlu1 %1253 }
 0x12f   : > { %1347 = vst.msk [vmem:[#allocation2 + $0xc] sm:$0xf] %vm1343_vm11, %v1254_v53 }
 0x130   : > { %v1252_v59 = vpop.permute.xlu0 %1251  ;;  %1140 = vrot.lane.b32.xlu1 %v6579_v32, %s4453_s23 }
 0x131   : > { %1346 = vst.msk [vmem:[#allocation2 + $0x8] sm:$0xf] %vm1343_vm11, %v1252_v59 }
 0x132   : > { %1138 = vrot.lane.b32.xlu0 %v4767_v37, %s4453_s23  ;;  %v1387_v9 = vpop.permute.xlu1 %1386 }
 0x133   : > { %1482 = vst.msk [vmem:[#allocation2 + $0x4] sm:$0xf] %vm1480_vm12, %v1387_v9 }
 0x134   : > { %v1385_v52 = vpop.permute.xlu0 %1384  ;;  %1289 = vrot.lane.b32.xlu1 %v6592_v34, %s4454_s24 }
 0x135   : > { %1481 = vst.msk [vmem:[#allocation2] sm:$0xf] %vm1480_vm12, %v1385_v52  ;;  %v6600_v52 = vld [vmem:[#allocation21_spill] sm:$0xff] }
 0x136   : > { %1287 = vrot.lane.b32.xlu0 %v6593_v46, %s4454_s24  ;;  %v1391_v45 = vpop.permute.xlu1 %1390 }
 0x137   : > { %1484 = vst.msk [vmem:[#allocation2 + $0xc] sm:$0xf] %vm1480_vm12, %v1391_v45  ;;  %v6601_v45 = vld [vmem:[#allocation22_spill] sm:$0xff] }
 0x138   : > { %v1389_v47 = vpop.permute.xlu0 %1388  ;;  %1682 = vrot.lane.b32.xlu1 %v6596_v61, %s4457_s27 }
 0x139   : > { %1483 = vst.msk [vmem:[#allocation2 + $0x8] sm:$0xf] %vm1480_vm12, %v1389_v47 }
 0x13a   : > { %1680 = vrot.lane.b32.xlu0 %v6597_v44, %s4457_s27  ;;  %v1518_v42 = vpop.permute.xlu1 %1517 }
 0x13b   : > { %1613 = vst.msk [vmem:[#allocation2 + $0x4] sm:$0xf] %vm1611_vm13, %v1518_v42 }
 0x13c   : > { %v1516_v34 = vpop.permute.xlu0 %1515  ;;  %1815 = vrot.lane.b32.xlu1 %v5054_v13, %s4458_s6 }
 0x13d   : > { %1612 = vst.msk [vmem:[#allocation2] sm:$0xf] %vm1611_vm13, %v1516_v34 }
 0x13e   : > { %1813 = vrot.lane.b32.xlu0 %v5060_v20, %s4458_s6  ;;  %v1129_v46 = vpop.permute.xlu1 %1128 }
 0x13f   : > { %1208 = vst.msk [vmem:[#allocation2 + $0x44] sm:$0xf] %vm1190_vm10, %v1129_v46 }
 0x140   : > { %v1127_v29 = vpop.permute.xlu0 %1126  ;;  %1293 = vrot.lane.b32.xlu1 %v6598_v62, %s4454_s24 }
 0x141   : > { %1207 = vst.msk [vmem:[#allocation2 + $0x40] sm:$0xf] %vm1190_vm10, %v1127_v29 }
 0x142   : > { %1291 = vrot.lane.b32.xlu0 %v6599_v58, %s4454_s24  ;;  %v1522_v24 = vpop.permute.xlu1 %1521 }
 0x143   : > { %1615 = vst.msk [vmem:[#allocation2 + $0xc] sm:$0xf] %vm1611_vm13, %v1522_v24 }
 0x144   : > { %v1520_v41 = vpop.permute.xlu0 %1519  ;;  %1426 = vrot.lane.b32.xlu1 %v5159_v31, %s4455_s25 }
 0x145   : > { %1614 = vst.msk [vmem:[#allocation2 + $0x8] sm:$0xf] %vm1611_vm13, %v1520_v41  ;;  %v6603_v41 = vld [vmem:[#allocation24_spill] sm:$0xff] }
 0x146   : > { %1424 = vrot.lane.b32.xlu0 %v5165_v6, %s4455_s25  ;;  %v1671_v13 = vpop.permute.xlu1 %1670 }
 0x147   : > { %1766 = vst.msk [vmem:[#allocation2 + $0x4] sm:$0xf] %vm1764_vm14, %v1671_v13 }
 0x148   : > { %v1669_v20 = vpop.permute.xlu0 %1668  ;;  %1819 = vrot.lane.b32.xlu1 %v5069_v51, %s4458_s6 }
 0x149   : > { %1765 = vst.msk [vmem:[#allocation2] sm:$0xf] %vm1764_vm14, %v1669_v20 }
 0x14a   : > { %1817 = vrot.lane.b32.xlu0 %v5075_v26, %s4458_s6  ;;  %v1133_v18 = vpop.permute.xlu1 %1132 }
 0x14b   : > { %1210 = vst.msk [vmem:[#allocation2 + $0x4c] sm:$0xf] %vm1190_vm10, %v1133_v18 }
 0x14c   : > { %v1131_v31 = vpop.permute.xlu0 %1130  ;;  %1430 = vrot.lane.b32.xlu1 %v5174_v38, %s4455_s25 }
 0x14d   : > { %1209 = vst.msk [vmem:[#allocation2 + $0x48] sm:$0xf] %vm1190_vm10, %v1131_v31 }
 0x14e   : > { %1428 = vrot.lane.b32.xlu0 %v5180_v50, %s4455_s25  ;;  %v1282_v6 = vpop.permute.xlu1 %1281 }
 0x14f   : > { %1361 = vst.msk [vmem:[#allocation2 + $0x44] sm:$0xf] %vm1343_vm11, %v1282_v6 }
 0x150   : > { %v1280_v14 = vpop.permute.xlu0 %1279  ;;  %1557 = vrot.lane.b32.xlu1 %v6579_v32, %s4456_s26 }
 0x151   : > { %1360 = vst.msk [vmem:[#allocation2 + $0x40] sm:$0xf] %vm1343_vm11, %v1280_v14  ;;  %v6604_v14 = vld [vmem:[#allocation25_spill] sm:$0xff] }
 0x152   : > { %1555 = vrot.lane.b32.xlu0 %v4767_v37, %s4456_s26  ;;  %v1675_v28 = vpop.permute.xlu1 %1674 }
 0x153   : > { %1768 = vst.msk [vmem:[#allocation2 + $0xc] sm:$0xf] %vm1764_vm14, %v1675_v28  ;;  %v6605_v28 = vld [vmem:[#allocation27_spill] sm:$0xff] }
 0x154   : > { %v1673_v10 = vpop.permute.xlu0 %1672  ;;  %1561 = vrot.lane.b32.xlu1 %v4775_v48, %s4456_s26 }
 0x155   : > { %1767 = vst.msk [vmem:[#allocation2 + $0x8] sm:$0xf] %vm1764_vm14, %v1673_v10 }
 0x156   : > { %1559 = vrot.lane.b32.xlu0 %v4791_v8, %s4456_s26  ;;  %v1808_v55 = vpop.permute.xlu1 %1807 }
 0x157   : > { %1903 = vst.msk [vmem:[#allocation2 + $0x4] sm:$0xf] %vm1901_vm15, %v1808_v55 }
 0x158   : > { %v1806_v32 = vpop.permute.xlu0 %1805  ;;  %1710 = vrot.lane.b32.xlu1 %v6598_v62, %s4457_s27 }
 0x159   : > { %1902 = vst.msk [vmem:[#allocation2] sm:$0xf] %vm1901_vm15, %v1806_v32  ;;  %v6606_v32 = vld [vmem:[#allocation39_spill] sm:$0xff] }
 0x15a   : > { %1708 = vrot.lane.b32.xlu0 %v6599_v58, %s4457_s27  ;;  %v1286_v37 = vpop.permute.xlu1 %1285 }
 0x15b   : > { %1363 = vst.msk [vmem:[#allocation2 + $0x4c] sm:$0xf] %vm1343_vm11, %v1286_v37  ;;  %v6607_v37 = vld [vmem:[#allocation40_spill] sm:$0xff] }
 0x15c   : > { %v1284_v17 = vpop.permute.xlu0 %1283  ;;  %1116 = vrot.lane.b32.xlu1 %v4626_v15, %s4453_s23 }
 0x15d   : > { %1362 = vst.msk [vmem:[#allocation2 + $0x48] sm:$0xf] %vm1343_vm11, %v1284_v17 }
 0x15e   : > { %1114 = vrot.lane.b32.xlu0 %v4638_v27, %s4453_s23  ;;  %v1419_v43 = vpop.permute.xlu1 %1418 }
 0x15f   : > { %1498 = vst.msk [vmem:[#allocation2 + $0x44] sm:$0xf] %vm1480_vm12, %v1419_v43 }
 0x160   : > { %v1417_v23 = vpop.permute.xlu0 %1416  ;;  %v4423_v22 = vld [vmem:[#allocation2] sm:$0xff]   ;;  %1265 = vrot.lane.b32.xlu1 %v6596_v61, %s4454_s24 }
 0x161   : > { %1497 = vst.msk [vmem:[#allocation2 + $0x40] sm:$0xf] %vm1480_vm12, %v1417_v23  ;;  %4361 = vmatprep.mubr.msk.bf16.mxu0 %vm2066_vm0, %v4423_v22  ;;  %v6608_v23 = vld [vmem:[#allocation43_spill] sm:$0xff]  ;;  %v6609_v22 = vld [vmem:[#allocation44_spill] sm:$0xff] }
 0x162   : > { %1263 = vrot.lane.b32.xlu0 %v6597_v44, %s4454_s24  ;;  %v1812_v33 = vpop.permute.xlu1 %1811 }
 0x163   : > { %1905 = vst.msk [vmem:[#allocation2 + $0xc] sm:$0xf] %vm1901_vm15, %v1812_v33 }
 0x164   : > { %v1810_v21 = vpop.permute.xlu0 %1809  ;;  %1714 = vrot.lane.b32.xlu1 %v4950_v30, %s4457_s27 }
 0x165   : > { %1904 = vst.msk [vmem:[#allocation2 + $0x8] sm:$0xf] %vm1901_vm15, %v1810_v21 }
 0x166   : > { %1712 = vrot.lane.b32.xlu0 %v4957_v60, %s4457_s27  ;;  %v1423_v49 = vpop.permute.xlu1 %1422 }
 0x167   : > { %1500 = vst.msk [vmem:[#allocation2 + $0x4c] sm:$0xf] %vm1480_vm12, %v1423_v49 }
 0x168   : > { %v1421_v54 = vpop.permute.xlu0 %1420  ;;  %1847 = vrot.lane.b32.xlu1 %v5174_v38, %s4458_s6 }
 0x169   : > { %1499 = vst.msk [vmem:[#allocation2 + $0x48] sm:$0xf] %vm1480_vm12, %v1421_v54 }
 0x16a   : > { %1845 = vrot.lane.b32.xlu0 %v5180_v50, %s4458_s6  ;;  %v1550_v53 = vpop.permute.xlu1 %1549 }
 0x16b   : > { %1629 = vst.msk [vmem:[#allocation2 + $0x44] sm:$0xf] %vm1611_vm13, %v1550_v53 }
 0x16c   : > { %v1548_v59 = vpop.permute.xlu0 %1547  ;;  %v4426_v9 = vld [vmem:[#allocation2 + $0x8] sm:$0xff]   ;;  %1269 = vrot.lane.b32.xlu1 %v6600_v52, %s4454_s24 }
 0x16d   : > { %1628 = vst.msk [vmem:[#allocation2 + $0x40] sm:$0xf] %vm1611_vm13, %v1548_v59  ;;  %4362 = vmatmul.mubr.msk.bf16.vlgmr.msra.gmra.mxu0 %vm2066_vm0, %v4426_v9 }
 0x16e   : > { %1267 = vrot.lane.b32.xlu0 %v6601_v45, %s4454_s24  ;;  %v1554_v47 = vpop.permute.xlu1 %1553 }
 0x16f   : > { %1631 = vst.msk [vmem:[#allocation2 + $0x4c] sm:$0xf] %vm1611_vm13, %v1554_v47  ;;  %v6610_v47 = vld [vmem:[#allocation9_spill] sm:$0xff] }
 0x170   : > { %v1552_v38 = vpop.permute.xlu0 %1551  ;;  %1402 = vrot.lane.b32.xlu1 %v5069_v51, %s4455_s25 }
 0x171   : > { %1630 = vst.msk [vmem:[#allocation2 + $0x48] sm:$0xf] %vm1611_vm13, %v1552_v38  ;;  %v6611_v38 = vld [vmem:[#allocation11_spill] sm:$0xff] }
 0x172   : > { %1400 = vrot.lane.b32.xlu0 %v5075_v26, %s4455_s25  ;;  %v1703_v50 = vpop.permute.xlu1 %1702 }
 0x173   : > { %1782 = vst.msk [vmem:[#allocation2 + $0x44] sm:$0xf] %vm1764_vm14, %v1703_v50 }
 0x174   : > { %v1701_v61 = vpop.permute.xlu0 %1700  ;;  %1851 = vrot.lane.b32.xlu1 %v5189_v35, %s4458_s6 }
 0x175   : > { %1781 = vst.msk [vmem:[#allocation2 + $0x40] sm:$0xf] %vm1764_vm14, %v1701_v61 }
 0x176   : > { %1849 = vrot.lane.b32.xlu0 %v5195_v57, %s4458_s6  ;;  %v1258_v44 = vpop.permute.xlu1 %1257 }
 0x177   : > { %1349 = vst.msk [vmem:[#allocation2 + $0x14] sm:$0xf] %vm1343_vm11, %v1258_v44 }
 0x178   : > { %v1256_v42 = vpop.permute.xlu0 %1255  ;;  %1406 = vrot.lane.b32.xlu1 %v5084_v56, %s4455_s25 }
 0x179   : > { %1348 = vst.msk [vmem:[#allocation2 + $0x10] sm:$0xf] %vm1343_vm11, %v1256_v42 }
 0x17a   : > { %1404 = vrot.lane.b32.xlu0 %v5090_v2, %s4455_s25  ;;  %v1707_v51 = vpop.permute.xlu1 %1706 }
 0x17b   : > { %1784 = vst.msk [vmem:[#allocation2 + $0x4c] sm:$0xf] %vm1764_vm14, %v1707_v51 }
 0x17c   : > { %v1705_v26 = vpop.permute.xlu0 %1704  ;;  %1533 = vrot.lane.b32.xlu1 %v4626_v15, %s4456_s26  ;;  %v6602_v15 = vld [vmem:[#allocation8_spill] sm:$0xff] }
 0x17d   : > { %1783 = vst.msk [vmem:[#allocation2 + $0x48] sm:$0xf] %vm1764_vm14, %v1705_v26  ;;  %v6612_v26 = vld [vmem:[#allocation41_spill] sm:$0xff] }
 0x17e   : > { %1531 = vrot.lane.b32.xlu0 %v4638_v27, %s4456_s26  ;;  %v1840_v34 = vpop.permute.xlu1 %1839 }
 0x17f   : > { %1919 = vst.msk [vmem:[#allocation2 + $0x44] sm:$0xf] %vm1901_vm15, %v1840_v34  ;;  %v6613_v34 = vld [vmem:[#allocation42_spill] sm:$0xff] }
 0x180   : > { %v1838_v46 = vpop.permute.xlu0 %1837  ;;  %1144 = vrot.lane.b32.xlu1 %v4775_v48, %s4453_s23 }
 0x181   : > { %1918 = vst.msk [vmem:[#allocation2 + $0x40] sm:$0xf] %vm1901_vm15, %v1838_v46 }
 0x182   : > { %1142 = vrot.lane.b32.xlu0 %v4791_v8, %s4453_s23  ;;  %v1262_v29 = vpop.permute.xlu1 %1261 }
 0x183   : > { %1351 = vst.msk [vmem:[#allocation2 + $0x1c] sm:$0xf] %vm1343_vm11, %v1262_v29 }
 0x184   : > { %v1260_v62 = vpop.permute.xlu0 %1259  ;;  %1537 = vrot.lane.b32.xlu1 %v4649_v36, %s4456_s26 }
 0x185   : > { %1350 = vst.msk [vmem:[#allocation2 + $0x18] sm:$0xf] %vm1343_vm11, %v1260_v62 }
 0x186   : > { %1535 = vrot.lane.b32.xlu0 %v6602_v15, %s4456_s26  ;;  %v1395_v27 = vpop.permute.xlu1 %1394 }
 0x187   : > { %1486 = vst.msk [vmem:[#allocation2 + $0x14] sm:$0xf] %vm1480_vm12, %v1395_v27  ;;  %v6614_v27 = vld [vmem:[#allocation28_spill] sm:$0xff] }
 0x188   : > { %v1393_v58 = vpop.permute.xlu0 %1392  ;;  %v4427_v48 = vld [vmem:[#allocation2 + $0x40] sm:$0xff]   ;;  %1686 = vrot.lane.b32.xlu1 %v6600_v52, %s4457_s27 }
 0x189   : > { %1485 = vst.msk [vmem:[#allocation2 + $0x10] sm:$0xf] %vm1480_vm12, %v1393_v58  ;;  %4377 = vmatprep.mubr.msk.bf16.mxu1 %vm2066_vm0, %v4427_v48  ;;  %v6615_v58 = vld [vmem:[#allocation29_spill] sm:$0xff] }
 0x18a   : > { %1684 = vrot.lane.b32.xlu0 %v6601_v45, %s4457_s27  ;;  %v1844_v8 = vpop.permute.xlu1 %1843 }
 0x18b   : > { %1921 = vst.msk [vmem:[#allocation2 + $0x4c] sm:$0xf] %vm1901_vm15, %v1844_v8 }
 0x18c   : > { %v1842_v24 = vpop.permute.xlu0 %1841  ;;  %1148 = vrot.lane.b32.xlu1 %v6603_v41, %s4453_s23 }
 0x18d   : > { %1920 = vst.msk [vmem:[#allocation2 + $0x48] sm:$0xf] %vm1901_vm15, %v1842_v24 }
 0x18e   : > { %1146 = vrot.lane.b32.xlu0 %v6581_v25, %s4453_s23  ;;  %v1399_v13 = vpop.permute.xlu1 %1398 }
 0x18f   : > { %1488 = vst.msk [vmem:[#allocation2 + $0x1c] sm:$0xf] %vm1480_vm12, %v1399_v13  ;;  %v6616_v13 = vld [vmem:[#allocation45_spill] sm:$0xff] }
 0x190   : > { %v1397_v20 = vpop.permute.xlu0 %1396  ;;  %1297 = vrot.lane.b32.xlu1 %v4950_v30, %s4454_s24 }
 0x191   : > { %1487 = vst.msk [vmem:[#allocation2 + $0x18] sm:$0xf] %vm1480_vm12, %v1397_v20  ;;  %v6617_v20 = vld [vmem:[#allocation23_spill] sm:$0xff] }
 0x192   : > { %1295 = vrot.lane.b32.xlu0 %v4957_v60, %s4454_s24  ;;  %v1526_v18 = vpop.permute.xlu1 %1525 }
 0x193   : > { %1617 = vst.msk [vmem:[#allocation2 + $0x14] sm:$0xf] %vm1611_vm13, %v1526_v18 }
 0x194   : > { %v1524_v31 = vpop.permute.xlu0 %1523  ;;  %v4428_v6 = vld [vmem:[#allocation2 + $0x48] sm:$0xff]   ;;  %1690 = vrot.lane.b32.xlu1 %v6604_v14, %s4457_s27 }
 0x195   : > { %1616 = vst.msk [vmem:[#allocation2 + $0x10] sm:$0xf] %vm1611_vm13, %v1524_v31  ;;  %4378 = vmatmul.mubr.msk.bf16.vlgmr.msra.gmra.mxu1 %vm2066_vm0, %v4428_v6 }
 0x196   : > { %1688 = vrot.lane.b32.xlu0 %v6605_v28, %s4457_s27  ;;  %v1137_v10 = vpop.permute.xlu1 %1136 }
 0x197   : > { %1212 = vst.msk [vmem:[#allocation2 + $0x54] sm:$0xf] %vm1190_vm10, %v1137_v10 }
 0x198   : > { %v1135_v30 = vpop.permute.xlu0 %1134  ;;  %1823 = vrot.lane.b32.xlu1 %v5084_v56, %s4458_s6 }
 0x199   : > { %1211 = vst.msk [vmem:[#allocation2 + $0x50] sm:$0xf] %vm1190_vm10, %v1135_v30 }
 0x19a   : > { %1821 = vrot.lane.b32.xlu0 %v5090_v2, %s4458_s6  ;;  %v1530_v60 = vpop.permute.xlu1 %1529 }
 0x19b   : > { %1619 = vst.msk [vmem:[#allocation2 + $0x1c] sm:$0xf] %vm1611_vm13, %v1530_v60  ;;  %v5741_v60 = vld [vmem:[%s4502_s20 + $0xc4] sm:$0xf] }
 0x19c   : > { %v1528_v55 = vpop.permute.xlu0 %1527  ;;  %1301 = vrot.lane.b32.xlu1 %v6606_v32, %s4454_s24 }
 0x19d   : > { %1618 = vst.msk [vmem:[#allocation2 + $0x18] sm:$0xf] %vm1611_vm13, %v1528_v55  ;;  %v1237_v55 = vshrl.u32 %v5741_v60, 16 }
 0x19e   : > { %1299 = vrot.lane.b32.xlu0 %v6607_v37, %s4454_s24  ;;  %v1679_v17 = vpop.permute.xlu1 %1678 }
 0x19f   : > { %1770 = vst.msk [vmem:[#allocation2 + $0x14] sm:$0xf] %vm1764_vm14, %v1679_v17 }
 0x1a0   : > { %v1677_v43 = vpop.permute.xlu0 %1676  ;;  %1434 = vrot.lane.b32.xlu1 %v5189_v35, %s4455_s25 }
 0x1a1   : > { %1769 = vst.msk [vmem:[#allocation2 + $0x10] sm:$0xf] %vm1764_vm14, %v1677_v43 }
 0x1a2   : > { %1432 = vrot.lane.b32.xlu0 %v5195_v57, %s4455_s25  ;;  %v1141_v56 = vpop.permute.xlu1 %1140 }
 0x1a3   : > { %1214 = vst.msk [vmem:[#allocation2 + $0x5c] sm:$0xf] %vm1190_vm10, %v1141_v56 }
 0x1a4   : > { %v1139_v2 = vpop.permute.xlu0 %1138  ;;  %1827 = vrot.lane.b32.xlu1 %v6608_v23, %s4458_s6 }
 0x1a5   : > { %1213 = vst.msk [vmem:[#allocation2 + $0x58] sm:$0xf] %vm1190_vm10, %v1139_v2  ;;  %v1239_v2 = vrot.slane %v1237_v55, 4 }
 0x1a6   : > { %1825 = vrot.lane.b32.xlu0 %v6609_v22, %s4458_s6  ;;  %v1290_v33 = vpop.permute.xlu1 %1289 }
 0x1a7   : > { %1365 = vst.msk [vmem:[#allocation2 + $0x54] sm:$0xf] %vm1343_vm11, %v1290_v33 }
 0x1a8   : > { %v1288_v21 = vpop.permute.xlu0 %1287  ;;  %1438 = vrot.lane.b32.xlu1 %v5206_v16, %s4455_s25 }
 0x1a9   : > { %1364 = vst.msk [vmem:[#allocation2 + $0x50] sm:$0xf] %vm1343_vm11, %v1288_v21 }
 0x1aa   : > { %1436 = vrot.lane.b32.xlu0 %v5211_v19, %s4455_s25  ;;  %v1683_v35 = vpop.permute.xlu1 %1682 }
 0x1ab   : > { %1772 = vst.msk [vmem:[#allocation2 + $0x1c] sm:$0xf] %vm1764_vm14, %v1683_v35 }
 0x1ac   : > { %v1681_v57 = vpop.permute.xlu0 %1680  ;;  %1565 = vrot.lane.b32.xlu1 %v6603_v41, %s4456_s26 }
 0x1ad   : > { %1771 = vst.msk [vmem:[#allocation2 + $0x18] sm:$0xf] %vm1764_vm14, %v1681_v57 }
 0x1ae   : > { %1563 = vrot.lane.b32.xlu0 %v6581_v25, %s4456_s26  ;;  %v1816_v49 = vpop.permute.xlu1 %1815 }
 0x1af   : > { %1907 = vst.msk [vmem:[#allocation2 + $0x14] sm:$0xf] %vm1901_vm15, %v1816_v49 }
 0x1b0   : > { %v1814_v54 = vpop.permute.xlu0 %1813  ;;  %1120 = vrot.lane.b32.xlu1 %v4649_v36, %s4453_s23 }
 0x1b1   : > { %1906 = vst.msk [vmem:[#allocation2 + $0x10] sm:$0xf] %vm1901_vm15, %v1814_v54 }
 0x1b2   : > { %1118 = vrot.lane.b32.xlu0 %v6602_v15, %s4453_s23  ;;  %v1294_v53 = vpop.permute.xlu1 %1293 }
 0x1b3   : > { %1367 = vst.msk [vmem:[#allocation2 + $0x5c] sm:$0xf] %vm1343_vm11, %v1294_v53 }
 0x1b4   : > { %v1292_v59 = vpop.permute.xlu0 %1291  ;;  %1569 = vrot.lane.b32.xlu1 %v4822_v12, %s4456_s26 }
 0x1b5   : > { %1366 = vst.msk [vmem:[#allocation2 + $0x58] sm:$0xf] %vm1343_vm11, %v1292_v59 }
 0x1b6   : > { %1567 = vrot.lane.b32.xlu0 %v4839_v11, %s4456_s26  ;;  %v1427_v25 = vpop.permute.xlu1 %1426 }
 0x1b7   : > { %1502 = vst.msk [vmem:[#allocation2 + $0x54] sm:$0xf] %vm1480_vm12, %v1427_v25 }
 0x1b8   : > { %v1425_v9 = vpop.permute.xlu0 %1424  ;;  %v4429_v36 = vld [vmem:[#allocation2 + $0x10] sm:$0xff]   ;;  %1718 = vrot.lane.b32.xlu1 %v6606_v32, %s4457_s27 }
 0x1b9   : > { %1501 = vst.msk [vmem:[#allocation2 + $0x50] sm:$0xf] %vm1480_vm12, %v1425_v9  ;;  %4365 = vmatprep.mubr.msk.bf16.mxu0 %vm2066_vm0, %v4429_v36 }
 0x1ba   : > { %1716 = vrot.lane.b32.xlu0 %v6607_v37, %s4457_s27  ;;  %v1820_v52 = vpop.permute.xlu1 %1819 }
 0x1bb   : > { %1909 = vst.msk [vmem:[#allocation2 + $0x1c] sm:$0xf] %vm1901_vm15, %v1820_v52 }
 0x1bc   : > { %v1818_v45 = vpop.permute.xlu0 %1817  ;;  %1124 = vrot.lane.b32.xlu1 %v6610_v47, %s4453_s23 }
 0x1bd   : > { %1908 = vst.msk [vmem:[#allocation2 + $0x18] sm:$0xf] %vm1901_vm15, %v1818_v45 }
 0x1be   : > { %1122 = vrot.lane.b32.xlu0 %v6611_v38, %s4453_s23  ;;  %v1431_v50 = vpop.permute.xlu1 %1430 }
 0x1bf   : > { %1504 = vst.msk [vmem:[#allocation2 + $0x5c] sm:$0xf] %vm1480_vm12, %v1431_v50 }
 0x1c0   : > { %v1429_v61 = vpop.permute.xlu0 %1428  ;;  %1273 = vrot.lane.b32.xlu1 %v6604_v14, %s4454_s24 }
 0x1c1   : > { %1503 = vst.msk [vmem:[#allocation2 + $0x58] sm:$0xf] %vm1480_vm12, %v1429_v61 }
 0x1c2   : > { %1271 = vrot.lane.b32.xlu0 %v6605_v28, %s4454_s24  ;;  %v1558_v44 = vpop.permute.xlu1 %1557 }
 0x1c3   : > { %1633 = vst.msk [vmem:[#allocation2 + $0x54] sm:$0xf] %vm1611_vm13, %v1558_v44  ;;  %v1379_v44 = vrot.slane %v5741_v60, 5 }
 0x1c4   : > { %v1556_v42 = vpop.permute.xlu0 %1555  ;;  %v4430_v51 = vld [vmem:[#allocation2 + $0x18] sm:$0xff]   ;;  %1722 = vrot.lane.b32.xlu1 %v6612_v26, %s4457_s27 }
 0x1c5   : > { %1632 = vst.msk [vmem:[#allocation2 + $0x50] sm:$0xf] %vm1611_vm13, %v1556_v42  ;;  %4366 = vmatmul.mubr.msk.bf16.gmra.mxu0 %vm2066_vm0, %v4430_v51 }
 0x1c6   : > { %1720 = vrot.lane.b32.xlu0 %v6613_v34, %s4457_s27  ;;  %v1562_v46 = vpop.permute.xlu1 %1561 }
 0x1c7   : > { %1635 = vst.msk [vmem:[#allocation2 + $0x5c] sm:$0xf] %vm1611_vm13, %v1562_v46 }
 0x1c8   : > { %v1560_v29 = vpop.permute.xlu0 %1559  ;;  %1855 = vrot.lane.b32.xlu1 %v5206_v16, %s4458_s6 }
 0x1c9   : > { %1634 = vst.msk [vmem:[#allocation2 + $0x58] sm:$0xf] %vm1611_vm13, %v1560_v29 }
 0x1ca   : > { %1853 = vrot.lane.b32.xlu0 %v5211_v19, %s4458_s6  ;;  %v1711_v62 = vpop.permute.xlu1 %1710 }
 0x1cb   : > { %1786 = vst.msk [vmem:[#allocation2 + $0x54] sm:$0xf] %vm1764_vm14, %v1711_v62  ;;  %v5801_v62 = vld [vmem:[%s4502_s20 + $0xd0] sm:$0xf] }
 0x1cc   : > { %v1709_v15 = vpop.permute.xlu0 %1708  ;;  %1277 = vrot.lane.b32.xlu1 %v6614_v27, %s4454_s24 }
 0x1cd   : > { %1785 = vst.msk [vmem:[#allocation2 + $0x50] sm:$0xf] %vm1764_vm14, %v1709_v15 }
 0x1ce   : > { %1275 = vrot.lane.b32.xlu0 %v6615_v58, %s4454_s24  ;;  %v1117_v48 = vpop.permute.xlu1 %1116 }
 0x1cf   : > { %1202 = vst.msk [vmem:[#allocation2 + $0x2c] sm:$0xf] %vm1190_vm10, %v1117_v48 }
 0x1d0   : > { %v1115_v8 = vpop.permute.xlu0 %1114  ;;  %1410 = vrot.lane.b32.xlu1 %v6608_v23, %s4455_s25 }
 0x1d1   : > { %1201 = vst.msk [vmem:[#allocation2 + $0x28] sm:$0xf] %vm1190_vm10, %v1115_v8 }
 0x1d2   : > { %1408 = vrot.lane.b32.xlu0 %v6609_v22, %s4455_s25  ;;  %v1266_v16 = vpop.permute.xlu1 %1265  ;;  %v247_v22 = vld [vmem:[%s4502_s20 + $0xc8] sm:$0x1] }
 0x1d3   : > { %1353 = vst.msk [vmem:[#allocation2 + $0x24] sm:$0xf] %vm1343_vm11, %v1266_v16  ;;  %v1243_v54 = vshll.u32 %v247_v22, 16 }
 0x1d4   : > { %v1264_v19 = vpop.permute.xlu0 %1263  ;;  %1859 = vrot.lane.b32.xlu1 %v5222_v7, %s4458_s6 }
 0x1d5   : > { %1352 = vst.msk [vmem:[#allocation2 + $0x20] sm:$0xf] %vm1343_vm11, %v1264_v19  ;;  %v1245_v36 = vrot.slane %v1243_v54, 5 }
 0x1d6   : > { %1857 = vrot.lane.b32.xlu0 %v5226_v40, %s4458_s6  ;;  %v1715_v24 = vpop.permute.xlu1 %1714 }
 0x1d7   : > { %1788 = vst.msk [vmem:[#allocation2 + $0x5c] sm:$0xf] %vm1764_vm14, %v1715_v24 }
 0x1d8   : > { %v1713_v41 = vpop.permute.xlu0 %1712  ;;  %1414 = vrot.lane.b32.xlu1 %v6616_v13, %s4455_s25 }
 0x1d9   : > { %1787 = vst.msk [vmem:[#allocation2 + $0x58] sm:$0xf] %vm1764_vm14, %v1713_v41 }
 0x1da   : > { %1412 = vrot.lane.b32.xlu0 %v6617_v20, %s4455_s25  ;;  %v1848_v18 = vpop.permute.xlu1 %1847 }
 0x1db   : > { %1923 = vst.msk [vmem:[#allocation2 + $0x54] sm:$0xf] %vm1901_vm15, %v1848_v18  ;;  %v250_v18 = vld [vmem:[%s4502_s20 + $0xd4] sm:$0x1] }
 0x1dc   : > { %v1846_v31 = vpop.permute.xlu0 %1845  ;;  %1541 = vrot.lane.b32.xlu1 %v6610_v47, %s4456_s26 }
 0x1dd   : > { %1922 = vst.msk [vmem:[#allocation2 + $0x50] sm:$0xf] %vm1901_vm15, %v1846_v31 }
 0x1de   : > { %1539 = vrot.lane.b32.xlu0 %v6611_v38, %s4456_s26  ;;  %v1270_v6 = vpop.permute.xlu1 %1269 }
 0x1df   : > { %1355 = vst.msk [vmem:[#allocation2 + $0x2c] sm:$0xf] %vm1343_vm11, %v1270_v6 }
 0x1e0   : > { %v1268_v14 = vpop.permute.xlu0 %1267  ;;  %1152 = vrot.lane.b32.xlu1 %v4822_v12, %s4453_s23 }
 0x1e1   : > { %1354 = vst.msk [vmem:[#allocation2 + $0x28] sm:$0xf] %vm1343_vm11, %v1268_v14  ;;  %v1664_v14 = vshll.u32 %v250_v18, 16 }
 0x1e2   : > { %1150 = vrot.lane.b32.xlu0 %v4839_v11, %s4453_s23  ;;  %v1403_v28 = vpop.permute.xlu1 %1402 }
 0x1e3   : > { %1490 = vst.msk [vmem:[#allocation2 + $0x24] sm:$0xf] %vm1480_vm12, %v1403_v28 }
 0x1e4   : > { %v1401_v10 = vpop.permute.xlu0 %1400  ;;  %v4431_v30 = vld [vmem:[#allocation2 + $0x50] sm:$0xff]   ;;  %1545 = vrot.lane.b32.xlu1 %v4690_v4, %s4456_s26  ;;  %v5746_v4 = vld [vmem:[%s4502_s20 + $0xc0] sm:$0xf] }
 0x1e5   : > { %1489 = vst.msk [vmem:[#allocation2 + $0x20] sm:$0xf] %vm1480_vm12, %v1401_v10  ;;  %4381 = vmatprep.mubr.msk.bf16.mxu1 %vm2066_vm0, %v4431_v30  ;;  %v1224_v37 = vshrl.u32 %v5746_v4, 16  ;;  %v1227_v17 = vshll.u32 %v5746_v4, 16  ;;  %v4167_v29 = vrot.slane %v5746_v4, 9 }
 0x1e6   : > { %1543 = vrot.lane.b32.xlu0 %v6576_v5, %s4456_s26  ;;  %v1852_v12 = vpop.permute.xlu1 %1851  ;;  %v1233_v5 = vshll.u32 %v5741_v60, 16 }
 0x1e7   : > { %1925 = vst.msk [vmem:[#allocation2 + $0x5c] sm:$0xf] %vm1901_vm15, %v1852_v12  ;;  %v1226_v33 = vrot.slane %v1224_v37, 4  ;;  %v1229_v21 = vrot.slane %v1227_v17, 5  ;;  %v1380_v8 = vsel %vm4970_vm6, %v4167_v29, %v1379_v44 }
 0x1e8   : > { %v1850_v11 = vpop.permute.xlu0 %1849  ;;  %1694 = vrot.lane.b32.xlu1 %v6614_v27, %s4457_s27  ;;  %v1235_v56 = vrot.slane %v1233_v5, 5  ;;  %v5805_v27 = vld [vmem:[%s4502_s20 + $0xcc] sm:$0xf] }
 0x1e9   : > { %1924 = vst.msk [vmem:[#allocation2 + $0x58] sm:$0xf] %vm1901_vm15, %v1850_v11  ;;  %v1230_v59 = vor.u32 %v1229_v21, %v1226_v33  ;;  %v1645_v16 = vshrl.u32 %v5805_v27, 16  ;;  %v1648_v19 = vshll.u32 %v5805_v27, 16  ;;  %v1666_v11 = vrot.slane %v1664_v14, 5 }
 0x1ea   : > { %1692 = vrot.lane.b32.xlu0 %v6615_v58, %s4457_s27  ;;  %v1407_v32 = vpop.permute.xlu1 %1406  ;;  %v1240_v49 = vor.u32 %v1239_v2, %v1235_v56  ;;  %v1658_v58 = vshrl.u32 %v5801_v62, 16 }
 0x1eb   : > { %1492 = vst.msk [vmem:[#allocation2 + $0x2c] sm:$0xf] %vm1480_vm12, %v1407_v32  ;;  %v1231_v45 = vrot.slane %v1230_v59, 4  ;;  %v1800_v32 = vrot.slane %v5801_v62, 5 }
 0x1ec   : > { %v1405_v43 = vpop.permute.xlu0 %1404  ;;  %1156 = vrot.lane.b32.xlu1 %v5741_v60, %s4453_s23  ;;  %v1241_v9 = vrot.slane %v1240_v49, 4  ;;  %v1660_v24 = vrot.slane %v1658_v58, 4 }
 0x1ed   : > { %1491 = vst.msk [vmem:[#allocation2 + $0x28] sm:$0xf] %vm1480_vm12, %v1405_v43  ;;  %v5784_v50 = vsel %vm4551_vm3, %v1231_v45, %v1235_v56  ;;  %v1802_v2 = vrot.slane %v1800_v32, 4 }
 0x1ee   : > { %1154 = vrot.lane.b32.xlu0 %v5746_v4, %s4453_s23  ;;  %v1534_v23 = vpop.permute.xlu1 %1533  ;;  %s4461_s23 = smov 48  }
 0x1ef   : > { %1621 = vst.msk [vmem:[#allocation2 + $0x24] sm:$0xf] %vm1611_vm13, %v1534_v23  ;;  %v1803_v23 = vrot.slane %v250_v18, 5 }
 0x1f0   : > { %v1532_v35 = vpop.permute.xlu0 %1531  ;;  %v4432_v57 = vld [vmem:[#allocation2 + $0x58] sm:$0xff]   ;;  %1305 = vrot.lane.b32.xlu1 %v6612_v26, %s4454_s24  ;;  %v1381_v26 = vrot.slane %v1379_v44, 4 }
 0x1f1   : > { %1620 = vst.msk [vmem:[#allocation2 + $0x20] sm:$0xf] %vm1611_vm13, %v1532_v35  ;;  %4382 = vmatmul.mubr.msk.bf16.gmra.mxu1 %vm2066_vm0, %v4432_v57  ;;  %v1804_v35 = vsel %vm4970_vm6, %v1802_v2, %v1803_v23 }
 0x1f2   : > { %1303 = vrot.lane.b32.xlu0 %v6613_v34, %s4454_s24  ;;  %v1145_v53 = vpop.permute.xlu1 %1144  ;;  %v1382_v34 = vrot.slane %v247_v22, 5  ;;  %v4168_v22 = vrot.slane %v5805_v27, 9 }
 0x1f3   : > { %1216 = vst.msk [vmem:[#allocation2 + $0x64] sm:$0xf] %vm1190_vm10, %v1145_v53 }
 0x1f4   : > { %v1143_v25 = vpop.permute.xlu0 %1142  ;;  %1698 = vrot.lane.b32.xlu1 %v6586_v0, %s4457_s27  ;;  %v5780_v0 = vsel %vm4551_vm3, %v1241_v9, %v1245_v36  ;;  %v1801_v49 = vsel %vm4970_vm6, %v4168_v22, %v1800_v32 }
 0x1f5   : > { %1215 = vst.msk [vmem:[#allocation2 + $0x60] sm:$0xf] %vm1190_vm10, %v1143_v25 }
 0x1f6   : > { %1696 = vrot.lane.b32.xlu0 %v6587_v1, %s4457_s27  ;;  %v1538_v52 = vpop.permute.xlu1 %1537 }
 0x1f7   : > { %1623 = vst.msk [vmem:[#allocation2 + $0x2c] sm:$0xf] %vm1611_vm13, %v1538_v52 }
 0x1f8   : > { %v1536_v47 = vpop.permute.xlu0 %1535  ;;  %1831 = vrot.lane.b32.xlu1 %v6616_v13, %s4458_s6  ;;  %v1647_v13 = vrot.slane %v1645_v16, 4 }
 0x1f9   : > { %1622 = vst.msk [vmem:[#allocation2 + $0x28] sm:$0xf] %vm1611_vm13, %v1536_v47 }
 0x1fa   : > { %1829 = vrot.lane.b32.xlu0 %v6617_v20, %s4458_s6  ;;  %v1687_v1 = vpop.permute.xlu1 %1686  ;;  %v1650_v20 = vrot.slane %v1648_v19, 5 }
 0x1fb   : > { %1774 = vst.msk [vmem:[#allocation2 + $0x24] sm:$0xf] %vm1764_vm14, %v1687_v1 }
 0x1fc   : > { %v1685_v61 = vpop.permute.xlu0 %1684  ;;  %1309 = vrot.lane.b32.xlu1 %v5780_v0, %s4454_s24  ;;  %v1651_v10 = vor.u32 %v1650_v20, %v1647_v13 }
 0x1fd   : > { %1773 = vst.msk [vmem:[#allocation2 + $0x20] sm:$0xf] %vm1764_vm14, %v1685_v61 }
 0x1fe   : > { %1307 = vrot.lane.b32.xlu0 %v5784_v50, %s4454_s24  ;;  %v1149_v42 = vpop.permute.xlu1 %1148  ;;  %v1652_v5 = vrot.slane %v1651_v10, 4 }
 0x1ff   : > { %1218 = vst.msk [vmem:[#allocation2 + $0x6c] sm:$0xf] %vm1190_vm10, %v1149_v42 }
 0x200   : > { %v1147_v51 = vpop.permute.xlu0 %1146  ;;  %1442 = vrot.lane.b32.xlu1 %v5222_v7, %s4455_s25  ;;  %v1383_v7 = vsel %vm4970_vm6, %v1381_v26, %v1382_v34  ;;  %vm3720_vm6 = vcmask 1046534  }
 0x201   : > { %1217 = vst.msk [vmem:[#allocation2 + $0x68] sm:$0xf] %vm1190_vm10, %v1147_v51 }
 0x202   : > { %1440 = vrot.lane.b32.xlu0 %v5226_v40, %s4455_s25  ;;  %v1298_v46 = vpop.permute.xlu1 %1297  ;;  %v1654_v40 = vshll.u32 %v5801_v62, 16 }
 0x203   : > { %1369 = vst.msk [vmem:[#allocation2 + $0x64] sm:$0xf] %vm1343_vm11, %v1298_v46 }
 0x204   : > { %v1296_v15 = vpop.permute.xlu0 %1295  ;;  %1835 = vrot.lane.b32.xlu1 %v5129_v3, %s4458_s6 }
 0x205   : > { %1368 = vst.msk [vmem:[#allocation2 + $0x60] sm:$0xf] %vm1343_vm11, %v1296_v15 }
 0x206   : > { %1833 = vrot.lane.b32.xlu0 %v5135_v39, %s4458_s6  ;;  %v1691_v48 = vpop.permute.xlu1 %1690  ;;  %v1656_v39 = vrot.slane %v1654_v40, 5 }
 0x207   : > { %1776 = vst.msk [vmem:[#allocation2 + $0x2c] sm:$0xf] %vm1764_vm14, %v1691_v48 }
 0x208   : > { %v1689_v3 = vpop.permute.xlu0 %1688  ;;  %1446 = vrot.lane.b32.xlu1 %v1383_v7, %s4455_s25  ;;  %v1661_v6 = vor.u32 %v1660_v24, %v1656_v39  ;;  %v1657_v43 = vsel %vm4551_vm3, %v1652_v5, %v1656_v39 }
 0x209   : > { %1775 = vst.msk [vmem:[#allocation2 + $0x28] sm:$0xf] %vm1764_vm14, %v1689_v3 }
 0x20a   : > { %1444 = vrot.lane.b32.xlu0 %v1380_v8, %s4455_s25  ;;  %v1824_v41 = vpop.permute.xlu1 %1823  ;;  %v1662_v12 = vrot.slane %v1661_v6, 4 }
 0x20b   : > { %1911 = vst.msk [vmem:[#allocation2 + $0x24] sm:$0xf] %vm1901_vm15, %v1824_v41 }
 0x20c   : > { %v1822_v31 = vpop.permute.xlu0 %1821  ;;  %1573 = vrot.lane.b32.xlu1 %v5741_v60, %s4456_s26  ;;  %v1667_v37 = vsel %vm4551_vm3, %v1662_v12, %v1666_v11  ;;  %vm3714_vm3 = vcmask 1043459  }
 0x20d   : > { %1910 = vst.msk [vmem:[#allocation2 + $0x20] sm:$0xf] %vm1901_vm15, %v1822_v31 }
 0x20e   : > { %1571 = vrot.lane.b32.xlu0 %v5746_v4, %s4456_s26  ;;  %v1302_v28 = vpop.permute.xlu1 %1301 }
 0x20f   : > { %1371 = vst.msk [vmem:[#allocation2 + $0x6c] sm:$0xf] %vm1343_vm11, %v1302_v28 }
 0x210   : > { %v1300_v30 = vpop.permute.xlu0 %1299  ;;  %1577 = vrot.lane.b32.xlu1 %v5801_v62, %s4456_s26 }
 0x211   : > { %1370 = vst.msk [vmem:[#allocation2 + $0x68] sm:$0xf] %vm1343_vm11, %v1300_v30 }
 0x212   : > { %1575 = vrot.lane.b32.xlu0 %v5805_v27, %s4456_s26  ;;  %v1435_v60 = vpop.permute.xlu1 %1434 }
 0x213   : > { %1506 = vst.msk [vmem:[#allocation2 + $0x64] sm:$0xf] %vm1480_vm12, %v1435_v60 }
 0x214   : > { %v1433_v4 = vpop.permute.xlu0 %1432  ;;  %v4433_v55 = vld [vmem:[#allocation2 + $0x20] sm:$0xff]   ;;  %1726 = vrot.lane.b32.xlu1 %v5780_v0, %s4457_s27 }
 0x215   : > { %1505 = vst.msk [vmem:[#allocation2 + $0x60] sm:$0xf] %vm1480_vm12, %v1433_v4  ;;  %4369 = vmatprep.mubr.msk.bf16.mxu0 %vm2066_vm0, %v4433_v55 }
 0x216   : > { %1724 = vrot.lane.b32.xlu0 %v5784_v50, %s4457_s27  ;;  %v1828_v17 = vpop.permute.xlu1 %1827 }
 0x217   : > { %1913 = vst.msk [vmem:[#allocation2 + $0x2c] sm:$0xf] %vm1901_vm15, %v1828_v17 }
 0x218   : > { %v1826_v56 = vpop.permute.xlu0 %1825  ;;  %1730 = vrot.lane.b32.xlu1 %v1667_v37, %s4457_s27 }
 0x219   : > { %1912 = vst.msk [vmem:[#allocation2 + $0x28] sm:$0xf] %vm1901_vm15, %v1826_v56 }
 0x21a   : > { %1728 = vrot.lane.b32.xlu0 %v1657_v43, %s4457_s27  ;;  %v1439_v33 = vpop.permute.xlu1 %1438 }
 0x21b   : > { %1508 = vst.msk [vmem:[#allocation2 + $0x6c] sm:$0xf] %vm1480_vm12, %v1439_v33 }
 0x21c   : > { %v1437_v21 = vpop.permute.xlu0 %1436  ;;  %1863 = vrot.lane.b32.xlu1 %v1383_v7, %s4458_s6 }
 0x21d   : > { %1507 = vst.msk [vmem:[#allocation2 + $0x68] sm:$0xf] %vm1480_vm12, %v1437_v21 }
 0x21e   : > { %1861 = vrot.lane.b32.xlu0 %v1380_v8, %s4458_s6  ;;  %v1566_v57 = vpop.permute.xlu1 %1565 }
 0x21f   : > { %1637 = vst.msk [vmem:[#allocation2 + $0x64] sm:$0xf] %vm1611_vm13, %v1566_v57 }
 0x220   : > { %v1564_v54 = vpop.permute.xlu0 %1563  ;;  %v4434_v53 = vld [vmem:[#allocation2 + $0x28] sm:$0xff]   ;;  %1867 = vrot.lane.b32.xlu1 %v1804_v35, %s4458_s6 }
 0x221   : > { %1636 = vst.msk [vmem:[#allocation2 + $0x60] sm:$0xf] %vm1611_vm13, %v1564_v54  ;;  %4370 = vmatmul.mubr.msk.bf16.gmra.mxu0 %vm2066_vm0, %v4434_v53 }
 0x222   : > { %1865 = vrot.lane.b32.xlu0 %v1801_v49, %s4458_s6  ;;  %v1121_v59 = vpop.permute.xlu1 %1120 }
 0x223   : > { %1204 = vst.msk [vmem:[#allocation2 + $0x34] sm:$0xf] %vm1190_vm10, %v1121_v59 }
 0x224   : > { %v1119_v25 = vpop.permute.xlu0 %1118 }
 0x225   : > { %1203 = vst.msk [vmem:[#allocation2 + $0x30] sm:$0xf] %vm1190_vm10, %v1119_v25  ;;  %v5934_v25 = vld [vmem:[%s6440_s2] ss:$0 sm:$0xff] }
 0x226   : > { %v1570_v63 = vpop.permute.xlu1 %1569 }
 0x227   : > { %1639 = vst.msk [vmem:[#allocation2 + $0x6c] sm:$0xf] %vm1611_vm13, %v1570_v63 }
 0x228   : > { %v1568_v9 = vpop.permute.xlu0 %1567 }
 0x229   : > { %1638 = vst.msk [vmem:[#allocation2 + $0x68] sm:$0xf] %vm1611_vm13, %v1568_v9 }
 0x22a   : > { %v1719_v36 = vpop.permute.xlu1 %1718 }
 0x22b   : > { %1790 = vst.msk [vmem:[#allocation2 + $0x64] sm:$0xf] %vm1764_vm14, %v1719_v36  ;;  %v5940_v36 = vld [vmem:[%s6441_s3] ss:$0 sm:$0xff] }
 0x22c   : > { %v1717_v52 = vpop.permute.xlu0 %1716 }
 0x22d   : > { %1789 = vst.msk [vmem:[#allocation2 + $0x60] sm:$0xf] %vm1764_vm14, %v1717_v52  ;;  %v4363_v59 = vpop.f32.mrf.mxu0 }
 0x22e   : > { %v1125_v45 = vpop.permute.xlu1 %1124  ;;  %v2289_v9 = vmul.f32 %v4363_v59, %v5934_v25 }
 0x22f   : > { %1206 = vst.msk [vmem:[#allocation2 + $0x3c] sm:$0xf] %vm1190_vm10, %v1125_v45  ;;  %v2153_v63 = vpop.f32.mrf.mxu0  ;;  %v4459_v45 = vmov 1983009808  }
 0x230   : > { %v1123_v47 = vpop.permute.xlu0 %1122 }
 0x231   : > { %1205 = vst.msk [vmem:[#allocation2 + $0x38] sm:$0xf] %vm1190_vm10, %v1123_v47  ;;  %v4364_v52 = vpop.f32.mrf.mxu0  ;;  %v2424_v47 = vunpack.c.l.s4 %v4459_v45 }
 0x232   : > { %v1274_v38 = vpop.permute.xlu1 %1273 }
 0x233   : > { %1357 = vst.msk [vmem:[#allocation2 + $0x34] sm:$0xf] %vm1343_vm11, %v1274_v38  ;;  %v2426_v38 = vlaneseq }
 0x234   : > { %v1272_v0 = vpop.permute.xlu0 %1271 }
 0x235   : > { %1356 = vst.msk [vmem:[#allocation2 + $0x30] sm:$0xf] %vm1343_vm11, %v1272_v0  ;;  %v2287_v0 = vmul.f32 %v5934_v25, %v2153_v63 }
 0x236   : > { %v1723_v1 = vpop.permute.xlu1 %1722 }
 0x237   : > { %1792 = vst.msk [vmem:[#allocation2 + $0x6c] sm:$0xf] %vm1764_vm14, %v1723_v1  ;;  %v2328_v1 = vadd.f32 %v5940_v36, %v2289_v9 }
 0x238   : > { %v1721_v50 = vpop.permute.xlu0 %1720 }
 0x239   : > { %1791 = vst.msk [vmem:[#allocation2 + $0x68] sm:$0xf] %vm1764_vm14, %v1721_v50  ;;  %v2156_v50 = vpop.f32.mrf.mxu0 }
 0x23a   : > { %v1856_v61 = vpop.permute.xlu1 %1855 }
 0x23b   : > { %1927 = vst.msk [vmem:[#allocation2 + $0x64] sm:$0xf] %vm1901_vm15, %v1856_v61  ;;  %v2425_v61 = vunpack.c.0.s8 %v2424_v47 }
 0x23c   : > { %v1854_v44 = vpop.permute.xlu0 %1853 }
 0x23d   : > { %1926 = vst.msk [vmem:[#allocation2 + $0x60] sm:$0xf] %vm1901_vm15, %v1854_v44  ;;  %v2427_v44 = vshrl.u32 %v2426_v38, 7 }
 0x23e   : > { %v1278_v42 = vpop.permute.xlu1 %1277 }
 0x23f   : > { %1359 = vst.msk [vmem:[#allocation2 + $0x3c] sm:$0xf] %vm1343_vm11, %v1278_v42  ;;  %v2326_v42 = vadd.f32 %v5940_v36, %v2287_v0 }
 0x240   : > { %v1276_v51 = vpop.permute.xlu0 %1275 }
 0x241   : > { %1358 = vst.msk [vmem:[#allocation2 + $0x38] sm:$0xf] %vm1343_vm11, %v1276_v51  ;;  %v2360_v51 = vmax.f32 %v2328_v1, 0.0 }
 0x242   : > { %v1411_v26 = vpop.permute.xlu1 %1410 }
 0x243   : > { %1494 = vst.msk [vmem:[#allocation2 + $0x34] sm:$0xf] %vm1480_vm12, %v1411_v26  ;;  %v2288_v26 = vmul.f32 %v5934_v25, %v2156_v50 }
 0x244   : > { %v1409_v34 = vpop.permute.xlu0 %1408  ;;  %v4435_v46 = vld [vmem:[#allocation2 + $0x60] sm:$0xff]  }
 0x245   : > { %1493 = vst.msk [vmem:[#allocation2 + $0x30] sm:$0xf] %vm1480_vm12, %v1409_v34  ;;  %4385 = vmatprep.mubr.msk.bf16.mxu1 %vm2066_vm0, %v4435_v46  ;;  %v5946_v34 = vsub.s32 %v2425_v61, %v2427_v44  ;;  %v2290_v46 = vmul.f32 %v4364_v52, %v5934_v25 }
 0x246   : > { %v1860_v29 = vpop.permute.xlu1 %1859 }
 0x247   : > { %1929 = vst.msk [vmem:[#allocation2 + $0x6c] sm:$0xf] %vm1901_vm15, %v1860_v29  ;;  %v2358_v29 = vmax.f32 %v2326_v42, 0.0 }
 0x248   : > { %v1858_v62 = vpop.permute.xlu0 %1857 }
 0x249   : > { %1928 = vst.msk [vmem:[#allocation2 + $0x68] sm:$0xf] %vm1901_vm15, %v1858_v62  ;;  %v2456_v62 = vcombine.high %v2360_v51, %v2360_v51 }
 0x24a   : > { %v1415_v15 = vpop.permute.xlu1 %1414 }
 0x24b   : > { %1496 = vst.msk [vmem:[#allocation2 + $0x3c] sm:$0xf] %vm1480_vm12, %v1415_v15  ;;  %v2327_v15 = vadd.f32 %v5940_v36, %v2288_v26 }
 0x24c   : > { %v1413_v27 = vpop.permute.xlu0 %1412 }
 0x24d   : > { %1495 = vst.msk [vmem:[#allocation2 + $0x38] sm:$0xf] %vm1480_vm12, %v1413_v27  ;;  %v2463_v27 = vrot.slane %v2360_v51, %v5946_v34 }
 0x24e   : > { %v1542_v7 = vpop.permute.xlu1 %1541 }
 0x24f   : > { %1625 = vst.msk [vmem:[#allocation2 + $0x34] sm:$0xf] %vm1611_vm13, %v1542_v7  ;;  %v2329_v7 = vadd.f32 %v5940_v36, %v2290_v46 }
 0x250   : > { %v1540_v40 = vpop.permute.xlu0 %1539  ;;  %v4436_v58 = vld [vmem:[#allocation2 + $0x68] sm:$0xff]  }
 0x251   : > { %1624 = vst.msk [vmem:[#allocation2 + $0x30] sm:$0xf] %vm1611_vm13, %v1540_v40  ;;  %4386 = vmatmul.mubr.msk.bf16.gmra.mxu1 %vm2066_vm0, %v4436_v58  ;;  %v2422_v40 = vcombine.high %v2358_v29, %v2358_v29 }
 0x252   : > { %v1153_v48 = vpop.permute.xlu1 %1152 }
 0x253   : > { %1220 = vst.msk [vmem:[#allocation2 + $0x74] sm:$0xf] %vm1190_vm10, %v1153_v48  ;;  %v2470_v48 = vrot.slane %v2456_v62, %v5946_v34 }
 0x254   : > { %v1151_v8 = vpop.permute.xlu0 %1150 }
 0x255   : > { %1219 = vst.msk [vmem:[#allocation2 + $0x70] sm:$0xf] %vm1190_vm10, %v1151_v8  ;;  %v4379_v58 = vpop.f32.mrf.mxu1  ;;  %v2359_v8 = vmax.f32 %v2327_v15, 0.0 }
 0x256   : > { %v1546_v16 = vpop.permute.xlu1 %1545 }
 0x257   : > { %1627 = vst.msk [vmem:[#allocation2 + $0x3c] sm:$0xf] %vm1611_vm13, %v1546_v16  ;;  %v2429_v16 = vrot.slane %v2358_v29, %v5946_v34 }
 0x258   : > { %v1544_v19 = vpop.permute.xlu0 %1543 }
 0x259   : > { %1626 = vst.msk [vmem:[#allocation2 + $0x38] sm:$0xf] %vm1611_vm13, %v1544_v19  ;;  %v2471_v19 = vcombine.high %v2463_v27, %v2463_v27 }
 0x25a   : > { %v1695_v3 = vpop.permute.xlu1 %1694 }
 0x25b   : > { %1778 = vst.msk [vmem:[#allocation2 + $0x34] sm:$0xf] %vm1764_vm14, %v1695_v3  ;;  %v2361_v3 = vmax.f32 %v2329_v7, 0.0 }
 0x25c   : > { %v1693_v39 = vpop.permute.xlu0 %1692 }
 0x25d   : > { %1777 = vst.msk [vmem:[#allocation2 + $0x30] sm:$0xf] %vm1764_vm14, %v1693_v39  ;;  %v2436_v39 = vrot.slane %v2422_v40, %v5946_v34 }
 0x25e   : > { %v1157_v24 = vpop.permute.xlu1 %1156 }
 0x25f   : > { %1222 = vst.msk [vmem:[#allocation2 + $0x7c] sm:$0xf] %vm1190_vm10, %v1157_v24  ;;  %v2217_v24 = vpop.f32.mrf.mxu1 }
 0x260   : > { %v1155_v41 = vpop.permute.xlu0 %1154 }
 0x261   : > { %1221 = vst.msk [vmem:[#allocation2 + $0x78] sm:$0xf] %vm1190_vm10, %v1155_v41  ;;  %v2472_v41 = vcombine.high %v2470_v48, %v2470_v48  ;;  %vm3829_vm10 = vcmask 195712  }
 0x262   : > { %v1306_v13 = vpop.permute.xlu1 %1305 }
 0x263   : > { %1373 = vst.msk [vmem:[#allocation2 + $0x74] sm:$0xf] %vm1343_vm11, %v1306_v13  ;;  %v2439_v13 = vcombine.high %v2359_v8, %v2359_v8 }
 0x264   : > { %v1304_v20 = vpop.permute.xlu0 %1303 }
 0x265   : > { %1372 = vst.msk [vmem:[#allocation2 + $0x70] sm:$0xf] %vm1343_vm11, %v1304_v20  ;;  %v2305_v20 = vmul.f32 %v4379_v58, %v5934_v25 }
 0x266   : > { %v1699_v18 = vpop.permute.xlu1 %1698 }
 0x267   : > { %1780 = vst.msk [vmem:[#allocation2 + $0x3c] sm:$0xf] %vm1764_vm14, %v1699_v18  ;;  %v2437_v18 = vcombine.high %v2429_v16, %v2429_v16 }
 0x268   : > { %v1697_v31 = vpop.permute.xlu0 %1696 }
 0x269   : > { %1779 = vst.msk [vmem:[#allocation2 + $0x38] sm:$0xf] %vm1764_vm14, %v1697_v31  ;;  %v4206_v31 = vrot.slane %v2429_v16, 9 }
 0x26a   : > { %v1832_v6 = vpop.permute.xlu1 %1831 }
 0x26b   : > { %1915 = vst.msk [vmem:[#allocation2 + $0x34] sm:$0xf] %vm1901_vm15, %v1832_v6  ;;  %v4214_v6 = vrot.slane %v2463_v27, 9 }
 0x26c   : > { %v1830_v14 = vpop.permute.xlu0 %1829 }
 0x26d   : > { %1914 = vst.msk [vmem:[#allocation2 + $0x30] sm:$0xf] %vm1901_vm15, %v1830_v14  ;;  %v4215_v14 = vrot.slane %v2471_v19, 9 }
 0x26e   : > { %v1310_v28 = vpop.permute.xlu1 %1309 }
 0x26f   : > { %1375 = vst.msk [vmem:[#allocation2 + $0x7c] sm:$0xf] %vm1343_vm11, %v1310_v28  ;;  %v2473_v28 = vcombine.high %v2361_v3, %v2361_v3 }
 0x270   : > { %v1308_v10 = vpop.permute.xlu0 %1307 }
 0x271   : > { %1374 = vst.msk [vmem:[#allocation2 + $0x78] sm:$0xf] %vm1343_vm11, %v1308_v10  ;;  %v2446_v10 = vrot.slane %v2359_v8, %v5946_v34  ;;  %vm3881_vm11 = vcmask 261312  }
 0x272   : > { %v1443_v30 = vpop.permute.xlu1 %1442 }
 0x273   : > { %1510 = vst.msk [vmem:[#allocation2 + $0x74] sm:$0xf] %vm1480_vm12, %v1443_v30  ;;  %v4216_v30 = vrot.slane %v2470_v48, 9  ;;  %v4210_v63 = vrot.slane %v2446_v10, 9 }
 0x274   : > { %v1441_v12 = vpop.permute.xlu0 %1440  ;;  %v4437_v11 = vld [vmem:[#allocation2 + $0x30] sm:$0xff]  }
 0x275   : > { %1509 = vst.msk [vmem:[#allocation2 + $0x70] sm:$0xf] %vm1480_vm12, %v1441_v12  ;;  %4373 = vmatprep.mubr.msk.bf16.mxu0 %vm2066_vm0, %v4437_v11  ;;  %v2438_v12 = vcombine.high %v2436_v39, %v2436_v39  ;;  %v2480_v11 = vrot.slane %v2361_v3, %v5946_v34  ;;  %v3482_v62 = vmax.f32 %v2446_v10, %v4210_v63 }
 0x276   : > { %v1836_v60 = vpop.permute.xlu1 %1835 }
 0x277   : > { %1917 = vst.msk [vmem:[#allocation2 + $0x3c] sm:$0xf] %vm1901_vm15, %v1836_v60  ;;  %v2303_v60 = vmul.f32 %v5934_v25, %v2217_v24  ;;  %v4218_v38 = vrot.slane %v2480_v11, 9 }
 0x278   : > { %v1834_v5 = vpop.permute.xlu0 %1833 }
 0x279   : > { %1916 = vst.msk [vmem:[#allocation2 + $0x38] sm:$0xf] %vm1901_vm15, %v1834_v5  ;;  %v4380_v5 = vpop.f32.mrf.mxu1  ;;  %v3490_v58 = vmax.f32 %v2480_v11, %v4218_v38 }
 0x27a   : > { %v1447_v4 = vpop.permute.xlu1 %1446  ;;  %v2306_v50 = vmul.f32 %v4380_v5, %v5934_v25 }
 0x27b   : > { %1512 = vst.msk [vmem:[#allocation2 + $0x7c] sm:$0xf] %vm1480_vm12, %v1447_v4  ;;  %v4217_v4 = vrot.slane %v2472_v41, 9 }
 0x27c   : > { %v1445_v55 = vpop.permute.xlu0 %1444 }
 0x27d   : > { %1511 = vst.msk [vmem:[#allocation2 + $0x78] sm:$0xf] %vm1480_vm12, %v1445_v55  ;;  %v2453_v55 = vrot.slane %v2439_v13, %v5946_v34  ;;  %vm3933_vm12 = vcmask 326912  }
 0x27e   : > { %v1574_v32 = vpop.permute.xlu1 %1573 }
 0x27f   : > { %1641 = vst.msk [vmem:[#allocation2 + $0x74] sm:$0xf] %vm1611_vm13, %v1574_v32  ;;  %v2344_v32 = vadd.f32 %v5940_v36, %v2305_v20  ;;  %v2455_v59 = vcombine.high %v2453_v55, %v2453_v55  ;;  %v4212_v51 = vrot.slane %v2453_v55, 9 }
 0x280   : > { %v1572_v37 = vpop.permute.xlu0 %1571  ;;  %v4438_v17 = vld [vmem:[#allocation2 + $0x38] sm:$0xff]  }
 0x281   : > { %1640 = vst.msk [vmem:[#allocation2 + $0x70] sm:$0xf] %vm1611_vm13, %v1572_v37  ;;  %4374 = vmatmul.mubr.msk.bf16.gmra.mxu0 %vm2066_vm0, %v4438_v17  ;;  %v4207_v37 = vrot.slane %v2437_v18, 9  ;;  %v4208_v17 = vrot.slane %v2436_v39, 9  ;;  %v2376_v9 = vmax.f32 %v2344_v32, 0.0  ;;  %v4213_v29 = vrot.slane %v2455_v59, 9 }
 0x282   : > { %v1578_v43 = vpop.permute.xlu1 %1577 }
 0x283   : > { %1643 = vst.msk [vmem:[#allocation2 + $0x7c] sm:$0xf] %vm1611_vm13, %v1578_v43  ;;  %v3478_v43 = vmax.f32 %v2429_v16, %v4206_v31  ;;  %v3479_v52 = vmax.f32 %v2437_v18, %v4207_v37  ;;  %v3480_v45 = vmax.f32 %v2436_v39, %v4208_v17  ;;  %v2728_v15 = vcombine.high %v2376_v9, %v2376_v9 }
 0x284   : > { %v1576_v56 = vpop.permute.xlu0 %1575  ;;  %v3485_v18 = vmax.f32 %v2455_v59, %v4213_v29  ;;  %v3610_v31 = vmax.f32 %v3482_v62, %v3490_v58 }
 0x285   : > { %1642 = vst.msk [vmem:[#allocation2 + $0x78] sm:$0xf] %vm1611_vm13, %v1576_v56  ;;  %v5961_v56 = vsub.s32 0, %v2427_v44  ;;  %vm3985_vm13 = vcmask 392512  }
 0x286   : > { %v1727_v2 = vpop.permute.xlu1 %1726 }
 0x287   : > { %1794 = vst.msk [vmem:[#allocation2 + $0x74] sm:$0xf] %vm1764_vm14, %v1727_v2  ;;  %v3486_v2 = vmax.f32 %v2463_v27, %v4214_v6  ;;  %v4367_v27 = vpop.f32.mrf.mxu0  ;;  %v2742_v6 = vrot.slane %v2728_v15, %v5946_v34 }
 0x288   : > { %v1725_v23 = vpop.permute.xlu0 %1724 }
 0x289   : > { %1793 = vst.msk [vmem:[#allocation2 + $0x70] sm:$0xf] %vm1764_vm14, %v1725_v23  ;;  %v3487_v23 = vmax.f32 %v2471_v19, %v4215_v14  ;;  %v3606_v47 = vmax.f32 %v3478_v43, %v3486_v2  ;;  %v2345_v19 = vadd.f32 %v5940_v36, %v2306_v50  ;;  %v2169_v14 = vpop.f32.mrf.mxu0  ;;  %v5986_v2 = vrot.slane %v3610_v31, %v5961_v56 }
 0x28a   : > { %v1731_v22 = vpop.permute.xlu1 %1730 }
 0x28b   : > { %1796 = vst.msk [vmem:[#allocation2 + $0x7c] sm:$0xf] %vm1764_vm14, %v1731_v22  ;;  %v2487_v22 = vrot.slane %v2473_v28, %v5946_v34  ;;  %v3607_v7 = vmax.f32 %v3479_v52, %v3487_v23  ;;  %v5971_v24 = vrot.slane %v3606_v47, %v5961_v56  ;;  %v2377_v5 = vmax.f32 %v2345_v19, 0.0 }
 0x28c   : > { %v1729_v33 = vpop.permute.xlu0 %1728  ;;  %v2744_v23 = vcombine.high %v2742_v6, %v2742_v6 }
 0x28d   : > { %1795 = vst.msk [vmem:[#allocation2 + $0x78] sm:$0xf] %vm1764_vm14, %v1729_v33  ;;  %v2454_v33 = vcombine.high %v2446_v10, %v2446_v10  ;;  %v2489_v0 = vcombine.high %v2487_v22, %v2487_v22  ;;  %v4220_v46 = vrot.slane %v2487_v22, 9  ;;  %v5975_v28 = vrot.slane %v3607_v7, %v5961_v56 }
 0x28e   : > { %v1864_v21 = vpop.permute.xlu1 %1863  ;;  %v2745_v59 = vcombine.high %v2377_v5, %v2377_v5  ;;  %vm4037_vm14 = vcmask 458112  }
 0x28f   : > { %1931 = vst.msk [vmem:[#allocation2 + $0x74] sm:$0xf] %vm1901_vm15, %v1864_v21  ;;  %v3488_v21 = vmax.f32 %v2470_v48, %v4216_v30  ;;  %v4211_v1 = vrot.slane %v2454_v33, 9  ;;  %v2735_v48 = vrot.slane %v2376_v9, %v5946_v34  ;;  %v4221_v8 = vrot.slane %v2489_v0, 9 }
 0x290   : > { %v1862_v35 = vpop.permute.xlu0 %1861  ;;  %v3492_v10 = vmax.f32 %v2487_v22, %v4220_v46  ;;  %v2293_v22 = vmul.f32 %v4367_v27, %v5934_v25  ;;  %v2759_v62 = vrot.slane %v2745_v59, %v5946_v34 }
 0x291   : > { %1930 = vst.msk [vmem:[#allocation2 + $0x70] sm:$0xf] %vm1901_vm15, %v1862_v35  ;;  %v4209_v35 = vrot.slane %v2438_v12, 9  ;;  %v3608_v40 = vmax.f32 %v3480_v45, %v3488_v21  ;;  %v3483_v16 = vmax.f32 %v2454_v33, %v4211_v1  ;;  %v2743_v30 = vcombine.high %v2735_v48, %v2735_v48  ;;  %v4368_v33 = vpop.f32.mrf.mxu0 }
 0x292   : > { %v1868_v57 = vpop.permute.xlu1 %1867  ;;  %v4278_v21 = vrot.slane %v2735_v48, 9  ;;  %v2752_v45 = vrot.slane %v2377_v5, %v5946_v34  ;;  %v4281_v1 = vrot.slane %v2744_v23, 9  ;;  %v2332_v50 = vadd.f32 %v5940_v36, %v2293_v22 }
 0x293   : > { %1933 = vst.msk [vmem:[#allocation2 + $0x7c] sm:$0xf] %vm1901_vm15, %v1868_v57  ;;  %v2488_v57 = vcombine.high %v2480_v11, %v2480_v11  ;;  %v3481_v44 = vmax.f32 %v2438_v12, %v4209_v35  ;;  %v3493_v11 = vmax.f32 %v2489_v0, %v4221_v8  ;;  %v4279_v35 = vrot.slane %v2743_v30, 9 }
 0x294   : > { %v1866_v49 = vpop.permute.xlu0 %1865  ;;  %v4280_v0 = vrot.slane %v2742_v6, 9  ;;  %v2760_v7 = vcombine.high %v2752_v45, %v2752_v45  ;;  %v4282_v19 = vrot.slane %v2752_v45, 9  ;;  %v2761_v31 = vcombine.high %v2759_v62, %v2759_v62 }
 0x295   : > { %1932 = vst.msk [vmem:[#allocation2 + $0x78] sm:$0xf] %vm1901_vm15, %v1866_v49  ;;  %v2342_v49 = vadd.f32 %v5940_v36, %v2303_v60  ;;  %v4219_v42 = vrot.slane %v2488_v57, 9  ;;  %v3613_v43 = vmax.f32 %v3485_v18, %v3493_v11  ;;  %vm4089_vm15 = vcmask 523712  }
 0x296   : > { %v3552_v8 = vmax.f32 %v2742_v6, %v4280_v0  ;;  %v3554_v5 = vmax.f32 %v2752_v45, %v4282_v19 }
 0x297   : > { %v2374_v26 = vmax.f32 %v2342_v49, 0.0  ;;  %v3491_v20 = vmax.f32 %v2488_v57, %v4219_v42  ;;  %v2291_v49 = vmul.f32 %v5934_v25, %v2169_v14  ;;  %v5999_v38 = vrot.slane %v3613_v43, %v5961_v56 }
 0x298   : > { %v4439_v54 = vld [vmem:[#allocation2 + $0x70] sm:$0xff]   ;;  %v3551_v42 = vmax.f32 %v2743_v30, %v4279_v35  ;;  %v4283_v30 = vrot.slane %v2760_v7, 9 }
 0x299   : > { %4389 = vmatprep.mubr.msk.bf16.mxu1 %vm2066_vm0, %v4439_v54  ;;  %v2220_v54 = vpop.f32.mrf.mxu1  ;;  %v2694_v13 = vcombine.high %v2374_v26, %v2374_v26  ;;  %v2701_v12 = vrot.slane %v2374_v26, %v5946_v34  ;;  %v3611_v60 = vmax.f32 %v3483_v16, %v3491_v20  ;;  %v2330_v26 = vadd.f32 %v5940_v36, %v2291_v49 }
 0x29a   : > { %v2304_v61 = vmul.f32 %v5934_v25, %v2220_v54  ;;  %v3553_v16 = vmax.f32 %v2744_v23, %v4281_v1  ;;  %v4285_v49 = vrot.slane %v2761_v31, 9 }
 0x29b   : > { %v2708_v17 = vrot.slane %v2694_v13, %v5946_v34  ;;  %v2709_v57 = vcombine.high %v2701_v12, %v2701_v12  ;;  %v5991_v54 = vrot.slane %v3611_v60, %v5961_v56  ;;  %v2294_v13 = vmul.f32 %v4368_v33, %v5934_v25 }
 0x29c   : > { %v4440_v53 = vld [vmem:[#allocation2 + $0x78] sm:$0xff]   ;;  %v2343_v3 = vadd.f32 %v5940_v36, %v2304_v61  ;;  %v2172_v61 = vpop.f32.mrf.mxu0  ;;  %v4284_v60 = vrot.slane %v2759_v62, 9 }
 0x29d   : > { %4390 = vmatmul.mubr.msk.bf16.gmra.mxu1 %vm2066_vm0, %v4440_v53  ;;  %v3489_v53 = vmax.f32 %v2472_v41, %v4217_v4  ;;  %v3484_v41 = vmax.f32 %v2453_v55, %v4212_v51  ;;  %v5979_v55 = vrot.slane %v3608_v40, %v5961_v56  ;;  %v2710_v52 = vcombine.high %v2708_v17, %v2708_v17 }
 0x29e   : > { %v2375_v4 = vmax.f32 %v2343_v3, 0.0  ;;  %v4271_v51 = vrot.slane %v2709_v57, 9  ;;  %v4272_v46 = vrot.slane %v2708_v17, 9  ;;  %v2292_v58 = vmul.f32 %v5934_v25, %v2172_v61 }
 0x29f   : > { %v3609_v39 = vmax.f32 %v3481_v44, %v3489_v53  ;;  %v3612_v37 = vmax.f32 %v3484_v41, %v3492_v10  ;;  %v4270_v53 = vrot.slane %v2701_v12, 9  ;;  %v3550_v44 = vmax.f32 %v2735_v48, %v4278_v21 }
 0x2a0   : > { %v2711_v63 = vcombine.high %v2375_v4, %v2375_v4  ;;  %v2718_v47 = vrot.slane %v2375_v4, %v5946_v34  ;;  %v4273_v27 = vrot.slane %v2710_v52, 9  ;;  %v2364_v3 = vmax.f32 %v2332_v50, 0.0 }
 0x2a1   : > { %v5982_v32 = vrot.slane %v3609_v39, %v5961_v56  ;;  %v5994_v9 = vrot.slane %v3612_v37, %v5961_v56  ;;  %v3542_v29 = vmax.f32 %v2701_v12, %v4270_v53  ;;  %v3543_v48 = vmax.f32 %v2709_v57, %v4271_v51 }
 0x2a2   : > { %v2725_v15 = vrot.slane %v2711_v63, %v5946_v34  ;;  %v2726_v40 = vcombine.high %v2718_v47, %v2718_v47  ;;  %v4274_v39 = vrot.slane %v2718_v47, 9  ;;  %v2362_v41 = vmax.f32 %v2330_v26, 0.0 }
 0x2a3   : > { %v3544_v20 = vmax.f32 %v2708_v17, %v4272_v46  ;;  %v3638_v18 = vmax.f32 %v3542_v29, %v3550_v44  ;;  %v3545_v10 = vmax.f32 %v2710_v52, %v4273_v27  ;;  %v2331_v11 = vadd.f32 %v5940_v36, %v2292_v58 }
 0x2a4   : > { %v2727_v14 = vcombine.high %v2725_v15, %v2725_v15  ;;  %v4275_v12 = vrot.slane %v2726_v40, 9  ;;  %v4276_v6 = vrot.slane %v2725_v15, 9  ;;  %v2524_v4 = vcombine.high %v2364_v3, %v2364_v3 }
 0x2a5   : > { %v3639_v37 = vmax.f32 %v3543_v48, %v3551_v42  ;;  %v3546_v43 = vmax.f32 %v2718_v47, %v4274_v39  ;;  %v2490_v23 = vcombine.high %v2362_v41, %v2362_v41  ;;  %v2333_v22 = vadd.f32 %v5940_v36, %v2294_v13 }
 0x2a6   : > { %v3640_v21 = vmax.f32 %v3544_v20, %v3552_v8  ;;  %v6010_v17 = vrot.slane %v3638_v18, %v5961_v56  ;;  %v4277_v33 = vrot.slane %v2727_v14, 9  ;;  %v2531_v35 = vrot.slane %v2364_v3, %v5946_v34 }
 0x2a7   : > { %v3641_v57 = vmax.f32 %v3545_v10, %v3553_v16  ;;  %v3547_v53 = vmax.f32 %v2726_v40, %v4275_v12  ;;  %v2363_v59 = vmax.f32 %v2331_v11, 0.0  ;;  %v3555_v52 = vmax.f32 %v2760_v7, %v4283_v30 }
 0x2a8   : > { %v6013_v45 = vmax.f32 %v2725_v15, %v4276_v6  ;;  %v2538_v47 = vrot.slane %v2524_v4, %v5946_v34  ;;  %v2497_v0 = vrot.slane %v2362_v41, %v5946_v34  ;;  %v6017_v1 = vmax.f32 %v2759_v62, %v4284_v60 }
 0x2a9   : > { %v3642_v50 = vmax.f32 %v3546_v43, %v3554_v5  ;;  %v2504_v61 = vrot.slane %v2490_v23, %v5946_v34  ;;  %v2365_v44 = vmax.f32 %v2333_v22, 0.0  ;;  %v6020_v42 = vmax.f32 %v2727_v14, %v4277_v33 }
 0x2aa   : > { %v2539_v51 = vcombine.high %v2531_v35, %v2531_v35  ;;  %v6023_v26 = vrot.slane %v3639_v37, %v5961_v56  ;;  %v6026_v46 = vrot.slane %v3640_v21, %v5961_v56  ;;  %v6028_v29 = vmax.f32 %v2761_v31, %v4285_v49 }
 0x2ab   : > { %v3643_v15 = vmax.f32 %v3547_v53, %v3555_v52  ;;  %v2507_v27 = vcombine.high %v2363_v59, %v2363_v59  ;;  %v6031_v62 = vrot.slane %v3641_v57, %v5961_v56  ;;  %v2540_v58 = vcombine.high %v2538_v47, %v2538_v47 }
 0x2ac   : > { %v2505_v8 = vcombine.high %v2497_v0, %v2497_v0  ;;  %v2514_v16 = vrot.slane %v2363_v59, %v5946_v34  ;;  %v6037_v19 = vrot.slane %v3642_v50, %v5961_v56  ;;  %v4230_v3 = vrot.slane %v2531_v35, 9 }
 0x2ad   : > { %v2506_v48 = vcombine.high %v2504_v61, %v2504_v61  ;;  %v2541_v39 = vcombine.high %v2365_v44, %v2365_v44  ;;  %v4231_v13 = vrot.slane %v2539_v51, 9  ;;  %v2548_v20 = vrot.slane %v2365_v44, %v5946_v34 }
 0x2ae   : > { %v4232_v31 = vrot.slane %v2538_v47, 9  ;;  %v4222_v14 = vrot.slane %v2497_v0, 9  ;;  %v2521_v10 = vrot.slane %v2507_v27, %v5946_v34  ;;  %v6045_v12 = vrot.slane %v3643_v15, %v5961_v56 }
 0x2af   : > { %v4233_v11 = vrot.slane %v2540_v58, 9  ;;  %v4223_v60 = vrot.slane %v2505_v8, 9  ;;  %v4224_v5 = vrot.slane %v2504_v61, 9  ;;  %v2522_v6 = vcombine.high %v2514_v16, %v2514_v16 }
 0x2b0   : > { %6619 = vst [vmem:[#allocation14_spill] sm:$0xff] %v6045_v12  ;;  %v3502_v4 = vmax.f32 %v2531_v35, %v4230_v3  ;;  %v4225_v37 = vrot.slane %v2506_v48, 9  ;;  %v2555_v43 = vrot.slane %v2541_v39, %v5946_v34  ;;  %v3503_v22 = vmax.f32 %v2539_v51, %v4231_v13 }
 0x2b1   : > { %v4383_v63 = vpop.f32.mrf.mxu1  ;;  %v2556_v21 = vcombine.high %v2548_v20, %v2548_v20  ;;  %v4226_v33 = vrot.slane %v2514_v16, 9  ;;  %v3504_v49 = vmax.f32 %v2538_v47, %v4232_v31  ;;  %v3494_v53 = vmax.f32 %v2497_v0, %v4222_v14 }
 0x2b2   : > { %v2309_v18 = vmul.f32 %v4383_v63, %v5934_v25  ;;  %v4234_v59 = vrot.slane %v2548_v20, 9  ;;  %v2523_v63 = vcombine.high %v2521_v10, %v2521_v10  ;;  %v3505_v50 = vmax.f32 %v2540_v58, %v4233_v11 }
 0x2b3   : > { %v2233_v7 = vpop.f32.mrf.mxu1  ;;  %v3495_v44 = vmax.f32 %v2505_v8, %v4223_v60  ;;  %v3496_v15 = vmax.f32 %v2504_v61, %v4224_v5  ;;  %v4227_v27 = vrot.slane %v2522_v6, 9  ;;  %v3497_v35 = vmax.f32 %v2506_v48, %v4225_v37 }
 0x2b4   : > { %v2307_v23 = vmul.f32 %v5934_v25, %v2233_v7  ;;  %v2348_v57 = vadd.f32 %v5940_v36, %v2309_v18  ;;  %v2557_v3 = vcombine.high %v2555_v43, %v2555_v43  ;;  %v4228_v39 = vrot.slane %v2521_v10, 9 }
 0x2b5   : > { %v4384_v30 = vpop.f32.mrf.mxu1  ;;  %v4235_v51 = vrot.slane %v2556_v21, 9  ;;  %v3498_v13 = vmax.f32 %v2514_v16, %v4226_v33  ;;  %v3614_v47 = vmax.f32 %v3494_v53, %v3502_v4  ;;  %v4236_v0 = vrot.slane %v2555_v43, 9 }
 0x2b6   : > { %v2346_v7 = vadd.f32 %v5940_v36, %v2307_v23  ;;  %v2380_v41 = vmax.f32 %v2348_v57, 0.0  ;;  %v3506_v31 = vmax.f32 %v2548_v20, %v4234_v59  ;;  %v4229_v14 = vrot.slane %v2523_v63, 9 }
 0x2b7   : > { %v2236_v52 = vpop.f32.mrf.mxu1  ;;  %v3615_v40 = vmax.f32 %v3495_v44, %v3503_v22  ;;  %v3616_v58 = vmax.f32 %v3496_v15, %v3504_v49  ;;  %v3499_v8 = vmax.f32 %v2522_v6, %v4227_v27  ;;  %v2310_v61 = vmul.f32 %v4384_v30, %v5934_v25 }
 0x2b8   : > { %v2308_v18 = vmul.f32 %v5934_v25, %v2236_v52  ;;  %v3617_v48 = vmax.f32 %v3497_v35, %v3505_v50  ;;  %v4237_v11 = vrot.slane %v2557_v3, 9  ;;  %v3500_v60 = vmax.f32 %v2521_v10, %v4228_v39 }
 0x2b9   : > { %v2378_v5 = vmax.f32 %v2346_v7, 0.0  ;;  %v3507_v37 = vmax.f32 %v2556_v21, %v4235_v51  ;;  %v3618_v23 = vmax.f32 %v3498_v13, %v3506_v31  ;;  %v2796_v12 = vcombine.high %v2380_v41, %v2380_v41 }
 0x2ba   : > { %v2347_v16 = vadd.f32 %v5940_v36, %v2308_v18  ;;  %v3685_v33 = vrot.slane %v3614_v47, %v5961_v56  ;;  %v3508_v4 = vmax.f32 %v2555_v43, %v4236_v0  ;;  %v3501_v57 = vmax.f32 %v2523_v63, %v4229_v14 }
 0x2bb   : > { %v2803_v20 = vrot.slane %v2380_v41, %v5946_v34  ;;  %v3742_v22 = vrot.slane %v3615_v40, %v5961_v56  ;;  %v3794_v6 = vrot.slane %v3616_v58, %v5961_v56  ;;  %v3619_v30 = vmax.f32 %v3499_v8, %v3507_v37 }
 0x2bc   : > { %v2349_v49 = vadd.f32 %v5940_v36, %v2310_v61  ;;  %v3846_v21 = vrot.slane %v3617_v48, %v5961_v56  ;;  %v3509_v53 = vmax.f32 %v2557_v3, %v4237_v11  ;;  %v3620_v59 = vmax.f32 %v3500_v60, %v3508_v4 }
 0x2bd   : > { %v2762_v52 = vcombine.high %v2378_v5, %v2378_v5  ;;  %v3898_v50 = vrot.slane %v3618_v23, %v5961_v56  ;;  %v2810_v43 = vrot.slane %v2796_v12, %v5946_v34  ;;  %v2379_v63 = vmax.f32 %v2347_v16, 0.0 }
 0x2be   : > { %v6620_v40 = vmax.f32 %v6013_v45, %v6017_v1  ;;  %v3621_v44 = vmax.f32 %v3501_v57, %v3509_v53  ;;  %v2811_v15 = vcombine.high %v2803_v20, %v2803_v20  ;;  %v2769_v27 = vrot.slane %v2378_v5, %v5946_v34 }
 0x2bf   : > { %v6622_v35 = vmax.f32 %v6020_v42, %v6028_v29  ;;  %v6077_v12 = vsel %vm3710_vm1, %v3685_v33, %v5971_v24  ;;  %v3950_v39 = vrot.slane %v3619_v30, %v5961_v56  ;;  %v2381_v7 = vmax.f32 %v2349_v49, 0.0 }
 0x2c0   : > { %v6066_v41 = vrot.slane %v6620_v40, %v5961_v56  ;;  %v6082_v1 = vsel %vm3710_vm1, %v3742_v22, %v5975_v28  ;;  %v4002_v51 = vrot.slane %v3620_v59, %v5961_v56  ;;  %v2776_v13 = vrot.slane %v2762_v52, %v5946_v34 }
 0x2c1   : > { %v6073_v3 = vrot.slane %v6622_v35, %v5961_v56  ;;  %v6088_v42 = vsel %vm3710_vm1, %v3794_v6, %v5979_v55  ;;  %v6092_v24 = vsel %vm3710_vm1, %v3846_v21, %v5982_v32  ;;  %v2812_v29 = vcombine.high %v2810_v43, %v2810_v43 }
 0x2c2   : > { %6621 = vst [vmem:[#allocation16_spill] sm:$0xff] %v6066_v41  ;;  %v2779_v18 = vcombine.high %v2379_v63, %v2379_v63  ;;  %v2786_v47 = vrot.slane %v2379_v63, %v5946_v34  ;;  %v6097_v28 = vsel %vm3710_vm1, %v3898_v50, %v5986_v2  ;;  %v4054_v0 = vrot.slane %v3621_v44, %v5961_v56 }
 0x2c3   : > { %6623 = vst [vmem:[#allocation30_spill] sm:$0xff] %v6073_v3  ;;  %v4294_v31 = vrot.slane %v2803_v20, 9  ;;  %v4295_v14 = vrot.slane %v2811_v15, 9  ;;  %v2777_v58 = vcombine.high %v2769_v27, %v2769_v27  ;;  %v2813_v8 = vcombine.high %v2381_v7, %v2381_v7 }
 0x2c4   : > { %v2820_v55 = vrot.slane %v2381_v7, %v5946_v34  ;;  %v6104_v48 = vsel %vm3710_vm1, %v3950_v39, %v5991_v54  ;;  %v4296_v11 = vrot.slane %v2810_v43, 9  ;;  %v2778_v60 = vcombine.high %v2776_v13, %v2776_v13 }
 0x2c5   : > { %v4286_v5 = vrot.slane %v2769_v27, 9  ;;  %v4297_v37 = vrot.slane %v2812_v29, 9  ;;  %v2793_v23 = vrot.slane %v2779_v18, %v5946_v34  ;;  %v2794_v16 = vcombine.high %v2786_v47, %v2786_v47 }
 0x2c6   : > { %v6110_v33 = vsel %vm3710_vm1, %v4002_v51, %v5994_v9  ;;  %v3566_v4 = vmax.f32 %v2803_v20, %v4294_v31  ;;  %v3567_v57 = vmax.f32 %v2811_v15, %v4295_v14  ;;  %v4287_v22 = vrot.slane %v2777_v58, 9 }
 0x2c7   : > { %v6114_v54 = vsel %vm3710_vm1, %v4054_v0, %v5999_v38  ;;  %v4288_v6 = vrot.slane %v2776_v13, 9  ;;  %v2827_v30 = vrot.slane %v2813_v8, %v5946_v34  ;;  %v2828_v49 = vcombine.high %v2820_v55, %v2820_v55 }
 0x2c8   : > { %v3568_v53 = vmax.f32 %v2810_v43, %v4296_v11  ;;  %v4289_v59 = vrot.slane %v2778_v60, 9  ;;  %v3558_v52 = vmax.f32 %v2769_v27, %v4286_v5  ;;  %v3569_v50 = vmax.f32 %v2812_v29, %v4297_v37 }
 0x2c9   : > { %v2795_v20 = vcombine.high %v2793_v23, %v2793_v23  ;;  %v4290_v63 = vrot.slane %v2786_v47, 9  ;;  %v4291_v40 = vrot.slane %v2794_v16, 9  ;;  %v3559_v44 = vmax.f32 %v2777_v58, %v4287_v22 }
 0x2ca   : > { %v4298_v15 = vrot.slane %v2820_v55, 9  ;;  %v3560_v39 = vmax.f32 %v2776_v13, %v4288_v6  ;;  %v2829_v7 = vcombine.high %v2827_v30, %v2827_v30  ;;  %v3561_v18 = vmax.f32 %v2778_v60, %v4289_v59 }
 0x2cb   : > { %v3646_v43 = vmax.f32 %v3558_v52, %v3566_v4  ;;  %v4292_v0 = vrot.slane %v2793_v23, 9  ;;  %v4300_v31 = vrot.slane %v2827_v30, 9  ;;  %v4293_v14 = vrot.slane %v2795_v20, 9 }
 0x2cc   : > { %v3562_v29 = vmax.f32 %v2786_v47, %v4290_v63  ;;  %v3563_v8 = vmax.f32 %v2794_v16, %v4291_v40  ;;  %v3570_v11 = vmax.f32 %v2820_v55, %v4298_v15  ;;  %v3648_v5 = vmax.f32 %v3560_v39, %v3568_v53 }
 0x2cd   : > { %v3564_v22 = vmax.f32 %v2793_v23, %v4292_v0  ;;  %v6126_v55 = vrot.slane %v3646_v43, %v5961_v56 }
 0x2ce   : > { %v3650_v59 = vmax.f32 %v3562_v29, %v3570_v11  ;;  %v6133_v63 = vrot.slane %v3648_v5, %v5961_v56 }
 0x2e1   : > { %v4371_v10 = vpop.f32.mrf.mxu0 }
 0x2e2   : > { %v2297_v61 = vmul.f32 %v4371_v10, %v5934_v25 }
 0x2e3   : > { %v2185_v45 = vpop.f32.mrf.mxu0 }
 0x2e4   : > { %v2295_v2 = vmul.f32 %v5934_v25, %v2185_v45  ;;  %v2336_v10 = vadd.f32 %v5940_v36, %v2297_v61  ;;  %v4299_v45 = vrot.slane %v2828_v49, 9  ;;  %v3647_v61 = vmax.f32 %v3559_v44, %v3567_v57 }
 0x2e5   : > { %v4372_v32 = vpop.f32.mrf.mxu0  ;;  %v3572_v57 = vmax.f32 %v2827_v30, %v4300_v31 }
 0x2e6   : > { %v2334_v9 = vadd.f32 %v5940_v36, %v2295_v2  ;;  %v2298_v38 = vmul.f32 %v4372_v32, %v5934_v25  ;;  %v2368_v51 = vmax.f32 %v2336_v10, 0.0  ;;  %v4301_v2 = vrot.slane %v2829_v7, 9 }
 0x2e7   : > { %v2188_v21 = vpop.f32.mrf.mxu0  ;;  %v3571_v13 = vmax.f32 %v2828_v49, %v4299_v45  ;;  %v3649_v10 = vmax.f32 %v3561_v18, %v3569_v50  ;;  %v6130_v23 = vrot.slane %v3647_v61, %v5961_v56  ;;  %v3652_v50 = vmax.f32 %v3564_v22, %v3572_v57 }
 0x2e8   : > { %v2296_v35 = vmul.f32 %v5934_v25, %v2188_v21  ;;  %v2366_v27 = vmax.f32 %v2334_v9, 0.0  ;;  %v2337_v58 = vadd.f32 %v5940_v36, %v2298_v38  ;;  %v2592_v37 = vcombine.high %v2368_v51, %v2368_v51 }
 0x2e9   : > { %v2599_v60 = vrot.slane %v2368_v51, %v5946_v34  ;;  %v3565_v21 = vmax.f32 %v2795_v20, %v4293_v14  ;;  %v3651_v47 = vmax.f32 %v3563_v8, %v3571_v13  ;;  %v3573_v9 = vmax.f32 %v2829_v7, %v4301_v2 }
 0x2ea   : > { %v2335_v32 = vadd.f32 %v5940_v36, %v2296_v35  ;;  %v2558_v4 = vcombine.high %v2366_v27, %v2366_v27  ;;  %v2565_v16 = vrot.slane %v2366_v27, %v5946_v34  ;;  %v2369_v52 = vmax.f32 %v2337_v58, 0.0 }
 0x2eb   : > { %v2606_v49 = vrot.slane %v2592_v37, %v5946_v34  ;;  %v2607_v20 = vcombine.high %v2599_v60, %v2599_v60  ;;  %v6137_v15 = vrot.slane %v3649_v10, %v5961_v56  ;;  %v6140_v38 = vrot.slane %v3650_v59, %v5961_v56 }
 0x2ec   : > { %v2367_v53 = vmax.f32 %v2335_v32, 0.0  ;;  %v2572_v40 = vrot.slane %v2558_v4, %v5946_v34  ;;  %v2573_v30 = vcombine.high %v2565_v16, %v2565_v16  ;;  %v6143_v35 = vrot.slane %v3651_v47, %v5961_v56 }
 0x2ed   : > { %6624 = vst [vmem:[#allocation19_spill] sm:$0xff] %v6140_v38  ;;  %v3653_v39 = vmax.f32 %v3565_v21, %v3573_v9  ;;  %v4246_v7 = vrot.slane %v2599_v60, 9  ;;  %v4238_v45 = vrot.slane %v2565_v16, 9  ;;  %v2609_v51 = vcombine.high %v2369_v52, %v2369_v52 }
 0x2ee   : > { %6625 = vst [vmem:[#allocation18_spill] sm:$0xff] %v6143_v35  ;;  %v2575_v18 = vcombine.high %v2367_v53, %v2367_v53  ;;  %v2608_v43 = vcombine.high %v2606_v49, %v2606_v49  ;;  %v2616_v0 = vrot.slane %v2369_v52, %v5946_v34  ;;  %v2582_v27 = vrot.slane %v2367_v53, %v5946_v34 }
 0x2ef   : > { %v4247_v14 = vrot.slane %v2607_v20, 9  ;;  %v4248_v29 = vrot.slane %v2606_v49, 9  ;;  %v2574_v8 = vcombine.high %v2572_v40, %v2572_v40  ;;  %v4239_v11 = vrot.slane %v2573_v30, 9 }
 0x2f0   : > { %v4240_v58 = vrot.slane %v2572_v40, 9  ;;  %v6150_v32 = vrot.slane %v3652_v50, %v5961_v56  ;;  %v6153_v5 = vrot.slane %v3653_v39, %v5961_v56  ;;  %v3518_v2 = vmax.f32 %v2599_v60, %v4246_v7 }
 0x2f1   : > { %v3510_v13 = vmax.f32 %v2565_v16, %v4238_v45  ;;  %v2623_v37 = vrot.slane %v2609_v51, %v5946_v34  ;;  %v2589_v22 = vrot.slane %v2575_v18, %v5946_v34  ;;  %v4249_v10 = vrot.slane %v2608_v43, 9 }
 0x2f2   : > { %6626 = vst [vmem:[#allocation26_spill] sm:$0xff] %v6150_v32  ;;  %6627 = vst [vmem:[#allocation5_spill] sm:$0xff] %v6153_v5  ;;  %v2624_v21 = vcombine.high %v2616_v0, %v2616_v0  ;;  %v2590_v59 = vcombine.high %v2582_v27, %v2582_v27  ;;  %v3519_v47 = vmax.f32 %v2607_v20, %v4247_v14  ;;  %v4241_v52 = vrot.slane %v2574_v8, 9 }
 0x2f3   : > { %v3520_v57 = vmax.f32 %v2606_v49, %v4248_v29  ;;  %v3511_v9 = vmax.f32 %v2573_v30, %v4239_v11  ;;  %v3512_v50 = vmax.f32 %v2572_v40, %v4240_v58  ;;  %v4250_v60 = vrot.slane %v2616_v0, 9 }
 0x2f4   : > { %v2625_v39 = vcombine.high %v2623_v37, %v2623_v37  ;;  %v2591_v7 = vcombine.high %v2589_v22, %v2589_v22  ;;  %v4242_v45 = vrot.slane %v2582_v27, 9  ;;  %v3521_v51 = vmax.f32 %v2608_v43, %v4249_v10 }
 0x2f5   : > { %v4251_v18 = vrot.slane %v2624_v21, 9  ;;  %v4243_v5 = vrot.slane %v2590_v59, 9  ;;  %v3513_v32 = vmax.f32 %v2574_v8, %v4241_v52  ;;  %v4244_v20 = vrot.slane %v2589_v22, 9 }
 0x2f6   : > { %v3623_v14 = vmax.f32 %v3511_v9, %v3519_v47  ;;  %v3624_v29 = vmax.f32 %v3512_v50, %v3520_v57  ;;  %v4253_v11 = vrot.slane %v2625_v39, 9  ;;  %v4245_v58 = vrot.slane %v2591_v7, 9 }
 0x2f7   : > { %v3515_v43 = vmax.f32 %v2590_v59, %v4243_v5  ;;  %v3625_v8 = vmax.f32 %v3513_v32, %v3521_v51  ;;  %v3516_v52 = vmax.f32 %v2589_v22, %v4244_v20 }
 0x2f8   : > { %v3798_v5 = vrot.slane %v3624_v29, %v5961_v56 }
 0x2fa   : > { %v6183_v20 = vsel %vm3712_vm2, %v3798_v5, %v6088_v42 }
 0x311   : > { %v4387_v6 = vpop.f32.mrf.mxu1 }
 0x312   : > { %v2313_v61 = vmul.f32 %v4387_v6, %v5934_v25 }
 0x313   : > { %v2249_v44 = vpop.f32.mrf.mxu1 }
 0x314   : > { %v2311_v31 = vmul.f32 %v5934_v25, %v2249_v44  ;;  %v2352_v53 = vadd.f32 %v5940_v36, %v2313_v61  ;;  %v3622_v44 = vmax.f32 %v3510_v13, %v3518_v2  ;;  %v3522_v61 = vmax.f32 %v2616_v0, %v4250_v60 }
 0x315   : > { %v4388_v4 = vpop.f32.mrf.mxu1  ;;  %v3514_v2 = vmax.f32 %v2582_v27, %v4242_v45  ;;  %v3746_v0 = vrot.slane %v3623_v14, %v5961_v56  ;;  %v3850_v60 = vrot.slane %v3625_v8, %v5961_v56 }
 0x316   : > { %v2350_v6 = vadd.f32 %v5940_v36, %v2311_v31  ;;  %v2314_v16 = vmul.f32 %v4388_v4, %v5934_v25  ;;  %v4252_v31 = vrot.slane %v2623_v37, 9  ;;  %v2384_v49 = vmax.f32 %v2352_v53, 0.0 }
 0x317   : > { %v3689_v30 = vrot.slane %v3622_v44, %v5961_v56  ;;  %v2252_v13 = vpop.f32.mrf.mxu1  ;;  %v3523_v4 = vmax.f32 %v2624_v21, %v4251_v18  ;;  %v3517_v21 = vmax.f32 %v2591_v7, %v4245_v58  ;;  %v3626_v59 = vmax.f32 %v3514_v2, %v3522_v61 }
 0x318   : > { %v2382_v3 = vmax.f32 %v2350_v6, 0.0  ;;  %v2353_v40 = vadd.f32 %v5940_v36, %v2314_v16  ;;  %v2864_v35 = vcombine.high %v2384_v49, %v2384_v49  ;;  %v2871_v47 = vrot.slane %v2384_v49, %v5946_v34 }
 0x319   : > { %v3524_v57 = vmax.f32 %v2623_v37, %v4252_v31  ;;  %v2312_v9 = vmul.f32 %v5934_v25, %v2252_v13  ;;  %v6168_v27 = vsel %vm3712_vm2, %v3689_v30, %v6077_v12  ;;  %v3627_v32 = vmax.f32 %v3515_v43, %v3523_v4 }
 0x31a   : > { %v2830_v10 = vcombine.high %v2382_v3, %v2382_v3  ;;  %v2837_v6 = vrot.slane %v2382_v3, %v5946_v34  ;;  %v2385_v53 = vmax.f32 %v2353_v40, 0.0  ;;  %v3525_v3 = vmax.f32 %v2625_v39, %v4253_v11 }
 0x31b   : > { %v3628_v16 = vmax.f32 %v3516_v52, %v3524_v57  ;;  %v2878_v37 = vrot.slane %v2864_v35, %v5946_v34  ;;  %v2879_v44 = vcombine.high %v2871_v47, %v2871_v47  ;;  %v2351_v12 = vadd.f32 %v5940_v36, %v2312_v9 }
 0x31c   : > { %v2844_v22 = vrot.slane %v2830_v10, %v5946_v34  ;;  %v2845_v50 = vcombine.high %v2837_v6, %v2837_v6  ;;  %v4302_v45 = vrot.slane %v2837_v6, 9  ;;  %v2881_v51 = vcombine.high %v2385_v53, %v2385_v53 }
 0x31d   : > { %v6177_v18 = vsel %vm3712_vm2, %v3746_v0, %v6082_v1  ;;  %v3629_v7 = vmax.f32 %v3517_v21, %v3525_v3  ;;  %v3902_v39 = vrot.slane %v3626_v59, %v5961_v56  ;;  %v2888_v31 = vrot.slane %v2385_v53, %v5946_v34 }
 0x31e   : > { %v3954_v35 = vrot.slane %v3627_v32, %v5961_v56  ;;  %v4310_v49 = vrot.slane %v2871_v47, 9  ;;  %v2846_v14 = vcombine.high %v2844_v22, %v2844_v22  ;;  %v4303_v29 = vrot.slane %v2845_v50, 9 }
 0x31f   : > { %v4006_v61 = vrot.slane %v3628_v16, %v5961_v56  ;;  %v2880_v40 = vcombine.high %v2878_v37, %v2878_v37  ;;  %v4311_v30 = vrot.slane %v2879_v44, 9  ;;  %v6189_v1 = vsel %vm3712_vm2, %v3850_v60, %v6092_v24 }
 0x320   : > { %v4304_v11 = vrot.slane %v2844_v22, 9  ;;  %v3574_v58 = vmax.f32 %v2837_v6, %v4302_v45  ;;  %v2895_v2 = vrot.slane %v2881_v51, %v5946_v34  ;;  %v2383_v13 = vmax.f32 %v2351_v12, 0.0 }
 0x321   : > { %v4058_v42 = vrot.slane %v3629_v7, %v5961_v56  ;;  %v4312_v4 = vrot.slane %v2878_v37, 9  ;;  %v2896_v43 = vcombine.high %v2888_v31, %v2888_v31  ;;  %v6195_v10 = vsel %vm3712_vm2, %v3902_v39, %v6097_v28 }
 0x322   : > { %v3582_v8 = vmax.f32 %v2871_v47, %v4310_v49  ;;  %v4305_v52 = vrot.slane %v2846_v14, 9  ;;  %v3575_v0 = vmax.f32 %v2845_v50, %v4303_v29  ;;  %v6199_v24 = vsel %vm3712_vm2, %v3954_v35, %v6104_v48 }
 0x323   : > { %6628 = vst [vmem:[#allocation4_spill] sm:$0xff] %v6199_v24  ;;  %v4313_v57 = vrot.slane %v2880_v40, 9  ;;  %v3583_v6 = vmax.f32 %v2879_v44, %v4311_v30  ;;  %v4314_v53 = vrot.slane %v2888_v31, 9  ;;  %v6203_v9 = vsel %vm3712_vm2, %v4006_v61, %v6110_v33 }
 0x324   : > { %6629 = vst [vmem:[#allocation6_spill] sm:$0xff] %v6203_v9  ;;  %v3576_v5 = vmax.f32 %v2844_v22, %v4304_v11  ;;  %v3654_v21 = vmax.f32 %v3574_v58, %v3582_v8  ;;  %v2897_v59 = vcombine.high %v2895_v2, %v2895_v2  ;;  %v2847_v3 = vcombine.high %v2383_v13, %v2383_v13 }
 0x325   : > { %v3584_v32 = vmax.f32 %v2878_v37, %v4312_v4  ;;  %v4315_v47 = vrot.slane %v2896_v43, 9  ;;  %v6208_v48 = vsel %vm3712_vm2, %v4058_v42, %v6114_v54  ;;  %v6210_v60 = vmax.f32 %v2846_v14, %v4305_v52  ;;  %v6245_v4 = vld [vmem:[%s6441_s3] ss:$0 sm:$0xff] }
 0x326   : > { %6630 = vst [vmem:[#allocation7_spill] sm:$0xff] %v6208_v48  ;;  %v4316_v16 = vrot.slane %v2895_v2, 9  ;;  %v2854_v44 = vrot.slane %v2383_v13, %v5946_v34  ;;  %v3655_v45 = vmax.f32 %v3575_v0, %v3583_v6  ;;  %v6213_v22 = vmax.f32 %v2880_v40, %v4313_v57 }
 0x327   : > { %v6215_v51 = vmax.f32 %v2888_v31, %v4314_v53  ;;  %v6220_v7 = vrot.slane %v3654_v21, %v5961_v56  ;;  %v4317_v54 = vrot.slane %v2897_v59, 9  ;;  %v6223_v39 = vrot.slane %v2847_v3, %v5946_v34  ;;  %v6231_v31 = vld [vmem:[%s6440_s2] ss:$0 sm:$0xff] }
 0x328   : > { %v3656_v49 = vmax.f32 %v3576_v5, %v3584_v32  ;;  %v6225_v14 = vmax.f32 %v2896_v43, %v4315_v47  ;;  %v6234_v40 = vmax.f32 %v2895_v2, %v4316_v16  ;;  %v2862_v30 = vcombine.high %v2854_v44, %v2854_v44 }
 0x329   : > { %v6237_v11 = vrot.slane %v3655_v45, %v5961_v56  ;;  %v3657_v58 = vmax.f32 %v6210_v60, %v6213_v22  ;;  %v6248_v2 = vmax.f32 %v2897_v59, %v4317_v54  ;;  %v2863_v8 = vcombine.high %v6223_v39, %v6223_v39 }
 0x32a   : > { %v4306_v52 = vrot.slane %v2854_v44, 9  ;;  %v6253_v57 = vrot.slane %v3656_v49, %v5961_v56  ;;  %v4307_v3 = vrot.slane %v2862_v30, 9 }
 0x32b   : > { %6631 = vst [vmem:[#allocation31_spill] sm:$0xff] %v6248_v2 }
 0x32c   : > { %v3579_v41 = vmax.f32 %v2862_v30, %v4307_v3 }
 0x341   : > { %v4375_v28 = vpop.f32.mrf.mxu0 }
 0x342   : > { %v2301_v50 = vmul.f32 %v4375_v28, %v5934_v25  ;;  %v4308_v28 = vrot.slane %v6223_v39, 9 }
 0x343   : > { %v2201_v33 = vpop.f32.mrf.mxu0 }
 0x344   : > { %v2340_v37 = vadd.f32 %v5940_v36, %v2301_v50  ;;  %v2299_v12 = vmul.f32 %v5934_v25, %v2201_v33  ;;  %v6259_v33 = vmax.f32 %v2854_v44, %v4306_v52 }
 0x345   : > { %v4376_v35 = vpop.f32.mrf.mxu0 }
 0x346   : > { %v2372_v29 = vmax.f32 %v2340_v37, 0.0  ;;  %v2338_v61 = vadd.f32 %v5940_v36, %v2299_v12  ;;  %v2302_v25 = vmul.f32 %v6231_v31, %v4376_v35 }
 0x347   : > { %v2204_v0 = vpop.f32.mrf.mxu0 }
 0x348   : > { %v2660_v13 = vcombine.high %v2372_v29, %v2372_v29  ;;  %v2667_v42 = vrot.slane %v2372_v29, %v5946_v34  ;;  %v2370_v36 = vmax.f32 %v2338_v61, 0.0  ;;  %v2341_v43 = vadd.f32 %v6245_v4, %v2302_v25 }
 0x349   : > { %v2300_v16 = vmul.f32 %v6231_v31, %v2204_v0 }
 0x34a   : > { %v2674_v6 = vrot.slane %v2660_v13, %v5946_v34  ;;  %v2675_v53 = vcombine.high %v2667_v42, %v2667_v42  ;;  %v4262_v5 = vrot.slane %v2667_v42, 9  ;;  %v2626_v21 = vcombine.high %v2370_v36, %v2370_v36 }
 0x34b   : > { %v2633_v32 = vrot.slane %v2370_v36, %v5946_v34  ;;  %v2373_v59 = vmax.f32 %v2341_v43, 0.0  ;;  %v4309_v36 = vrot.slane %v2863_v8, 9  ;;  %v2339_v0 = vadd.f32 %v6245_v4, %v2300_v16 }
 0x34c   : > { %v2676_v47 = vcombine.high %v2674_v6, %v2674_v6  ;;  %v4263_v50 = vrot.slane %v2675_v53, 9  ;;  %v4264_v60 = vrot.slane %v2674_v6, 9  ;;  %v2640_v45 = vrot.slane %v2626_v21, %v5946_v34 }
 0x34d   : > { %v2641_v22 = vcombine.high %v2633_v32, %v2633_v32  ;;  %v4254_v37 = vrot.slane %v2633_v32, 9  ;;  %v3534_v54 = vmax.f32 %v2667_v42, %v4262_v5  ;;  %v2677_v35 = vcombine.high %v2373_v59, %v2373_v59 }
 0x34e   : > { %v4265_v12 = vrot.slane %v2676_v47, 9  ;;  %v2684_v49 = vrot.slane %v2373_v59, %v5946_v34  ;;  %v2642_v29 = vcombine.high %v2640_v45, %v2640_v45  ;;  %v4256_v25 = vrot.slane %v2640_v45, 9 }
 0x34f   : > { %v4255_v61 = vrot.slane %v2641_v22, 9  ;;  %v3526_v13 = vmax.f32 %v2633_v32, %v4254_v37  ;;  %v3535_v43 = vmax.f32 %v2675_v53, %v4263_v50  ;;  %v3536_v2 = vmax.f32 %v2674_v6, %v4264_v60 }
 0x350   : > { %v4257_v44 = vrot.slane %v2642_v29, 9  ;;  %v3528_v21 = vmax.f32 %v2640_v45, %v4256_v25  ;;  %v3537_v38 = vmax.f32 %v2676_v47, %v4265_v12  ;;  %v2691_v42 = vrot.slane %v2677_v35, %v5946_v34 }
 0x351   : > { %v3527_v52 = vmax.f32 %v2641_v22, %v4255_v61  ;;  %v3630_v48 = vmax.f32 %v3526_v13, %v3534_v54  ;;  %v2692_v5 = vcombine.high %v2684_v49, %v2684_v49  ;;  %v6267_v6 = vmax.f32 %v6223_v39, %v4308_v28 }
 0x352   : > { %v3529_v59 = vmax.f32 %v2642_v29, %v4257_v44  ;;  %v3632_v24 = vmax.f32 %v3528_v21, %v3536_v2  ;;  %v3658_v53 = vmax.f32 %v6259_v33, %v6215_v51  ;;  %v2371_v50 = vmax.f32 %v2339_v0, 0.0 }
 0x353   : > { %v3631_v9 = vmax.f32 %v3527_v52, %v3535_v43  ;;  %v3693_v32 = vrot.slane %v3630_v48, %v5961_v56  ;;  %v6272_v60 = vrot.slane %v3657_v58, %v5961_v56  ;;  %v4266_v16 = vrot.slane %v2684_v49, 9 }
 0x354   : > { %v3633_v30 = vmax.f32 %v3529_v59, %v3537_v38  ;;  %v3802_v47 = vrot.slane %v3632_v24, %v5961_v56  ;;  %v6276_v2 = vmax.f32 %v2863_v8, %v4309_v36  ;;  %v2643_v48 = vcombine.high %v2371_v50, %v2371_v50 }
 0x355   : > { %v3750_v3 = vrot.slane %v3631_v9, %v5961_v56  ;;  %v2650_v45 = vrot.slane %v2371_v50, %v5946_v34  ;;  %v3659_v39 = vmax.f32 %v3579_v41, %v6225_v14  ;;  %v3715_v51 = vsel %vm3714_vm3, %v3693_v32, %v6168_v27 }
 0x356   : > { %v4267_v28 = vrot.slane %v2692_v5, 9  ;;  %v4268_v58 = vrot.slane %v2691_v42, 9  ;;  %v3854_v38 = vrot.slane %v3633_v30, %v5961_v56  ;;  %v2657_v9 = vrot.slane %v2643_v48, %v5946_v34 }
 0x357   : > { %v2658_v33 = vcombine.high %v2650_v45, %v2650_v45  ;;  %v4258_v24 = vrot.slane %v2650_v45, 9  ;;  %v3769_v8 = vsel %vm3714_vm3, %v3750_v3, %v6177_v18  ;;  %v2693_v22 = vcombine.high %v2691_v42, %v2691_v42 }
 0x358   : > { %v3538_v37 = vmax.f32 %v2684_v49, %v4266_v16  ;;  %v3821_v12 = vsel %vm3714_vm3, %v3802_v47, %v6183_v20  ;;  %v3873_v41 = vsel %vm3714_vm3, %v3854_v38, %v6189_v1  ;;  %v2659_v27 = vcombine.high %v2657_v9, %v2657_v9 }
 0x359   : > { %v4259_v14 = vrot.slane %v2658_v33, 9  ;;  %v4260_v54 = vrot.slane %v2657_v9, 9  ;;  %v3530_v35 = vmax.f32 %v2650_v45, %v4258_v24  ;;  %v3539_v29 = vmax.f32 %v2692_v5, %v4267_v28 }
 0x35a   : > { %v3540_v61 = vmax.f32 %v2691_v42, %v4268_v58  ;;  %v3770_v25 = vsel %vm3716_vm4, %v6023_v26, %v3769_v8  ;;  %v3717_v18 = vsel %vm3716_vm4, %v6010_v17, %v3715_v51  ;;  %v4261_v13 = vrot.slane %v2659_v27, 9 }
 0x35b   : > { %v3531_v49 = vmax.f32 %v2658_v33, %v4259_v14  ;;  %v3532_v36 = vmax.f32 %v2657_v9, %v4260_v54  ;;  %v3634_v43 = vmax.f32 %v3530_v35, %v3538_v37  ;;  %v4269_v20 = vrot.slane %v2693_v22, 9 }
 0x35c   : > { %v3822_v1 = vsel %vm3716_vm4, %v6026_v46, %v3821_v12  ;;  %v3874_v44 = vsel %vm3716_vm4, %v6031_v62, %v3873_v41  ;;  %v6299_v52 = vrot.slane %v3658_v53, %v5961_v56  ;;  %v3719_v17 = vsel %vm3718_vm5, %v6126_v55, %v3717_v18 }
 0x35d   : > { %v4391_v0 = vpop.f32.mrf.mxu1  ;;  %v3635_v21 = vmax.f32 %v3531_v49, %v3539_v29  ;;  %v3636_v26 = vmax.f32 %v3532_v36, %v3540_v61  ;;  %v3906_v42 = vrot.slane %v3634_v43, %v5961_v56  ;;  %v3771_v32 = vsel %vm3718_vm5, %v6130_v23, %v3770_v25 }
 0x35e   : > { %v2317_v5 = vmul.f32 %v6231_v31, %v4391_v0  ;;  %v6308_v46 = vrot.slane %v3659_v39, %v5961_v56  ;;  %v3660_v62 = vmax.f32 %v6267_v6, %v6234_v40  ;;  %v6312_v53 = vmax.f32 %v2659_v27, %v4261_v13  ;;  %v6633_v27 = vld [vmem:[#allocation6_spill] sm:$0xff] }
 0x35f   : > { %v2265_v59 = vpop.f32.mrf.mxu1  ;;  %v3823_v30 = vsel %vm3718_vm5, %v6133_v63, %v3822_v1  ;;  %v3875_v55 = vsel %vm3718_vm5, %v6137_v15, %v3874_v44  ;;  %v6319_v3 = vmax.f32 %v2693_v22, %v4269_v20  ;;  %v3958_v23 = vrot.slane %v3635_v21, %v5961_v56 }
 0x360   : > { %v2315_v50 = vmul.f32 %v6231_v31, %v2265_v59  ;;  %v2356_v47 = vadd.f32 %v6245_v4, %v2317_v5  ;;  %v6325_v48 = vsel %vm3720_vm6, %v6220_v7, %v3719_v17  ;;  %v4010_v45 = vrot.slane %v3636_v26, %v5961_v56 }
 0x361   : > { %v4392_v16 = vpop.f32.mrf.mxu1  ;;  %v3925_v15 = vsel %vm3714_vm3, %v3906_v42, %v6195_v10  ;;  %v6334_v58 = vsel %vm3720_vm6, %v6237_v11, %v3771_v32  ;;  %v6338_v38 = vsel %vm3720_vm6, %v6253_v57, %v3823_v30  ;;  %v6342_v7 = vsel %vm3720_vm6, %v6272_v60, %v3875_v55  ;;  %v6632_v57 = vld [vmem:[#allocation4_spill] sm:$0xff] }
 0x362   : > { %v2354_v39 = vadd.f32 %v6245_v4, %v2315_v50  ;;  %v2318_v63 = vmul.f32 %v6231_v31, %v4392_v16  ;;  %v2388_v51 = vmax.f32 %v2356_v47, 0.0  ;;  %v3637_v9 = vmax.f32 %v6312_v53, %v6319_v3 }
 0x363   : > { %v2268_v28 = vpop.f32.mrf.mxu1  ;;  %v3926_v22 = vsel %vm3716_vm4, %v6037_v19, %v3925_v15  ;;  %v3977_v37 = vsel %vm3714_vm3, %v3958_v23, %v6632_v57  ;;  %v4029_v14 = vsel %vm3714_vm3, %v4010_v45, %v6633_v27  ;;  %v6634_v45 = vld [vmem:[#allocation19_spill] sm:$0xff] }
 0x364   : > { %v2386_v33 = vmax.f32 %v2354_v39, 0.0  ;;  %v2357_v10 = vadd.f32 %v6245_v4, %v2318_v63  ;;  %v2316_v24 = vmul.f32 %v6231_v31, %v2268_v28  ;;  %v2932_v8 = vcombine.high %v2388_v51, %v2388_v51  ;;  %v6635_v63 = vld [vmem:[#allocation14_spill] sm:$0xff] }
 0x365   : > { %v2939_v11 = vrot.slane %v2388_v51, %v5946_v34  ;;  %v3927_v39 = vsel %vm3718_vm5, %v6634_v45, %v3926_v22  ;;  %v3978_v15 = vsel %vm3716_vm4, %v6635_v63, %v3977_v37 }
 0x366   : > { %v2898_v12 = vcombine.high %v2386_v33, %v2386_v33  ;;  %v2905_v60 = vrot.slane %v2386_v33, %v5946_v34  ;;  %v2389_v41 = vmax.f32 %v2357_v10, 0.0  ;;  %v2946_v54 = vrot.slane %v2932_v8, %v5946_v34  ;;  %v6636_v10 = vld [vmem:[#allocation16_spill] sm:$0xff] }
 0x367   : > { %v2947_v35 = vcombine.high %v2939_v11, %v2939_v11  ;;  %v4326_v31 = vrot.slane %v2939_v11, 9  ;;  %v2355_v29 = vadd.f32 %v6245_v4, %v2316_v24  ;;  %v4030_v24 = vsel %vm3716_vm4, %v6636_v10, %v4029_v14 }
 0x368   : > { %v2912_v61 = vrot.slane %v2898_v12, %v5946_v34  ;;  %v2913_v25 = vcombine.high %v2905_v60, %v2905_v60  ;;  %v4318_v19 = vrot.slane %v2905_v60, 9  ;;  %v2949_v18 = vcombine.high %v2389_v41, %v2389_v41 }
 0x369   : > { %v2948_v13 = vcombine.high %v2946_v54, %v2946_v54  ;;  %v4327_v49 = vrot.slane %v2947_v35, 9  ;;  %v4328_v36 = vrot.slane %v2946_v54, 9  ;;  %v3598_v43 = vmax.f32 %v2939_v11, %v4326_v31 }
 0x36a   : > { %v2914_v20 = vcombine.high %v2912_v61, %v2912_v61  ;;  %v4319_v0 = vrot.slane %v2913_v25, 9  ;;  %v4320_v1 = vrot.slane %v2912_v61, 9  ;;  %v3590_v44 = vmax.f32 %v2905_v60, %v4318_v19 }
 0x36b   : > { %v4329_v21 = vrot.slane %v2948_v13, 9  ;;  %v3599_v26 = vmax.f32 %v2947_v35, %v4327_v49  ;;  %v3600_v42 = vmax.f32 %v2946_v54, %v4328_v36  ;;  %v2956_v17 = vrot.slane %v2389_v41, %v5946_v34 }
 0x36c   : > { %v4321_v4 = vrot.slane %v2914_v20, 9  ;;  %v3591_v5 = vmax.f32 %v2913_v25, %v4319_v0  ;;  %v3592_v59 = vmax.f32 %v2912_v61, %v4320_v1  ;;  %v3662_v32 = vmax.f32 %v3590_v44, %v3598_v43 }
 0x36d   : > { %v2963_v50 = vrot.slane %v2949_v18, %v5946_v34  ;;  %v2964_v30 = vcombine.high %v2956_v17, %v2956_v17  ;;  %v4330_v55 = vrot.slane %v2956_v17, 9  ;;  %v2387_v23 = vmax.f32 %v2355_v29, 0.0 }
 0x36e   : > { %v3663_v47 = vmax.f32 %v3591_v5, %v3599_v26  ;;  %v3664_v16 = vmax.f32 %v3592_v59, %v3600_v42  ;;  %v3593_v33 = vmax.f32 %v2914_v20, %v4321_v4  ;;  %v3709_v60 = vrot.slane %v3662_v32, %v5961_v56  ;;  %v6639_v59 = vld [vmem:[#allocation26_spill] sm:$0xff]  ;;  %v6640_v32 = vld [vmem:[#allocation31_spill] sm:$0xff] }
 0x36f   : > { %v2965_v51 = vcombine.high %v2963_v50, %v2963_v50  ;;  %v4331_v28 = vrot.slane %v2964_v30, 9  ;;  %v2915_v8 = vcombine.high %v2387_v23, %v2387_v23  ;;  %v2922_v11 = vrot.slane %v2387_v23, %v5946_v34 }
 0x370   : > { %v3766_v57 = vrot.slane %v3663_v47, %v5961_v56  ;;  %v3818_v12 = vrot.slane %v3664_v16, %v5961_v56  ;;  %v4332_v22 = vrot.slane %v2963_v50, 9  ;;  %v3602_v41 = vmax.f32 %v2956_v17, %v4330_v55  ;;  %v6638_v17 = vld [vmem:[#allocation7_spill] sm:$0xff] }
 0x371   : > { %v3601_v27 = vmax.f32 %v2948_v13, %v4329_v21  ;;  %v2929_v37 = vrot.slane %v2915_v8, %v5946_v34  ;;  %v2930_v54 = vcombine.high %v2922_v11, %v2922_v11  ;;  %v4322_v35 = vrot.slane %v2922_v11, 9  ;;  %v6637_v21 = vld [vmem:[#allocation18_spill] sm:$0xff] }
 0x372   : > { %v3773_v14 = vsel %vm3722_vm7, %v3766_v57, %v6334_v58  ;;  %v4333_v31 = vrot.slane %v2965_v51, 9  ;;  %v3603_v29 = vmax.f32 %v2964_v30, %v4331_v28  ;;  %v3825_v61 = vsel %vm3722_vm7, %v3818_v12, %v6338_v38  ;;  %v6641_v30 = vld [vmem:[#allocation30_spill] sm:$0xff] }
 0x373   : > { %3774 = vrot.lane.b32.xlu0 %v3773_v14, %s4452_s22  ;;  %v3665_v25 = vmax.f32 %v3593_v33, %v3601_v27  ;;  %v2931_v34 = vcombine.high %v2929_v37, %v2929_v37  ;;  %v4323_v19 = vrot.slane %v2930_v54, 9  ;;  %v4324_v18 = vrot.slane %v2929_v37, 9  ;;  %3826 = vrot.lane.b32.xlu1 %v3825_v61, %s4454_s24  ;;  %s4460_s22 = smov 40   ;;  %s4462_s24 = smov 56  }
 0x374   : > { %v3594_v13 = vmax.f32 %v2922_v11, %v4322_v35  ;;  %v3604_v58 = vmax.f32 %v2963_v50, %v4332_v22  ;;  %v4062_v38 = vrot.slane %v3637_v9, %v5961_v56  ;;  %v3723_v36 = vsel %vm3722_vm7, %v3709_v60, %v6325_v48 }
 0x375   : > { %v3870_v49 = vrot.slane %v3665_v25, %v5961_v56  ;;  %v4325_v43 = vrot.slane %v2931_v34, 9  ;;  %v3595_v20 = vmax.f32 %v2930_v54, %v4323_v19  ;;  %v3596_v0 = vmax.f32 %v2929_v37, %v4324_v18  ;;  %3726 = vst.msk [vmem:[%s6381_s21] sm:$0xff] %vm3725_vm8, %v3723_v36 }
 0x376   : > { %v3666_v1 = vmax.f32 %v3594_v13, %v3602_v41  ;;  %v3979_v26 = vsel %vm3718_vm5, %v6637_v21, %v3978_v15  ;;  %v3605_v42 = vmax.f32 %v2965_v51, %v4333_v31  ;;  %v4081_v53 = vsel %vm3714_vm3, %v4062_v38, %v6638_v17  ;;  %v6642_v15 = vld [vmem:[#allocation5_spill] sm:$0xff] }
 0x377   : > { %v3877_v44 = vsel %vm3722_vm7, %v3870_v49, %v6342_v7  ;;  %v3667_v48 = vmax.f32 %v3595_v20, %v3603_v29  ;;  %v3668_v9 = vmax.f32 %v3596_v0, %v3604_v58  ;;  %v3597_v4 = vmax.f32 %v2931_v34, %v4325_v43 }
 0x378   : > { %3878 = vrot.lane.b32.xlu0 %v3877_v44, %s4456_s26  ;;  %v3922_v3 = vrot.slane %v3666_v1, %v5961_v56  ;;  %v3928_v5 = vsel %vm3720_vm6, %v6299_v52, %v3927_v39  ;;  %v4031_v7 = vsel %vm3718_vm5, %v6639_v59, %v4030_v24  ;;  %v3661_v50 = vmax.f32 %v6276_v2, %v6640_v32 }
 0x379   : > { %v4082_v55 = vsel %vm3716_vm4, %v6641_v30, %v4081_v53  ;;  %v3974_v47 = vrot.slane %v3667_v48, %v5961_v56  ;;  %v4026_v16 = vrot.slane %v3668_v9, %v5961_v56  ;;  %v3669_v45 = vmax.f32 %v3597_v4, %v3605_v42 }
 0x37a   : > { %v3929_v23 = vsel %vm3722_vm7, %v3922_v3, %v3928_v5  ;;  %v3980_v52 = vsel %vm3720_vm6, %v6308_v46, %v3979_v26  ;;  %v4022_v2 = vrot.slane %v3660_v62, %v5961_v56  ;;  %v4083_v51 = vsel %vm3718_vm5, %v6642_v15, %v4082_v55 }
 0x37b   : > { %3930 = vrot.lane.b32.xlu1 %v3929_v23, %s4458_s6  ;;  %v3981_v39 = vsel %vm3722_vm7, %v3974_v47, %v3980_v52  ;;  %v4078_v63 = vrot.slane %v3669_v45, %v5961_v56  ;;  %v4074_v46 = vrot.slane %v3661_v50, %v5961_v56 }
 0x37c   : > { %3982 = vrot.lane.b32.xlu0 %v3981_v39, %s4460_s22  ;;  %v4032_v28 = vsel %vm3720_vm6, %v4022_v2, %v4031_v7 }
 0x37d   : > { %v4033_v33 = vsel %vm3722_vm7, %v4026_v16, %v4032_v28  ;;  %v4084_v40 = vsel %vm3720_vm6, %v4074_v46, %v4083_v51 }
 0x37e   : > { %v4085_v6 = vsel %vm3722_vm7, %v4078_v63, %v4084_v40 }
 0x37f   : > { %4034 = vrot.lane.b32.xlu1 %v4033_v33, %s4461_s23 }
 0x380   : > { %4086 = vrot.lane.b32.xlu0 %v4085_v6, %s4462_s24 }
 0x3e5   : > { %v3775_v62 = vpop.permute.xlu0 %3774  ;;  %v3827_v10 = vpop.permute.xlu1 %3826 }
 0x3e6   : > { %3778 = vst.msk [vmem:[%s6381_s21] sm:$0xff] %vm3777_vm9, %v3775_v62 }
 0x3e7   : > { %3830 = vst.msk [vmem:[%s6381_s21] sm:$0xff] %vm3829_vm10, %v3827_v10 }
 0x3ea   : > { %v3879_v56 = vpop.permute.xlu0 %3878 }
 0x3eb   : > { %3882 = vst.msk [vmem:[%s6381_s21] sm:$0xff] %vm3881_vm11, %v3879_v56 }
 0x3ed   : > { %v3931_v24 = vpop.permute.xlu1 %3930 }
 0x3ee   : > { %3934 = vst.msk [vmem:[%s6381_s21] sm:$0xff] %vm3933_vm12, %v3931_v24  ;;  %v3983_v8 = vpop.permute.xlu0 %3982 }
 0x3ef   : > { %3986 = vst.msk [vmem:[%s6381_s21] sm:$0xff] %vm3985_vm13, %v3983_v8 }
 0x3f1   : > { %v4035_v11 = vpop.permute.xlu1 %4034 }
 0x3f2   : > { %4038 = vst.msk [vmem:[%s6381_s21] sm:$0xff] %vm4037_vm14, %v4035_v11  ;;  %v4087_v57 = vpop.permute.xlu0 %4086 }
 0x3f3   : > { %4090 = vst.msk [vmem:[%s6381_s21] sm:$0xff] %vm4089_vm15, %v4087_v57 }
 0x3f4 PF: > { %s14_s15 = sadd.s32 1, %s4449_s15  }
 0x3f5   : > { %p11_p4 = scmp.ge.s32.totalorder %s14_s15, 4  }
 0x3f7   :  { %13 = sbr.rel (!%p11_p4) target bundleno = 1 (0x1), region = 66 }

</bundles_post_ra>
